<compile_context>
chip_gen: v7x
topology: tpu7x:2x2x1
jax: 0.10.0
libtpu: 0.0.40
codegen_flags: <defaults>
</compile_context>

<pallas_src>
import jax
import jax.numpy as jnp
import numpy as np
from jax.experimental import pallas as pl
from jax.experimental.pallas import tpu as pltpu

BN_EPS = 1e-5


def _round_up(x, m):
    return (x + m - 1) // m * m


# ----------------------------- Pallas kernel ------------------------------- #

def _conv_bn_relu_pool_kernel(p_ref, w_ref, b_ref, o_ref):
    """Fused conv (im2col matmul) + BN (folded) + ReLU + 2x2 maxpool.

    p_ref: (4*M, K)  four im2col slabs (one per 2x2 pool-window position),
                     stacked along rows; K padded to a multiple of 128.
    w_ref: (K, 128)  conv weights with BN scale folded in; channels padded to 128.
    b_ref: (1, 128)  folded bias (conv bias + BN shift); padded channels are 0.
    o_ref: (M, 128)  pooled output rows (M multiple of 8, lane-dense 128 channels).
    """
    m = o_ref.shape[0]
    y = jnp.dot(p_ref[...], w_ref[...], preferred_element_type=jnp.float32)
    y = jnp.maximum(y + b_ref[...], 0.0)
    o_ref[...] = jnp.maximum(jnp.maximum(y[0 * m:1 * m], y[1 * m:2 * m]),
                             jnp.maximum(y[2 * m:3 * m], y[3 * m:4 * m]))


# ------------------------------- glue code --------------------------------- #

def conv_bn_relu_pool_layer(x, layer_params, pad):
    """Conv2d(k, stride=1, padding=pad) + BatchNorm(eval) + ReLU + MaxPool2d(2,2)."""
    w_hwio, conv_b, gamma, beta, r_mean, r_var = layer_params
    B, H, W, Cin = x.shape
    k = w_hwio.shape[0]
    Cout = w_hwio.shape[-1]

    # im2col with feature order (dy, dx, c) to match the HWIO weight reshape.
    xp = jnp.pad(x, ((0, 0), (pad, pad), (pad, pad), (0, 0)))
    Ho = H + 2 * pad - k + 1
    Wo = W + 2 * pad - k + 1
    cols = [xp[:, dy:dy + Ho, dx:dx + Wo, :] for dy in range(k) for dx in range(k)]
    patches = jnp.concatenate(cols, axis=-1)             # (B, Ho, Wo, k*k*Cin)
    P = k * k * Cin
    Hq, Wq = Ho // 2, Wo // 2                            # MaxPool2d floor mode
    Mp = B * Hq * Wq

    # Group patches by 2x2 pool-window position; stack the 4 slabs along rows.
    slabs = [patches[:, a:2 * Hq:2, c:2 * Wq:2, :].reshape(Mp, P)
             for a in range(2) for c in range(2)]
    p4 = jnp.stack(slabs, axis=0)                        # (4, Mp, P)

    # Alignment: rows -> multiple of 8, K -> multiple of 128, Cout -> 128 lanes.
    M8 = _round_up(Mp, 8)
    K128 = _round_up(P, 128)
    C128 = _round_up(Cout, 128)
    p4 = jnp.pad(p4, ((0, 0), (0, M8 - Mp), (0, K128 - P)))
    p2d = p4.reshape(4 * M8, K128)

    # Fold BN scale into the weight columns; fold conv bias + BN shift into bias.
    scale = gamma / jnp.sqrt(r_var + BN_EPS)
    w_mat = w_hwio.reshape(P, Cout) * scale[None, :]
    bias = scale * (conv_b - r_mean) + beta
    w_mat = jnp.pad(w_mat, ((0, K128 - P), (0, C128 - Cout)))
    bias = jnp.pad(bias, (0, C128 - Cout)).reshape(1, C128)

    out = pl.pallas_call(
        _conv_bn_relu_pool_kernel,
        out_shape=jax.ShapeDtypeStruct((M8, C128), jnp.float32),
        grid=(1,),
        in_specs=[
            pl.BlockSpec((4 * M8, K128), lambda i: (0, 0)),
            pl.BlockSpec((K128, C128), lambda i: (0, 0)),
            pl.BlockSpec((1, C128), lambda i: (0, 0)),
        ],
        out_specs=pl.BlockSpec((M8, C128), lambda i: (0, 0)),
        compiler_params=pltpu.CompilerParams(dimension_semantics=("arbitrary",)),
    )(p2d, w_mat, bias)

    # Drop padded rows / channels (padding columns were zero-scaled, so valid data
    # is exact); reshape back to NHWC for the next layer.
    return out[:Mp, :Cout].reshape(B, Hq, Wq, Cout)


def cnn3_forward(params, x_nchw):
    x = jnp.transpose(x_nchw, (0, 2, 3, 1))                    # NCHW -> NHWC
    h = conv_bn_relu_pool_layer(x, params["layer1"], pad=2)    # conv 5x5, pad 2
    h = conv_bn_relu_pool_layer(h, params["layer2"], pad=2)    # conv 5x5, pad 2
    h = conv_bn_relu_pool_layer(h, params["layer3"], pad=2)    # conv 3x3, pad 2
    B, Hq, Wq, C = h.shape
    # PyTorch flattens NCHW; fold that permutation into the FC weight so the
    # activation flatten is a free NHWC reshape (no standalone transpose op).
    wfc = params["fc_w"].reshape(C, Hq, Wq, -1).transpose(1, 2, 0, 3)
    wfc = wfc.reshape(Hq * Wq * C, -1)
    flat = h.reshape(B, Hq * Wq * C)
    return flat @ wfc + params["fc_b"]


cnn3_forward_jit = jax.jit(cnn3_forward)


# --------------------------- parameter generation -------------------------- #

def init_params(key, in_channel):
    keys = jax.random.split(key, 8)

    def conv_bn(kw, kb, k, cin, cout):
        fan_in = k * k * cin
        w = jax.random.normal(kw, (k, k, cin, cout), jnp.float32) / np.sqrt(fan_in)
        b = jax.random.normal(kb, (cout,), jnp.float32) * 0.01
        gamma = jnp.ones((cout,), jnp.float32)
        beta = jnp.zeros((cout,), jnp.float32)
        r_mean = jnp.zeros((cout,), jnp.float32)
        r_var = jnp.ones((cout,), jnp.float32)
        return (w, b, gamma, beta, r_mean, r_var)

    return {
        "layer1": conv_bn(keys[0], keys[1], 5, in_channel, 16),
        "layer2": conv_bn(keys[2], keys[3], 5, 16, 32),
        "layer3": conv_bn(keys[4], keys[5], 3, 32, 64),
        "fc_w": jax.random.normal(keys[6], (4 * 4 * 64, 10), jnp.float32) / np.sqrt(1024.0),
        "fc_b": jax.random.normal(keys[7], (10,), jnp.float32) * 0.01,
    }


# ------------------------------- reference --------------------------------- #

@jax.jit
def reference_forward(params, x_nchw):
    x = jnp.transpose(x_nchw, (0, 2, 3, 1))

    def layer(h, p, pad):
        w, b, g, be, rm, rv = p
        y = jax.lax.conv_general_dilated(
            h, w, window_strides=(1, 1), padding=[(pad, pad), (pad, pad)],
            dimension_numbers=("NHWC", "HWIO", "NHWC")) + b
        y = (y - rm) / jnp.sqrt(rv + BN_EPS) * g + be
        y = jnp.maximum(y, 0.0)
        return jax.lax.reduce_window(y, -jnp.inf, jax.lax.max,
                                     (1, 2, 2, 1), (1, 2, 2, 1), "VALID")

    h = layer(x, params["layer1"], 2)
    h = layer(h, params["layer2"], 2)
    h = layer(h, params["layer3"], 2)
    flat = jnp.transpose(h, (0, 3, 1, 2)).reshape(h.shape[0], -1)
    return flat @ params["fc_w"] + params["fc_b"]


# ---------------------------------- main ------------------------------------ #

if __name__ == "__main__":
    key = jax.random.PRNGKey(0)
    kp, kx = jax.random.split(key)
    in_channel = 3
    # Spatial 28x28 is required by the module's fc = Linear(4*4*64, 10).
    x = jax.random.normal(kx, (2, in_channel, 28, 28), jnp.float32)  # NCHW, like PyTorch
    params = init_params(kp, in_channel)

    out = jax.block_until_ready(cnn3_forward_jit(params, x))
    ref = jax.block_until_ready(reference_forward(params, x))

    assert out.shape == (2, 10), out.shape
    np.testing.assert_allclose(np.asarray(out), np.asarray(ref), rtol=2e-3, atol=2e-3)
    print("KERNEL_OK")
</pallas_src>

<mosaic_0001>
module attributes {stable_mosaic.version = 11 : i64} {
  func.func @_conv_bn_relu_pool_kernel(%arg0: i32, %arg1: memref<1568x128xf32, #tpu.memory_space<vmem>>, %arg2: memref<128x128xf32, #tpu.memory_space<vmem>>, %arg3: memref<1x128xf32, #tpu.memory_space<vmem>>, %arg4: memref<392x128xf32, #tpu.memory_space<vmem>>) attributes {dimension_semantics = [#tpu.dimension_semantics<arbitrary>], iteration_bounds = array<i64: 1>, scalar_prefetch = 0 : i64, scratch_operands = 0 : i64, tpu.core_type = #tpu.core_type<tc>, window_params = [{pipeline_mode = #tpu.pipeline_mode<synchronous>, transform_indices = @transform_0, window_bounds = array<i64: 1568, 128>}, {pipeline_mode = #tpu.pipeline_mode<synchronous>, transform_indices = @transform_1, window_bounds = array<i64: 128, 128>}, {pipeline_mode = #tpu.pipeline_mode<synchronous>, transform_indices = @transform_2, window_bounds = array<i64: 1, 128>}, {pipeline_mode = #tpu.pipeline_mode<synchronous>, transform_indices = @transform_3, window_bounds = array<i64: 392, 128>}]} {
    %c0 = arith.constant 0 : index
    %c0_0 = arith.constant 0 : index
    %0 = vector.load %arg1[%c0, %c0_0] : memref<1568x128xf32, #tpu.memory_space<vmem>>, vector<1568x128xf32>
    %c0_1 = arith.constant 0 : index
    %c0_2 = arith.constant 0 : index
    %1 = vector.load %arg2[%c0_1, %c0_2] : memref<128x128xf32, #tpu.memory_space<vmem>>, vector<128x128xf32>
    %cst = arith.constant dense<0.000000e+00> : vector<1568x128xf32>
    %2 = tpu.matmul %0, %1, %cst {dimension_numbers = #tpu.dot_dimension_numbers<[1], [0], [0], [1], [0, 0, 1, 1], [], []>} : vector<1568x128xf32>, vector<128x128xf32>, vector<1568x128xf32> -> vector<1568x128xf32>
    %c0_3 = arith.constant 0 : index
    %c0_4 = arith.constant 0 : index
    %3 = vector.load %arg3[%c0_3, %c0_4] : memref<1x128xf32, #tpu.memory_space<vmem>>, vector<1x128xf32>
    %4 = vector.broadcast %3 : vector<1x128xf32> to vector<1568x128xf32>
    %5 = arith.addf %2, %4 : vector<1568x128xf32>
    %cst_5 = arith.constant 0.000000e+00 : f32
    %6 = vector.broadcast %cst_5 : f32 to vector<1568x128xf32>
    %7 = arith.maximumf %5, %6 : vector<1568x128xf32>
    %8 = vector.extract_strided_slice %7 {offsets = [0, 0], sizes = [392, 128], strides = [1, 1]} : vector<1568x128xf32> to vector<392x128xf32>
    %9 = vector.extract_strided_slice %7 {offsets = [392, 0], sizes = [392, 128], strides = [1, 1]} : vector<1568x128xf32> to vector<392x128xf32>
    %10 = arith.maximumf %8, %9 : vector<392x128xf32>
    %11 = vector.extract_strided_slice %7 {offsets = [784, 0], sizes = [392, 128], strides = [1, 1]} : vector<1568x128xf32> to vector<392x128xf32>
    %12 = vector.extract_strided_slice %7 {offsets = [1176, 0], sizes = [392, 128], strides = [1, 1]} : vector<1568x128xf32> to vector<392x128xf32>
    %13 = arith.maximumf %11, %12 : vector<392x128xf32>
    %14 = arith.maximumf %10, %13 : vector<392x128xf32>
    %c0_6 = arith.constant 0 : index
    %c0_7 = arith.constant 0 : index
    %15 = vector.load %arg4[%c0_6, %c0_7] : memref<392x128xf32, #tpu.memory_space<vmem>>, vector<392x128xf32>
    tpu.vector_store %arg4[%c0_6, %c0_7], %14 {strides = array<i32>} : memref<392x128xf32, #tpu.memory_space<vmem>>, vector<392x128xf32>,
    return
  }
  func.func @transform_0(%arg0: i32) -> (i32, i32) {
    %c0_i32 = arith.constant 0 : i32
    %c0_i32_0 = arith.constant 0 : i32
    %c0_i32_1 = arith.constant 0 : i32
    return %c0_i32, %c0_i32_0 : i32, i32
  }
  func.func @transform_1(%arg0: i32) -> (i32, i32) {
    %c0_i32 = arith.constant 0 : i32
    %c0_i32_0 = arith.constant 0 : i32
    %c0_i32_1 = arith.constant 0 : i32
    return %c0_i32, %c0_i32_0 : i32, i32
  }
  func.func @transform_2(%arg0: i32) -> (i32, i32) {
    %c0_i32 = arith.constant 0 : i32
    %c0_i32_0 = arith.constant 0 : i32
    %c0_i32_1 = arith.constant 0 : i32
    return %c0_i32, %c0_i32_0 : i32, i32
  }
  func.func @transform_3(%arg0: i32) -> (i32, i32) {
    %c0_i32 = arith.constant 0 : i32
    %c0_i32_0 = arith.constant 0 : i32
    %c0_i32_1 = arith.constant 0 : i32
    return %c0_i32, %c0_i32_0 : i32, i32
  }
}

module attributes {stable_mosaic.version = 11 : i64} {
  func.func @_conv_bn_relu_pool_kernel(%arg0: i32, %arg1: memref<416x512xf32, #tpu.memory_space<vmem>>, %arg2: memref<512x128xf32, #tpu.memory_space<vmem>>, %arg3: memref<1x128xf32, #tpu.memory_space<vmem>>, %arg4: memref<104x128xf32, #tpu.memory_space<vmem>>) attributes {dimension_semantics = [#tpu.dimension_semantics<arbitrary>], iteration_bounds = array<i64: 1>, scalar_prefetch = 0 : i64, scratch_operands = 0 : i64, tpu.core_type = #tpu.core_type<tc>, window_params = [{pipeline_mode = #tpu.pipeline_mode<synchronous>, transform_indices = @transform_0, window_bounds = array<i64: 416, 512>}, {pipeline_mode = #tpu.pipeline_mode<synchronous>, transform_indices = @transform_1, window_bounds = array<i64: 512, 128>}, {pipeline_mode = #tpu.pipeline_mode<synchronous>, transform_indices = @transform_2, window_bounds = array<i64: 1, 128>}, {pipeline_mode = #tpu.pipeline_mode<synchronous>, transform_indices = @transform_3, window_bounds = array<i64: 104, 128>}]} {
    %c0 = arith.constant 0 : index
    %c0_0 = arith.constant 0 : index
    %0 = vector.load %arg1[%c0, %c0_0] : memref<416x512xf32, #tpu.memory_space<vmem>>, vector<416x512xf32>
    %c0_1 = arith.constant 0 : index
    %c0_2 = arith.constant 0 : index
    %1 = vector.load %arg2[%c0_1, %c0_2] : memref<512x128xf32, #tpu.memory_space<vmem>>, vector<512x128xf32>
    %cst = arith.constant dense<0.000000e+00> : vector<416x128xf32>
    %2 = tpu.matmul %0, %1, %cst {dimension_numbers = #tpu.dot_dimension_numbers<[1], [0], [0], [1], [0, 0, 1, 1], [], []>} : vector<416x512xf32>, vector<512x128xf32>, vector<416x128xf32> -> vector<416x128xf32>
    %c0_3 = arith.constant 0 : index
    %c0_4 = arith.constant 0 : index
    %3 = vector.load %arg3[%c0_3, %c0_4] : memref<1x128xf32, #tpu.memory_space<vmem>>, vector<1x128xf32>
    %4 = vector.broadcast %3 : vector<1x128xf32> to vector<416x128xf32>
    %5 = arith.addf %2, %4 : vector<416x128xf32>
    %cst_5 = arith.constant 0.000000e+00 : f32
    %6 = vector.broadcast %cst_5 : f32 to vector<416x128xf32>
    %7 = arith.maximumf %5, %6 : vector<416x128xf32>
    %8 = vector.extract_strided_slice %7 {offsets = [0, 0], sizes = [104, 128], strides = [1, 1]} : vector<416x128xf32> to vector<104x128xf32>
    %9 = vector.extract_strided_slice %7 {offsets = [104, 0], sizes = [104, 128], strides = [1, 1]} : vector<416x128xf32> to vector<104x128xf32>
    %10 = arith.maximumf %8, %9 : vector<104x128xf32>
    %11 = vector.extract_strided_slice %7 {offsets = [208, 0], sizes = [104, 128], strides = [1, 1]} : vector<416x128xf32> to vector<104x128xf32>
    %12 = vector.extract_strided_slice %7 {offsets = [312, 0], sizes = [104, 128], strides = [1, 1]} : vector<416x128xf32> to vector<104x128xf32>
    %13 = arith.maximumf %11, %12 : vector<104x128xf32>
    %14 = arith.maximumf %10, %13 : vector<104x128xf32>
    %c0_6 = arith.constant 0 : index
    %c0_7 = arith.constant 0 : index
    %15 = vector.load %arg4[%c0_6, %c0_7] : memref<104x128xf32, #tpu.memory_space<vmem>>, vector<104x128xf32>
    tpu.vector_store %arg4[%c0_6, %c0_7], %14 {strides = array<i32>} : memref<104x128xf32, #tpu.memory_space<vmem>>, vector<104x128xf32>,
    return
  }
  func.func @transform_0(%arg0: i32) -> (i32, i32) {
    %c0_i32 = arith.constant 0 : i32
    %c0_i32_0 = arith.constant 0 : i32
    %c0_i32_1 = arith.constant 0 : i32
    return %c0_i32, %c0_i32_0 : i32, i32
  }
  func.func @transform_1(%arg0: i32) -> (i32, i32) {
    %c0_i32 = arith.constant 0 : i32
    %c0_i32_0 = arith.constant 0 : i32
    %c0_i32_1 = arith.constant 0 : i32
    return %c0_i32, %c0_i32_0 : i32, i32
  }
  func.func @transform_2(%arg0: i32) -> (i32, i32) {
    %c0_i32 = arith.constant 0 : i32
    %c0_i32_0 = arith.constant 0 : i32
    %c0_i32_1 = arith.constant 0 : i32
    return %c0_i32, %c0_i32_0 : i32, i32
  }
  func.func @transform_3(%arg0: i32) -> (i32, i32) {
    %c0_i32 = arith.constant 0 : i32
    %c0_i32_0 = arith.constant 0 : i32
    %c0_i32_1 = arith.constant 0 : i32
    return %c0_i32, %c0_i32_0 : i32, i32
  }
}

module attributes {stable_mosaic.version = 11 : i64} {
  func.func @_conv_bn_relu_pool_kernel(%arg0: i32, %arg1: memref<128x384xf32, #tpu.memory_space<vmem>>, %arg2: memref<384x128xf32, #tpu.memory_space<vmem>>, %arg3: memref<1x128xf32, #tpu.memory_space<vmem>>, %arg4: memref<32x128xf32, #tpu.memory_space<vmem>>) attributes {dimension_semantics = [#tpu.dimension_semantics<arbitrary>], iteration_bounds = array<i64: 1>, scalar_prefetch = 0 : i64, scratch_operands = 0 : i64, tpu.core_type = #tpu.core_type<tc>, window_params = [{pipeline_mode = #tpu.pipeline_mode<synchronous>, transform_indices = @transform_0, window_bounds = array<i64: 128, 384>}, {pipeline_mode = #tpu.pipeline_mode<synchronous>, transform_indices = @transform_1, window_bounds = array<i64: 384, 128>}, {pipeline_mode = #tpu.pipeline_mode<synchronous>, transform_indices = @transform_2, window_bounds = array<i64: 1, 128>}, {pipeline_mode = #tpu.pipeline_mode<synchronous>, transform_indices = @transform_3, window_bounds = array<i64: 32, 128>}]} {
    %c0 = arith.constant 0 : index
    %c0_0 = arith.constant 0 : index
    %0 = vector.load %arg1[%c0, %c0_0] : memref<128x384xf32, #tpu.memory_space<vmem>>, vector<128x384xf32>
    %c0_1 = arith.constant 0 : index
    %c0_2 = arith.constant 0 : index
    %1 = vector.load %arg2[%c0_1, %c0_2] : memref<384x128xf32, #tpu.memory_space<vmem>>, vector<384x128xf32>
    %cst = arith.constant dense<0.000000e+00> : vector<128x128xf32>
    %2 = tpu.matmul %0, %1, %cst {dimension_numbers = #tpu.dot_dimension_numbers<[1], [0], [0], [1], [0, 0, 1, 1], [], []>} : vector<128x384xf32>, vector<384x128xf32>, vector<128x128xf32> -> vector<128x128xf32>
    %c0_3 = arith.constant 0 : index
    %c0_4 = arith.constant 0 : index
    %3 = vector.load %arg3[%c0_3, %c0_4] : memref<1x128xf32, #tpu.memory_space<vmem>>, vector<1x128xf32>
    %4 = vector.broadcast %3 : vector<1x128xf32> to vector<128x128xf32>
    %5 = arith.addf %2, %4 : vector<128x128xf32>
    %cst_5 = arith.constant 0.000000e+00 : f32
    %6 = vector.broadcast %cst_5 : f32 to vector<128x128xf32>
    %7 = arith.maximumf %5, %6 : vector<128x128xf32>
    %8 = vector.extract_strided_slice %7 {offsets = [0, 0], sizes = [32, 128], strides = [1, 1]} : vector<128x128xf32> to vector<32x128xf32>
    %9 = vector.extract_strided_slice %7 {offsets = [32, 0], sizes = [32, 128], strides = [1, 1]} : vector<128x128xf32> to vector<32x128xf32>
    %10 = arith.maximumf %8, %9 : vector<32x128xf32>
    %11 = vector.extract_strided_slice %7 {offsets = [64, 0], sizes = [32, 128], strides = [1, 1]} : vector<128x128xf32> to vector<32x128xf32>
    %12 = vector.extract_strided_slice %7 {offsets = [96, 0], sizes = [32, 128], strides = [1, 1]} : vector<128x128xf32> to vector<32x128xf32>
    %13 = arith.maximumf %11, %12 : vector<32x128xf32>
    %14 = arith.maximumf %10, %13 : vector<32x128xf32>
    %c0_6 = arith.constant 0 : index
    %c0_7 = arith.constant 0 : index
    %15 = vector.load %arg4[%c0_6, %c0_7] : memref<32x128xf32, #tpu.memory_space<vmem>>, vector<32x128xf32>
    tpu.vector_store %arg4[%c0_6, %c0_7], %14 {strides = array<i32>} : memref<32x128xf32, #tpu.memory_space<vmem>>, vector<32x128xf32>,
    return
  }
  func.func @transform_0(%arg0: i32) -> (i32, i32) {
    %c0_i32 = arith.constant 0 : i32
    %c0_i32_0 = arith.constant 0 : i32
    %c0_i32_1 = arith.constant 0 : i32
    return %c0_i32, %c0_i32_0 : i32, i32
  }
  func.func @transform_1(%arg0: i32) -> (i32, i32) {
    %c0_i32 = arith.constant 0 : i32
    %c0_i32_0 = arith.constant 0 : i32
    %c0_i32_1 = arith.constant 0 : i32
    return %c0_i32, %c0_i32_0 : i32, i32
  }
  func.func @transform_2(%arg0: i32) -> (i32, i32) {
    %c0_i32 = arith.constant 0 : i32
    %c0_i32_0 = arith.constant 0 : i32
    %c0_i32_1 = arith.constant 0 : i32
    return %c0_i32, %c0_i32_0 : i32, i32
  }
  func.func @transform_3(%arg0: i32) -> (i32, i32) {
    %c0_i32 = arith.constant 0 : i32
    %c0_i32_0 = arith.constant 0 : i32
    %c0_i32_1 = arith.constant 0 : i32
    return %c0_i32, %c0_i32_0 : i32, i32
  }
}

</mosaic_0001>

<bundles_post_ra>
// kernel: cnn3_forward.3
= control target key start
LH: loop header
LB: loop body
LE: loop exit
PB: predicated region body
PF: predicated region fallthrough
CT: control target
= control target key end

     0   :  { %s4039_s1 = inlined_call_operand.vmem [shape: f32[128,128], index: 1, kind: input, shape index: {}]   ;;  %s4040_s0 = inlined_call_operand.vmem [shape: f32[1568,128], index: 0, kind: input, shape index: {}]   ;;  %s4041_s2 = inlined_call_operand.vmem [shape: f32[1,128], index: 2, kind: input, shape index: {}]   ;;  %s4042_s3 = inlined_call_operand.vmem [shape: f32[392,128], index: 3, kind: output, shape index: {}]  }
   0x1   :  { %v210_v0 = vld [vmem:[%s4039_s1] sm:$0xff]  ;;  %v211_v1 = vld [vmem:[%s4039_s1 + $0x8] sm:$0xff]  ;;  %v212_v2 = vld [vmem:[%s4039_s1 + $0x10] sm:$0xff] }
   0x2   :  { %v2213_v3 = vpack.c.bf16 %v211_v1, %v210_v0  ;;  %v213_v4 = vld [vmem:[%s4039_s1 + $0x18] sm:$0xff]  ;;  %v214_v6 = vld [vmem:[%s4039_s1 + $0x20] sm:$0xff]  ;;  %v215_v7 = vld [vmem:[%s4039_s1 + $0x28] sm:$0xff] }
   0x3   :  { %v2217_v5 = vpack.c.bf16 %v213_v4, %v212_v2  ;;  %v2221_v8 = vpack.c.bf16 %v215_v7, %v214_v6  ;;  %v14_v9 = vld [vmem:[%s4040_s0] sm:$0xff]  ;;  %v112_v10 = vld [vmem:[%s4040_s0 + $0x310] sm:$0xff]  ;;  %v217_v12 = vld [vmem:[%s4039_s1 + $0x38] sm:$0xff] }
   0x4   :  { %2214 = vmatprep.subr.bf16.mxu0 %v2213_v3  ;;  %2245 = vmatprep.subr.bf16.mxu1 %v2213_v3  ;;  %v216_v11 = vld [vmem:[%s4039_s1 + $0x30] sm:$0xff]  ;;  %v218_v14 = vld [vmem:[%s4039_s1 + $0x40] sm:$0xff]  ;;  %v219_v15 = vld [vmem:[%s4039_s1 + $0x48] sm:$0xff] }
   0x5   :  { %2216 = vmatpush3.bf16.msra.mxu0 %v2213_v3  ;;  %2253 = vmatpush3.bf16.msra.mxu1 %v2213_v3  ;;  %v2225_v13 = vpack.c.bf16 %v217_v12, %v216_v11  ;;  %v2229_v16 = vpack.c.bf16 %v219_v15, %v218_v14  ;;  %v220_v17 = vld [vmem:[%s4039_s1 + $0x50] sm:$0xff]  ;;  %v221_v18 = vld [vmem:[%s4039_s1 + $0x58] sm:$0xff]  ;;  %v222_v20 = vld [vmem:[%s4039_s1 + $0x60] sm:$0xff] }
   0x6   :  { %2218 = vmatprep.subr.bf16.mxu0 %v2217_v5  ;;  %2246 = vmatprep.subr.bf16.mxu1 %v2217_v5  ;;  %v2233_v19 = vpack.c.bf16 %v221_v18, %v220_v17  ;;  %v223_v21 = vld [vmem:[%s4039_s1 + $0x68] sm:$0xff]  ;;  %v224_v23 = vld [vmem:[%s4039_s1 + $0x70] sm:$0xff]  ;;  %v225_v24 = vld [vmem:[%s4039_s1 + $0x78] sm:$0xff] }
   0x7   :  { %1919 = vmatprep.mubr.f32.mxu0 %v14_v9  ;;  %2066 = vmatprep.mubr.f32.mxu1 %v112_v10  ;;  %v2237_v22 = vpack.c.bf16 %v223_v21, %v222_v20  ;;  %v2241_v25 = vpack.c.bf16 %v225_v24, %v224_v23  ;;  %v15_v26 = vld [vmem:[%s4040_s0 + $0x8] sm:$0xff]  ;;  %v113_v27 = vld [vmem:[%s4040_s0 + $0x318] sm:$0xff]  ;;  %v16_v28 = vld [vmem:[%s4040_s0 + $0x10] sm:$0xff] }
   0x8   :  { %v114_v29 = vld [vmem:[%s4040_s0 + $0x320] sm:$0xff]  ;;  %v17_v30 = vld [vmem:[%s4040_s0 + $0x18] sm:$0xff]  ;;  %v115_v31 = vld [vmem:[%s4040_s0 + $0x328] sm:$0xff] }
   0x9   :  { %2220 = vmatpush3.bf16.msra.mxu0 %v2217_v5  ;;  %2254 = vmatpush3.bf16.msra.mxu1 %v2217_v5  ;;  %v18_v32 = vld [vmem:[%s4040_s0 + $0x20] sm:$0xff]  ;;  %v116_v33 = vld [vmem:[%s4040_s0 + $0x330] sm:$0xff]  ;;  %v19_v34 = vld [vmem:[%s4040_s0 + $0x28] sm:$0xff] }
   0xa   :  { %2222 = vmatprep.subr.bf16.mxu0 %v2221_v8  ;;  %2247 = vmatprep.subr.bf16.mxu1 %v2221_v8  ;;  %v117_v35 = vld [vmem:[%s4040_s0 + $0x338] sm:$0xff]  ;;  %v20_v36 = vld [vmem:[%s4040_s0 + $0x30] sm:$0xff]  ;;  %v118_v37 = vld [vmem:[%s4040_s0 + $0x340] sm:$0xff] }
   0xb   :  { %v21_v38 = vld [vmem:[%s4040_s0 + $0x38] sm:$0xff]  ;;  %v119_v39 = vld [vmem:[%s4040_s0 + $0x348] sm:$0xff]  ;;  %v22_v40 = vld [vmem:[%s4040_s0 + $0x40] sm:$0xff] }
   0xc   :  { %v120_v41 = vld [vmem:[%s4040_s0 + $0x350] sm:$0xff]  ;;  %v23_v42 = vld [vmem:[%s4040_s0 + $0x48] sm:$0xff]  ;;  %v121_v43 = vld [vmem:[%s4040_s0 + $0x358] sm:$0xff] }
   0xd   :  { %2224 = vmatpush3.bf16.msra.mxu0 %v2221_v8  ;;  %2255 = vmatpush3.bf16.msra.mxu1 %v2221_v8  ;;  %v24_v44 = vld [vmem:[%s4040_s0 + $0x50] sm:$0xff]  ;;  %v122_v45 = vld [vmem:[%s4040_s0 + $0x360] sm:$0xff]  ;;  %v25_v46 = vld [vmem:[%s4040_s0 + $0x58] sm:$0xff] }
   0xe   :  { %2226 = vmatprep.subr.bf16.mxu0 %v2225_v13  ;;  %2248 = vmatprep.subr.bf16.mxu1 %v2225_v13  ;;  %v123_v47 = vld [vmem:[%s4040_s0 + $0x368] sm:$0xff]  ;;  %v26_v48 = vld [vmem:[%s4040_s0 + $0x60] sm:$0xff]  ;;  %v124_v49 = vld [vmem:[%s4040_s0 + $0x370] sm:$0xff] }
   0xf   :  { %v27_v50 = vld [vmem:[%s4040_s0 + $0x68] sm:$0xff]  ;;  %v125_v51 = vld [vmem:[%s4040_s0 + $0x378] sm:$0xff]  ;;  %v28_v52 = vld [vmem:[%s4040_s0 + $0x70] sm:$0xff] }
  0x10   :  { %v126_v53 = vld [vmem:[%s4040_s0 + $0x380] sm:$0xff]  ;;  %v29_v54 = vld [vmem:[%s4040_s0 + $0x78] sm:$0xff]  ;;  %v127_v55 = vld [vmem:[%s4040_s0 + $0x388] sm:$0xff] }
  0x11   :  { %2228 = vmatpush3.bf16.msra.mxu0 %v2225_v13  ;;  %2256 = vmatpush3.bf16.msra.mxu1 %v2225_v13  ;;  %v30_v56 = vld [vmem:[%s4040_s0 + $0x80] sm:$0xff]  ;;  %v128_v57 = vld [vmem:[%s4040_s0 + $0x390] sm:$0xff]  ;;  %v31_v58 = vld [vmem:[%s4040_s0 + $0x88] sm:$0xff] }
  0x12   :  { %2230 = vmatprep.subr.bf16.mxu0 %v2229_v16  ;;  %2249 = vmatprep.subr.bf16.mxu1 %v2229_v16  ;;  %v129_v59 = vld [vmem:[%s4040_s0 + $0x398] sm:$0xff]  ;;  %v32_v60 = vld [vmem:[%s4040_s0 + $0x90] sm:$0xff]  ;;  %v130_v61 = vld [vmem:[%s4040_s0 + $0x3a0] sm:$0xff] }
  0x13   :  { %v33_v62 = vld [vmem:[%s4040_s0 + $0x98] sm:$0xff]  ;;  %v131_v63 = vld [vmem:[%s4040_s0 + $0x3a8] sm:$0xff]  ;;  %v34_v0 = vld [vmem:[%s4040_s0 + $0xa0] sm:$0xff] }
  0x14   :  { %v132_v1 = vld [vmem:[%s4040_s0 + $0x3b0] sm:$0xff]  ;;  %v35_v2 = vld [vmem:[%s4040_s0 + $0xa8] sm:$0xff]  ;;  %v133_v3 = vld [vmem:[%s4040_s0 + $0x3b8] sm:$0xff] }
  0x15   :  { %2232 = vmatpush3.bf16.msra.mxu0 %v2229_v16  ;;  %2257 = vmatpush3.bf16.msra.mxu1 %v2229_v16  ;;  %v36_v4 = vld [vmem:[%s4040_s0 + $0xb0] sm:$0xff]  ;;  %v134_v5 = vld [vmem:[%s4040_s0 + $0x3c0] sm:$0xff]  ;;  %v37_v6 = vld [vmem:[%s4040_s0 + $0xb8] sm:$0xff] }
  0x16   :  { %2234 = vmatprep.subr.bf16.mxu0 %v2233_v19  ;;  %2250 = vmatprep.subr.bf16.mxu1 %v2233_v19  ;;  %v135_v7 = vld [vmem:[%s4040_s0 + $0x3c8] sm:$0xff]  ;;  %v38_v8 = vld [vmem:[%s4040_s0 + $0xc0] sm:$0xff]  ;;  %v136_v9 = vld [vmem:[%s4040_s0 + $0x3d0] sm:$0xff] }
  0x17   :  { %v39_v10 = vld [vmem:[%s4040_s0 + $0xc8] sm:$0xff]  ;;  %v137_v11 = vld [vmem:[%s4040_s0 + $0x3d8] sm:$0xff]  ;;  %v40_v12 = vld [vmem:[%s4040_s0 + $0xd0] sm:$0xff] }
  0x18   :  { %v138_v13 = vld [vmem:[%s4040_s0 + $0x3e0] sm:$0xff]  ;;  %v41_v14 = vld [vmem:[%s4040_s0 + $0xd8] sm:$0xff]  ;;  %v139_v15 = vld [vmem:[%s4040_s0 + $0x3e8] sm:$0xff] }
  0x19   :  { %2236 = vmatpush3.bf16.msra.mxu0 %v2233_v19  ;;  %2258 = vmatpush3.bf16.msra.mxu1 %v2233_v19  ;;  %v42_v16 = vld [vmem:[%s4040_s0 + $0xe0] sm:$0xff]  ;;  %v140_v17 = vld [vmem:[%s4040_s0 + $0x3f0] sm:$0xff]  ;;  %v43_v18 = vld [vmem:[%s4040_s0 + $0xe8] sm:$0xff] }
  0x1a   :  { %2238 = vmatprep.subr.bf16.mxu0 %v2237_v22  ;;  %2251 = vmatprep.subr.bf16.mxu1 %v2237_v22  ;;  %v141_v19 = vld [vmem:[%s4040_s0 + $0x3f8] sm:$0xff]  ;;  %v44_v20 = vld [vmem:[%s4040_s0 + $0xf0] sm:$0xff]  ;;  %v142_v21 = vld [vmem:[%s4040_s0 + $0x400] sm:$0xff] }
  0x1b   :  { %v143_v23 = vld [vmem:[%s4040_s0 + $0x408] sm:$0xff]  ;;  %v46_v24 = vld [vmem:[%s4040_s0 + $0x100] sm:$0xff] }
  0x1d   :  { %2240 = vmatpush3.bf16.msra.mxu0 %v2237_v22  ;;  %2259 = vmatpush3.bf16.msra.mxu1 %v2237_v22  ;;  %v45_v22 = vld [vmem:[%s4040_s0 + $0xf8] sm:$0xff] }
  0x1e   :  { %2242 = vmatprep.subr.bf16.mxu0 %v2241_v25  ;;  %2252 = vmatprep.subr.bf16.mxu1 %v2241_v25 }
  0x21   :  { %2244 = vmatpush3.bf16.msra.mxu0 %v2241_v25  ;;  %2260 = vmatpush3.bf16.msra.mxu1 %v2241_v25  ;;  %v144_v25 = vld [vmem:[%s4040_s0 + $0x410] sm:$0xff] }
  0x24   :  { %1920 = vmatmul.mubr.f32.vlgmr.msra.gmra.mrb[0].mxu0 %v15_v26  ;;  %2067 = vmatmul.mubr.f32.vlgmr.msra.gmra.mrb[0].mxu1 %v113_v27  ;;  %v47_v26 = vld [vmem:[%s4040_s0 + $0x108] sm:$0xff]  ;;  %v145_v27 = vld [vmem:[%s4040_s0 + $0x418] sm:$0xff] }
  0x25   :  { %1922 = vmatprep.mubr.f32.mxu0 %v16_v28  ;;  %2069 = vmatprep.mubr.f32.mxu1 %v114_v29  ;;  %v48_v28 = vld [vmem:[%s4040_s0 + $0x110] sm:$0xff]  ;;  %v146_v29 = vld [vmem:[%s4040_s0 + $0x420] sm:$0xff] }
  0x28   :  { %1923 = vmatmul.mubr.f32.gmra.mrb[2].mxu0 %v17_v30  ;;  %2070 = vmatmul.mubr.f32.gmra.mrb[2].mxu1 %v115_v31  ;;  %v49_v30 = vld [vmem:[%s4040_s0 + $0x118] sm:$0xff]  ;;  %v147_v31 = vld [vmem:[%s4040_s0 + $0x428] sm:$0xff] }
  0x29   :  { %1925 = vmatprep.mubr.f32.mxu0 %v18_v32  ;;  %2072 = vmatprep.mubr.f32.mxu1 %v116_v33  ;;  %v50_v32 = vld [vmem:[%s4040_s0 + $0x120] sm:$0xff]  ;;  %v148_v33 = vld [vmem:[%s4040_s0 + $0x430] sm:$0xff] }
  0x2c   :  { %1926 = vmatmul.mubr.f32.gmra.mrb[4].mxu0 %v19_v34  ;;  %2073 = vmatmul.mubr.f32.gmra.mrb[4].mxu1 %v117_v35  ;;  %v51_v34 = vld [vmem:[%s4040_s0 + $0x128] sm:$0xff]  ;;  %v149_v35 = vld [vmem:[%s4040_s0 + $0x438] sm:$0xff] }
  0x2d   :  { %1928 = vmatprep.mubr.f32.mxu0 %v20_v36  ;;  %2075 = vmatprep.mubr.f32.mxu1 %v118_v37  ;;  %v52_v36 = vld [vmem:[%s4040_s0 + $0x130] sm:$0xff]  ;;  %v150_v37 = vld [vmem:[%s4040_s0 + $0x440] sm:$0xff] }
  0x30   :  { %1929 = vmatmul.mubr.f32.gmra.mrb[6].mxu0 %v21_v38  ;;  %2076 = vmatmul.mubr.f32.gmra.mrb[6].mxu1 %v119_v39  ;;  %v53_v38 = vld [vmem:[%s4040_s0 + $0x138] sm:$0xff]  ;;  %v151_v39 = vld [vmem:[%s4040_s0 + $0x448] sm:$0xff] }
  0x31   :  { %1931 = vmatprep.mubr.f32.mxu0 %v22_v40  ;;  %2078 = vmatprep.mubr.f32.mxu1 %v120_v41  ;;  %v54_v40 = vld [vmem:[%s4040_s0 + $0x140] sm:$0xff]  ;;  %v152_v41 = vld [vmem:[%s4040_s0 + $0x450] sm:$0xff] }
  0x34   :  { %1932 = vmatmul.mubr.f32.gmra.mrb[8].mxu0 %v23_v42  ;;  %2079 = vmatmul.mubr.f32.gmra.mrb[8].mxu1 %v121_v43  ;;  %v55_v42 = vld [vmem:[%s4040_s0 + $0x148] sm:$0xff]  ;;  %v153_v43 = vld [vmem:[%s4040_s0 + $0x458] sm:$0xff] }
  0x35   :  { %1934 = vmatprep.mubr.f32.mxu0 %v24_v44  ;;  %2081 = vmatprep.mubr.f32.mxu1 %v122_v45  ;;  %v56_v44 = vld [vmem:[%s4040_s0 + $0x150] sm:$0xff]  ;;  %v154_v45 = vld [vmem:[%s4040_s0 + $0x460] sm:$0xff] }
  0x38   :  { %1935 = vmatmul.mubr.f32.gmra.mrb[10].mxu0 %v25_v46  ;;  %2082 = vmatmul.mubr.f32.gmra.mrb[10].mxu1 %v123_v47  ;;  %v57_v46 = vld [vmem:[%s4040_s0 + $0x158] sm:$0xff]  ;;  %v155_v47 = vld [vmem:[%s4040_s0 + $0x468] sm:$0xff] }
  0x39   :  { %1937 = vmatprep.mubr.f32.mxu0 %v26_v48  ;;  %2084 = vmatprep.mubr.f32.mxu1 %v124_v49  ;;  %v58_v48 = vld [vmem:[%s4040_s0 + $0x160] sm:$0xff]  ;;  %v156_v49 = vld [vmem:[%s4040_s0 + $0x470] sm:$0xff] }
  0x3c   :  { %1938 = vmatmul.mubr.f32.gmra.mrb[12].mxu0 %v27_v50  ;;  %2085 = vmatmul.mubr.f32.gmra.mrb[12].mxu1 %v125_v51  ;;  %v59_v50 = vld [vmem:[%s4040_s0 + $0x168] sm:$0xff]  ;;  %v157_v51 = vld [vmem:[%s4040_s0 + $0x478] sm:$0xff] }
  0x3d   :  { %1940 = vmatprep.mubr.f32.mxu0 %v28_v52  ;;  %2087 = vmatprep.mubr.f32.mxu1 %v126_v53  ;;  %v60_v52 = vld [vmem:[%s4040_s0 + $0x170] sm:$0xff]  ;;  %v158_v53 = vld [vmem:[%s4040_s0 + $0x480] sm:$0xff] }
  0x40   :  { %1941 = vmatmul.mubr.f32.gmra.mrb[14].mxu0 %v29_v54  ;;  %2088 = vmatmul.mubr.f32.gmra.mrb[14].mxu1 %v127_v55  ;;  %v61_v54 = vld [vmem:[%s4040_s0 + $0x178] sm:$0xff]  ;;  %v159_v55 = vld [vmem:[%s4040_s0 + $0x488] sm:$0xff] }
  0x41   :  { %1943 = vmatprep.mubr.f32.mxu0 %v30_v56  ;;  %2090 = vmatprep.mubr.f32.mxu1 %v128_v57  ;;  %v62_v56 = vld [vmem:[%s4040_s0 + $0x180] sm:$0xff]  ;;  %v160_v57 = vld [vmem:[%s4040_s0 + $0x490] sm:$0xff] }
  0x44   :  { %1944 = vmatmul.mubr.f32.gmra.mrb[16].mxu0 %v31_v58  ;;  %2091 = vmatmul.mubr.f32.gmra.mrb[16].mxu1 %v129_v59  ;;  %v63_v58 = vld [vmem:[%s4040_s0 + $0x188] sm:$0xff]  ;;  %v161_v59 = vld [vmem:[%s4040_s0 + $0x498] sm:$0xff] }
  0x45   :  { %1946 = vmatprep.mubr.f32.mxu0 %v32_v60  ;;  %2093 = vmatprep.mubr.f32.mxu1 %v130_v61  ;;  %v64_v60 = vld [vmem:[%s4040_s0 + $0x190] sm:$0xff]  ;;  %v162_v61 = vld [vmem:[%s4040_s0 + $0x4a0] sm:$0xff] }
  0x48   :  { %1947 = vmatmul.mubr.f32.gmra.mrb[18].mxu0 %v33_v62  ;;  %2094 = vmatmul.mubr.f32.gmra.mrb[18].mxu1 %v131_v63  ;;  %v65_v62 = vld [vmem:[%s4040_s0 + $0x198] sm:$0xff]  ;;  %v163_v63 = vld [vmem:[%s4040_s0 + $0x4a8] sm:$0xff] }
  0x49   :  { %1949 = vmatprep.mubr.f32.mxu0 %v34_v0  ;;  %2096 = vmatprep.mubr.f32.mxu1 %v132_v1  ;;  %v66_v0 = vld [vmem:[%s4040_s0 + $0x1a0] sm:$0xff]  ;;  %v164_v1 = vld [vmem:[%s4040_s0 + $0x4b0] sm:$0xff] }
  0x4c   :  { %1950 = vmatmul.mubr.f32.gmra.mrb[20].mxu0 %v35_v2  ;;  %2097 = vmatmul.mubr.f32.gmra.mrb[20].mxu1 %v133_v3  ;;  %v67_v2 = vld [vmem:[%s4040_s0 + $0x1a8] sm:$0xff]  ;;  %v165_v3 = vld [vmem:[%s4040_s0 + $0x4b8] sm:$0xff] }
  0x4d   :  { %1952 = vmatprep.mubr.f32.mxu0 %v36_v4  ;;  %2099 = vmatprep.mubr.f32.mxu1 %v134_v5  ;;  %v68_v4 = vld [vmem:[%s4040_s0 + $0x1b0] sm:$0xff]  ;;  %v166_v5 = vld [vmem:[%s4040_s0 + $0x4c0] sm:$0xff] }
  0x50   :  { %1953 = vmatmul.mubr.f32.gmra.mrb[22].mxu0 %v37_v6  ;;  %2100 = vmatmul.mubr.f32.gmra.mrb[22].mxu1 %v135_v7  ;;  %v69_v6 = vld [vmem:[%s4040_s0 + $0x1b8] sm:$0xff]  ;;  %v167_v7 = vld [vmem:[%s4040_s0 + $0x4c8] sm:$0xff] }
  0x51   :  { %1955 = vmatprep.mubr.f32.mxu0 %v38_v8  ;;  %2102 = vmatprep.mubr.f32.mxu1 %v136_v9  ;;  %v70_v8 = vld [vmem:[%s4040_s0 + $0x1c0] sm:$0xff]  ;;  %v168_v9 = vld [vmem:[%s4040_s0 + $0x4d0] sm:$0xff] }
  0x54   :  { %1956 = vmatmul.mubr.f32.gmra.mrb[24].mxu0 %v39_v10  ;;  %2103 = vmatmul.mubr.f32.gmra.mrb[24].mxu1 %v137_v11  ;;  %v71_v10 = vld [vmem:[%s4040_s0 + $0x1c8] sm:$0xff]  ;;  %v169_v11 = vld [vmem:[%s4040_s0 + $0x4d8] sm:$0xff] }
  0x55   :  { %1958 = vmatprep.mubr.f32.mxu0 %v40_v12  ;;  %2105 = vmatprep.mubr.f32.mxu1 %v138_v13  ;;  %v72_v12 = vld [vmem:[%s4040_s0 + $0x1d0] sm:$0xff]  ;;  %v170_v13 = vld [vmem:[%s4040_s0 + $0x4e0] sm:$0xff] }
  0x58   :  { %1959 = vmatmul.mubr.f32.gmra.mrb[26].mxu0 %v41_v14  ;;  %2106 = vmatmul.mubr.f32.gmra.mrb[26].mxu1 %v139_v15  ;;  %v73_v14 = vld [vmem:[%s4040_s0 + $0x1d8] sm:$0xff]  ;;  %v171_v15 = vld [vmem:[%s4040_s0 + $0x4e8] sm:$0xff] }
  0x59   :  { %1961 = vmatprep.mubr.f32.mxu0 %v42_v16  ;;  %2108 = vmatprep.mubr.f32.mxu1 %v140_v17  ;;  %v74_v16 = vld [vmem:[%s4040_s0 + $0x1e0] sm:$0xff]  ;;  %v172_v17 = vld [vmem:[%s4040_s0 + $0x4f0] sm:$0xff] }
  0x5c   :  { %1962 = vmatmul.mubr.f32.gmra.mrb[28].mxu0 %v43_v18  ;;  %2109 = vmatmul.mubr.f32.gmra.mrb[28].mxu1 %v141_v19  ;;  %v75_v18 = vld [vmem:[%s4040_s0 + $0x1e8] sm:$0xff]  ;;  %v173_v19 = vld [vmem:[%s4040_s0 + $0x4f8] sm:$0xff] }
  0x5d   :  { %1964 = vmatprep.mubr.f32.mxu0 %v44_v20  ;;  %2111 = vmatprep.mubr.f32.mxu1 %v142_v21  ;;  %v76_v20 = vld [vmem:[%s4040_s0 + $0x1f0] sm:$0xff]  ;;  %v174_v21 = vld [vmem:[%s4040_s0 + $0x500] sm:$0xff] }
  0x60   :  { %1965 = vmatmul.mubr.f32.gmra.mrb[30].mxu0 %v45_v22  ;;  %2112 = vmatmul.mubr.f32.gmra.mrb[30].mxu1 %v143_v23  ;;  %v77_v22 = vld [vmem:[%s4040_s0 + $0x1f8] sm:$0xff]  ;;  %v175_v23 = vld [vmem:[%s4040_s0 + $0x508] sm:$0xff] }
  0x61   :  { %1967 = vmatprep.mubr.f32.mxu0 %v46_v24  ;;  %2114 = vmatprep.mubr.f32.mxu1 %v144_v25  ;;  %v78_v24 = vld [vmem:[%s4040_s0 + $0x200] sm:$0xff]  ;;  %v176_v25 = vld [vmem:[%s4040_s0 + $0x510] sm:$0xff] }
  0x64   :  { %1968 = vmatmul.mubr.f32.gmra.mrb[32].mxu0 %v47_v26  ;;  %2115 = vmatmul.mubr.f32.gmra.mrb[32].mxu1 %v145_v27  ;;  %v79_v26 = vld [vmem:[%s4040_s0 + $0x208] sm:$0xff]  ;;  %v177_v27 = vld [vmem:[%s4040_s0 + $0x518] sm:$0xff] }
  0x65   :  { %1970 = vmatprep.mubr.f32.mxu0 %v48_v28  ;;  %2117 = vmatprep.mubr.f32.mxu1 %v146_v29  ;;  %v80_v28 = vld [vmem:[%s4040_s0 + $0x210] sm:$0xff]  ;;  %v178_v29 = vld [vmem:[%s4040_s0 + $0x520] sm:$0xff] }
  0x68   :  { %1971 = vmatmul.mubr.f32.gmra.mrb[34].mxu0 %v49_v30  ;;  %2118 = vmatmul.mubr.f32.gmra.mrb[34].mxu1 %v147_v31  ;;  %v81_v30 = vld [vmem:[%s4040_s0 + $0x218] sm:$0xff]  ;;  %v179_v31 = vld [vmem:[%s4040_s0 + $0x528] sm:$0xff] }
  0x69   :  { %1973 = vmatprep.mubr.f32.mxu0 %v50_v32  ;;  %2120 = vmatprep.mubr.f32.mxu1 %v148_v33  ;;  %v82_v32 = vld [vmem:[%s4040_s0 + $0x220] sm:$0xff]  ;;  %v180_v33 = vld [vmem:[%s4040_s0 + $0x530] sm:$0xff] }
  0x6c   :  { %1974 = vmatmul.mubr.f32.gmra.mrb[36].mxu0 %v51_v34  ;;  %2121 = vmatmul.mubr.f32.gmra.mrb[36].mxu1 %v149_v35  ;;  %v83_v34 = vld [vmem:[%s4040_s0 + $0x228] sm:$0xff]  ;;  %v181_v35 = vld [vmem:[%s4040_s0 + $0x538] sm:$0xff] }
  0x6d   :  { %1976 = vmatprep.mubr.f32.mxu0 %v52_v36  ;;  %2123 = vmatprep.mubr.f32.mxu1 %v150_v37  ;;  %v84_v36 = vld [vmem:[%s4040_s0 + $0x230] sm:$0xff]  ;;  %v182_v37 = vld [vmem:[%s4040_s0 + $0x540] sm:$0xff] }
  0x70   :  { %1977 = vmatmul.mubr.f32.gmra.mrb[38].mxu0 %v53_v38  ;;  %2124 = vmatmul.mubr.f32.gmra.mrb[38].mxu1 %v151_v39  ;;  %v85_v38 = vld [vmem:[%s4040_s0 + $0x238] sm:$0xff]  ;;  %v183_v39 = vld [vmem:[%s4040_s0 + $0x548] sm:$0xff] }
  0x71   :  { %1979 = vmatprep.mubr.f32.mxu0 %v54_v40  ;;  %2126 = vmatprep.mubr.f32.mxu1 %v152_v41  ;;  %v86_v40 = vld [vmem:[%s4040_s0 + $0x240] sm:$0xff]  ;;  %v184_v41 = vld [vmem:[%s4040_s0 + $0x550] sm:$0xff] }
  0x74   :  { %1980 = vmatmul.mubr.f32.gmra.mrb[40].mxu0 %v55_v42  ;;  %2127 = vmatmul.mubr.f32.gmra.mrb[40].mxu1 %v153_v43  ;;  %v87_v42 = vld [vmem:[%s4040_s0 + $0x248] sm:$0xff]  ;;  %v185_v43 = vld [vmem:[%s4040_s0 + $0x558] sm:$0xff] }
  0x75   :  { %1982 = vmatprep.mubr.f32.mxu0 %v56_v44  ;;  %2129 = vmatprep.mubr.f32.mxu1 %v154_v45  ;;  %v88_v44 = vld [vmem:[%s4040_s0 + $0x250] sm:$0xff]  ;;  %v186_v45 = vld [vmem:[%s4040_s0 + $0x560] sm:$0xff] }
  0x78   :  { %1983 = vmatmul.mubr.f32.gmra.mrb[42].mxu0 %v57_v46  ;;  %2130 = vmatmul.mubr.f32.gmra.mrb[42].mxu1 %v155_v47  ;;  %v89_v46 = vld [vmem:[%s4040_s0 + $0x258] sm:$0xff]  ;;  %v187_v47 = vld [vmem:[%s4040_s0 + $0x568] sm:$0xff] }
  0x79   :  { %1985 = vmatprep.mubr.f32.mxu0 %v58_v48  ;;  %2132 = vmatprep.mubr.f32.mxu1 %v156_v49  ;;  %v90_v48 = vld [vmem:[%s4040_s0 + $0x260] sm:$0xff]  ;;  %v188_v49 = vld [vmem:[%s4040_s0 + $0x570] sm:$0xff] }
  0x7c   :  { %1986 = vmatmul.mubr.f32.gmra.mrb[44].mxu0 %v59_v50  ;;  %2133 = vmatmul.mubr.f32.gmra.mrb[44].mxu1 %v157_v51  ;;  %v91_v50 = vld [vmem:[%s4040_s0 + $0x268] sm:$0xff]  ;;  %v189_v51 = vld [vmem:[%s4040_s0 + $0x578] sm:$0xff] }
  0x7d   :  { %1988 = vmatprep.mubr.f32.mxu0 %v60_v52  ;;  %2135 = vmatprep.mubr.f32.mxu1 %v158_v53  ;;  %v92_v52 = vld [vmem:[%s4040_s0 + $0x270] sm:$0xff]  ;;  %v190_v53 = vld [vmem:[%s4040_s0 + $0x580] sm:$0xff] }
  0x80   :  { %1989 = vmatmul.mubr.f32.gmra.mrb[46].mxu0 %v61_v54  ;;  %2136 = vmatmul.mubr.f32.gmra.mrb[46].mxu1 %v159_v55  ;;  %v93_v54 = vld [vmem:[%s4040_s0 + $0x278] sm:$0xff]  ;;  %v191_v55 = vld [vmem:[%s4040_s0 + $0x588] sm:$0xff] }
  0x81   :  { %1991 = vmatprep.mubr.f32.mxu0 %v62_v56  ;;  %2138 = vmatprep.mubr.f32.mxu1 %v160_v57  ;;  %v94_v56 = vld [vmem:[%s4040_s0 + $0x280] sm:$0xff]  ;;  %v192_v57 = vld [vmem:[%s4040_s0 + $0x590] sm:$0xff] }
  0x84   :  { %1992 = vmatmul.mubr.f32.gmra.mrb[48].mxu0 %v63_v58  ;;  %2139 = vmatmul.mubr.f32.gmra.mrb[48].mxu1 %v161_v59  ;;  %v95_v58 = vld [vmem:[%s4040_s0 + $0x288] sm:$0xff]  ;;  %v193_v59 = vld [vmem:[%s4040_s0 + $0x598] sm:$0xff] }
  0x85   :  { %1994 = vmatprep.mubr.f32.mxu0 %v64_v60  ;;  %2141 = vmatprep.mubr.f32.mxu1 %v162_v61  ;;  %v96_v60 = vld [vmem:[%s4040_s0 + $0x290] sm:$0xff]  ;;  %v194_v61 = vld [vmem:[%s4040_s0 + $0x5a0] sm:$0xff] }
  0x88   :  { %1995 = vmatmul.mubr.f32.gmra.mrb[50].mxu0 %v65_v62  ;;  %2142 = vmatmul.mubr.f32.gmra.mrb[50].mxu1 %v163_v63  ;;  %v97_v62 = vld [vmem:[%s4040_s0 + $0x298] sm:$0xff]  ;;  %v195_v63 = vld [vmem:[%s4040_s0 + $0x5a8] sm:$0xff] }
  0x89   :  { %1997 = vmatprep.mubr.f32.mxu0 %v66_v0  ;;  %2144 = vmatprep.mubr.f32.mxu1 %v164_v1  ;;  %v98_v0 = vld [vmem:[%s4040_s0 + $0x2a0] sm:$0xff]  ;;  %v196_v1 = vld [vmem:[%s4040_s0 + $0x5b0] sm:$0xff] }
  0x8c   :  { %1998 = vmatmul.mubr.f32.gmra.mrb[52].mxu0 %v67_v2  ;;  %2145 = vmatmul.mubr.f32.gmra.mrb[52].mxu1 %v165_v3  ;;  %v99_v2 = vld [vmem:[%s4040_s0 + $0x2a8] sm:$0xff]  ;;  %v197_v3 = vld [vmem:[%s4040_s0 + $0x5b8] sm:$0xff] }
  0x8d   :  { %2000 = vmatprep.mubr.f32.mxu0 %v68_v4  ;;  %2147 = vmatprep.mubr.f32.mxu1 %v166_v5  ;;  %v100_v4 = vld [vmem:[%s4040_s0 + $0x2b0] sm:$0xff]  ;;  %v198_v5 = vld [vmem:[%s4040_s0 + $0x5c0] sm:$0xff] }
  0x90   :  { %2001 = vmatmul.mubr.f32.gmra.mrb[54].mxu0 %v69_v6  ;;  %2148 = vmatmul.mubr.f32.gmra.mrb[54].mxu1 %v167_v7  ;;  %v101_v6 = vld [vmem:[%s4040_s0 + $0x2b8] sm:$0xff]  ;;  %v199_v7 = vld [vmem:[%s4040_s0 + $0x5c8] sm:$0xff] }
  0x91   :  { %2003 = vmatprep.mubr.f32.mxu0 %v70_v8  ;;  %2150 = vmatprep.mubr.f32.mxu1 %v168_v9  ;;  %v102_v8 = vld [vmem:[%s4040_s0 + $0x2c0] sm:$0xff]  ;;  %v200_v9 = vld [vmem:[%s4040_s0 + $0x5d0] sm:$0xff] }
  0x94   :  { %2004 = vmatmul.mubr.f32.gmra.mrb[56].mxu0 %v71_v10  ;;  %2151 = vmatmul.mubr.f32.gmra.mrb[56].mxu1 %v169_v11  ;;  %v103_v10 = vld [vmem:[%s4040_s0 + $0x2c8] sm:$0xff]  ;;  %v201_v11 = vld [vmem:[%s4040_s0 + $0x5d8] sm:$0xff] }
  0x95   :  { %2006 = vmatprep.mubr.f32.mxu0 %v72_v12  ;;  %2153 = vmatprep.mubr.f32.mxu1 %v170_v13  ;;  %v104_v12 = vld [vmem:[%s4040_s0 + $0x2d0] sm:$0xff]  ;;  %v202_v13 = vld [vmem:[%s4040_s0 + $0x5e0] sm:$0xff] }
  0x98   :  { %2007 = vmatmul.mubr.f32.gmra.mrb[58].mxu0 %v73_v14  ;;  %2154 = vmatmul.mubr.f32.gmra.mrb[58].mxu1 %v171_v15  ;;  %v105_v14 = vld [vmem:[%s4040_s0 + $0x2d8] sm:$0xff]  ;;  %v203_v15 = vld [vmem:[%s4040_s0 + $0x5e8] sm:$0xff] }
  0x99   :  { %2009 = vmatprep.mubr.f32.mxu0 %v74_v16  ;;  %2156 = vmatprep.mubr.f32.mxu1 %v172_v17  ;;  %v106_v16 = vld [vmem:[%s4040_s0 + $0x2e0] sm:$0xff]  ;;  %v204_v17 = vld [vmem:[%s4040_s0 + $0x5f0] sm:$0xff] }
  0x9c   :  { %2010 = vmatmul.mubr.f32.gmra.mrb[60].mxu0 %v75_v18  ;;  %2157 = vmatmul.mubr.f32.gmra.mrb[60].mxu1 %v173_v19  ;;  %v107_v18 = vld [vmem:[%s4040_s0 + $0x2e8] sm:$0xff]  ;;  %v205_v19 = vld [vmem:[%s4040_s0 + $0x5f8] sm:$0xff] }
  0x9d   :  { %2012 = vmatprep.mubr.f32.mxu0 %v76_v20  ;;  %2159 = vmatprep.mubr.f32.mxu1 %v174_v21  ;;  %v108_v20 = vld [vmem:[%s4040_s0 + $0x2f0] sm:$0xff]  ;;  %v206_v21 = vld [vmem:[%s4040_s0 + $0x600] sm:$0xff] }
  0xa0   :  { %2013 = vmatmul.mubr.f32.gmra.mrb[62].mxu0 %v77_v22  ;;  %2160 = vmatmul.mubr.f32.gmra.mrb[62].mxu1 %v175_v23  ;;  %v109_v22 = vld [vmem:[%s4040_s0 + $0x2f8] sm:$0xff]  ;;  %v207_v23 = vld [vmem:[%s4040_s0 + $0x608] sm:$0xff] }
  0xa1   :  { %2015 = vmatprep.mubr.f32.mxu0 %v78_v24  ;;  %2162 = vmatprep.mubr.f32.mxu1 %v176_v25  ;;  %v110_v24 = vld [vmem:[%s4040_s0 + $0x300] sm:$0xff]  ;;  %v208_v25 = vld [vmem:[%s4040_s0 + $0x610] sm:$0xff] }
  0xa4   :  { %2016 = vmatmul.mubr.f32.gmra.mrb[64].mxu0 %v79_v26  ;;  %2163 = vmatmul.mubr.f32.gmra.mrb[64].mxu1 %v177_v27  ;;  %v111_v26 = vld [vmem:[%s4040_s0 + $0x308] sm:$0xff]  ;;  %v209_v27 = vld [vmem:[%s4040_s0 + $0x618] sm:$0xff] }
  0xa5   :  { %2018 = vmatprep.mubr.f32.mxu0 %v80_v28  ;;  %2165 = vmatprep.mubr.f32.mxu1 %v178_v29 }
  0xa8   :  { %2019 = vmatmul.mubr.f32.gmra.mrb[66].mxu0 %v81_v30  ;;  %2166 = vmatmul.mubr.f32.gmra.mrb[66].mxu1 %v179_v31 }
  0xa9   :  { %2021 = vmatprep.mubr.f32.mxu0 %v82_v32  ;;  %2168 = vmatprep.mubr.f32.mxu1 %v180_v33 }
  0xac   :  { %2022 = vmatmul.mubr.f32.gmra.mrb[68].mxu0 %v83_v34  ;;  %2169 = vmatmul.mubr.f32.gmra.mrb[68].mxu1 %v181_v35 }
  0xad   :  { %2024 = vmatprep.mubr.f32.mxu0 %v84_v36  ;;  %2171 = vmatprep.mubr.f32.mxu1 %v182_v37 }
  0xb0   :  { %2025 = vmatmul.mubr.f32.gmra.mrb[70].mxu0 %v85_v38  ;;  %2172 = vmatmul.mubr.f32.gmra.mrb[70].mxu1 %v183_v39 }
  0xb1   :  { %2027 = vmatprep.mubr.f32.mxu0 %v86_v40  ;;  %2174 = vmatprep.mubr.f32.mxu1 %v184_v41 }
  0xb4   :  { %2028 = vmatmul.mubr.f32.gmra.mrb[72].mxu0 %v87_v42  ;;  %2175 = vmatmul.mubr.f32.gmra.mrb[72].mxu1 %v185_v43 }
  0xb5   :  { %2030 = vmatprep.mubr.f32.mxu0 %v88_v44  ;;  %2177 = vmatprep.mubr.f32.mxu1 %v186_v45 }
  0xb8   :  { %2031 = vmatmul.mubr.f32.gmra.mrb[74].mxu0 %v89_v46  ;;  %2178 = vmatmul.mubr.f32.gmra.mrb[74].mxu1 %v187_v47 }
  0xb9   :  { %2033 = vmatprep.mubr.f32.mxu0 %v90_v48  ;;  %2180 = vmatprep.mubr.f32.mxu1 %v188_v49 }
  0xbc   :  { %2034 = vmatmul.mubr.f32.gmra.mrb[76].mxu0 %v91_v50  ;;  %2181 = vmatmul.mubr.f32.gmra.mrb[76].mxu1 %v189_v51 }
  0xbd   :  { %2036 = vmatprep.mubr.f32.mxu0 %v92_v52  ;;  %2183 = vmatprep.mubr.f32.mxu1 %v190_v53 }
  0xc0   :  { %2037 = vmatmul.mubr.f32.gmra.mrb[78].mxu0 %v93_v54  ;;  %2184 = vmatmul.mubr.f32.gmra.mrb[78].mxu1 %v191_v55 }
  0xc1   :  { %2039 = vmatprep.mubr.f32.mxu0 %v94_v56  ;;  %2186 = vmatprep.mubr.f32.mxu1 %v192_v57 }
  0xc4   :  { %2040 = vmatmul.mubr.f32.gmra.mrb[80].mxu0 %v95_v58  ;;  %2187 = vmatmul.mubr.f32.gmra.mrb[80].mxu1 %v193_v59 }
  0xc5   :  { %2042 = vmatprep.mubr.f32.mxu0 %v96_v60  ;;  %2189 = vmatprep.mubr.f32.mxu1 %v194_v61 }
  0xc8   :  { %2043 = vmatmul.mubr.f32.gmra.mrb[82].mxu0 %v97_v62  ;;  %2190 = vmatmul.mubr.f32.gmra.mrb[82].mxu1 %v195_v63 }
  0xc9   :  { %2045 = vmatprep.mubr.f32.mxu0 %v98_v0  ;;  %2192 = vmatprep.mubr.f32.mxu1 %v196_v1 }
  0xcc   :  { %2046 = vmatmul.mubr.f32.gmra.mrb[84].mxu0 %v99_v2  ;;  %2193 = vmatmul.mubr.f32.gmra.mrb[84].mxu1 %v197_v3 }
  0xcd   :  { %2048 = vmatprep.mubr.f32.mxu0 %v100_v4  ;;  %2195 = vmatprep.mubr.f32.mxu1 %v198_v5 }
  0xd0   :  { %2049 = vmatmul.mubr.f32.gmra.mrb[86].mxu0 %v101_v6  ;;  %2196 = vmatmul.mubr.f32.gmra.mrb[86].mxu1 %v199_v7 }
  0xd1   :  { %2051 = vmatprep.mubr.f32.mxu0 %v102_v8  ;;  %2198 = vmatprep.mubr.f32.mxu1 %v200_v9 }
  0xd4   :  { %2052 = vmatmul.mubr.f32.gmra.mrb[88].mxu0 %v103_v10  ;;  %2199 = vmatmul.mubr.f32.gmra.mrb[88].mxu1 %v201_v11 }
  0xd5   :  { %2054 = vmatprep.mubr.f32.mxu0 %v104_v12  ;;  %2201 = vmatprep.mubr.f32.mxu1 %v202_v13 }
  0xd8   :  { %2055 = vmatmul.mubr.f32.gmra.mrb[90].mxu0 %v105_v14  ;;  %2202 = vmatmul.mubr.f32.gmra.mrb[90].mxu1 %v203_v15 }
  0xd9   :  { %2057 = vmatprep.mubr.f32.mxu0 %v106_v16  ;;  %2204 = vmatprep.mubr.f32.mxu1 %v204_v17 }
  0xdc   :  { %2058 = vmatmul.mubr.f32.gmra.mrb[92].mxu0 %v107_v18  ;;  %2205 = vmatmul.mubr.f32.gmra.mrb[92].mxu1 %v205_v19 }
  0xdd   :  { %2060 = vmatprep.mubr.f32.mxu0 %v108_v20  ;;  %2207 = vmatprep.mubr.f32.mxu1 %v206_v21 }
  0xe0   :  { %2061 = vmatmul.mubr.f32.gmra.mrb[94].mxu0 %v109_v22  ;;  %2208 = vmatmul.mubr.f32.gmra.mrb[94].mxu1 %v207_v23 }
  0xe1   :  { %2063 = vmatprep.mubr.f32.mxu0 %v110_v24  ;;  %2210 = vmatprep.mubr.f32.mxu1 %v208_v25  ;;  %v3041_v24 = vld [vmem:[%s4041_s2] ss:$0 sm:$0xff] }
  0xe4   :  { %2064 = vmatmul.mubr.f32.gmra.mrb[96].mxu0 %v111_v26  ;;  %2211 = vmatmul.mubr.f32.gmra.mrb[96].mxu1 %v209_v27 }
  0xf7   :  { %v2918_v28 = vpop.f32.mrb[0].mxu0  ;;  %v2920_v29 = vpop.f32.mrb[0].mxu1 }
  0xf8   :  { %v2922_v30 = vpop.f32.mrb[1].mxu0  ;;  %v2924_v31 = vpop.f32.mrb[1].mxu1 }
  0xfb   :  { %v2926_v32 = vpop.f32.mrb[2].mxu0  ;;  %v2928_v33 = vpop.f32.mrb[2].mxu1 }
  0xfc   :  { %v2930_v34 = vpop.f32.mrb[3].mxu0  ;;  %v2932_v35 = vpop.f32.mrb[3].mxu1 }
  0xff   :  { %v2934_v36 = vpop.f32.mrb[4].mxu0  ;;  %v2936_v37 = vpop.f32.mrb[4].mxu1 }
 0x100   :  { %v2938_v38 = vpop.f32.mrb[5].mxu0  ;;  %v2940_v39 = vpop.f32.mrb[5].mxu1 }
 0x103   :  { %v2942_v40 = vpop.f32.mrb[6].mxu0  ;;  %v2944_v41 = vpop.f32.mrb[6].mxu1 }
 0x104   :  { %v2946_v42 = vpop.f32.mrb[7].mxu0  ;;  %v2948_v43 = vpop.f32.mrb[7].mxu1 }
 0x107   :  { %v2950_v44 = vpop.f32.mrb[8].mxu0  ;;  %v2952_v45 = vpop.f32.mrb[8].mxu1 }
 0x108   :  { %v2954_v46 = vpop.f32.mrb[9].mxu0  ;;  %v2956_v47 = vpop.f32.mrb[9].mxu1 }
 0x10b   :  { %v2958_v48 = vpop.f32.mrb[10].mxu0  ;;  %v2960_v49 = vpop.f32.mrb[10].mxu1 }
 0x10c   :  { %v2962_v50 = vpop.f32.mrb[11].mxu0  ;;  %v2964_v51 = vpop.f32.mrb[11].mxu1 }
 0x10f   :  { %v2966_v52 = vpop.f32.mrb[12].mxu0  ;;  %v2968_v53 = vpop.f32.mrb[12].mxu1 }
 0x110   :  { %v2970_v54 = vpop.f32.mrb[13].mxu0  ;;  %v2972_v55 = vpop.f32.mrb[13].mxu1 }
 0x113   :  { %v2974_v56 = vpop.f32.mrb[14].mxu0  ;;  %v2976_v57 = vpop.f32.mrb[14].mxu1 }
 0x114   :  { %v2978_v58 = vpop.f32.mrb[15].mxu0  ;;  %v2980_v59 = vpop.f32.mrb[15].mxu1 }
 0x117   :  { %v2982_v60 = vpop.f32.mrb[16].mxu0  ;;  %v2984_v61 = vpop.f32.mrb[16].mxu1 }
 0x118   :  { %v2986_v62 = vpop.f32.mrb[17].mxu0  ;;  %v2988_v63 = vpop.f32.mrb[17].mxu1 }
 0x11b   :  { %v2990_v0 = vpop.f32.mrb[18].mxu0  ;;  %v2992_v1 = vpop.f32.mrb[18].mxu1 }
 0x11c   :  { %v2994_v2 = vpop.f32.mrb[19].mxu0  ;;  %v2996_v3 = vpop.f32.mrb[19].mxu1 }
 0x11f   :  { %v2998_v4 = vpop.f32.mrb[20].mxu0  ;;  %v3000_v5 = vpop.f32.mrb[20].mxu1 }
 0x120   :  { %v3002_v6 = vpop.f32.mrb[21].mxu0  ;;  %v3004_v7 = vpop.f32.mrb[21].mxu1 }
 0x123   :  { %v3006_v8 = vpop.f32.mrb[22].mxu0  ;;  %v3008_v9 = vpop.f32.mrb[22].mxu1 }
 0x124   :  { %v3010_v10 = vpop.f32.mrb[23].mxu0  ;;  %v3012_v11 = vpop.f32.mrb[23].mxu1 }
 0x127   :  { %v3014_v12 = vpop.f32.mrb[24].mxu0  ;;  %v3016_v13 = vpop.f32.mrb[24].mxu1 }
 0x128   :  { %v3018_v14 = vpop.f32.mrb[25].mxu0  ;;  %v3020_v15 = vpop.f32.mrb[25].mxu1 }
 0x12b   :  { %v3022_v16 = vpop.f32.mrb[26].mxu0  ;;  %v3024_v17 = vpop.f32.mrb[26].mxu1 }
 0x12c   :  { %v3026_v18 = vpop.f32.mrb[27].mxu0  ;;  %v3028_v19 = vpop.f32.mrb[27].mxu1 }
 0x12d   :  { %4082 = vst [vmem:[#allocation2_spill] sm:$0xff] %v3026_v18  ;;  %4083 = vst [vmem:[#allocation3_spill] sm:$0xff] %v3028_v19 }
 0x12f   :  { %v3030_v20 = vpop.f32.mrb[28].mxu0  ;;  %v3032_v21 = vpop.f32.mrb[28].mxu1 }
 0x130   :  { %4084 = vst [vmem:[#allocation4_spill] sm:$0xff] %v3030_v20  ;;  %4085 = vst [vmem:[#allocation5_spill] sm:$0xff] %v3032_v21  ;;  %v3034_v22 = vpop.f32.mrb[29].mxu0  ;;  %v3036_v23 = vpop.f32.mrb[29].mxu1  ;;  %v3053_v21 = vadd.f32 %v2918_v28, %v3041_v24  ;;  %v3073_v28 = vadd.f32 %v2928_v33, %v3041_v24 }
 0x131   :  { %4086 = vst [vmem:[#allocation6_spill] sm:$0xff] %v3034_v22  ;;  %4087 = vst [vmem:[#allocation7_spill] sm:$0xff] %v3036_v23  ;;  %v3057_v23 = vadd.f32 %v2920_v29, %v3041_v24  ;;  %v3061_v22 = vadd.f32 %v3041_v24, %v2922_v30  ;;  %v3077_v29 = vadd.f32 %v3041_v24, %v2930_v34 }
 0x132   :  { %4093 = vst [vmem:[#allocation13_spill] sm:$0xff] %v3073_v28  ;;  %v3130_v34 = vadd.f32 %v3041_v24, %v2946_v42  ;;  %v3151_v42 = vadd.f32 %v3041_v24, %v2954_v46  ;;  %v3167_v46 = vadd.f32 %v2960_v49, %v3041_v24  ;;  %v3181_v28 = vadd.f32 %v3041_v24, %v2964_v51 }
 0x133   :  { %v3043_v25 = vpop.f32.mrb[30].mxu0  ;;  %v3045_v26 = vpop.f32.mrb[30].mxu1  ;;  %v3185_v49 = vadd.f32 %v2966_v52, %v3041_v24  ;;  %v3202_v52 = vadd.f32 %v3041_v24, %v2970_v54  ;;  %v3216_v51 = vadd.f32 %v2976_v57, %v3041_v24 }
 0x134   :  { %4088 = vst [vmem:[#allocation8_spill] sm:$0xff] %v3043_v25  ;;  %4089 = vst [vmem:[#allocation9_spill] sm:$0xff] %v3045_v26  ;;  %v3047_v27 = vpop.f32.mrb[31].mxu0  ;;  %v3049_v19 = vpop.f32.mrb[31].mxu1  ;;  %v3065_v25 = vadd.f32 %v3041_v24, %v2924_v31  ;;  %v3085_v31 = vadd.f32 %v3041_v24, %v2932_v35  ;;  %v3120_v35 = vadd.f32 %v2944_v41, %v3041_v24 }
 0x135   :  { %4090 = vst [vmem:[#allocation10_spill] sm:$0xff] %v3047_v27  ;;  %4091 = vst [vmem:[#allocation11_spill] sm:$0xff] %v3049_v19  ;;  %v3069_v27 = vadd.f32 %v2926_v32, %v3041_v24  ;;  %v3089_v32 = vadd.f32 %v2934_v36, %v3041_v24  ;;  %v3106_v36 = vadd.f32 %v3041_v24, %v2938_v38 }
 0x136   :  { %4100 = vst [vmem:[#allocation20_spill] sm:$0xff] %v3120_v35  ;;  %4101 = vst [vmem:[#allocation21_spill] sm:$0xff] %v3130_v34  ;;  %v3206_v34 = vadd.f32 %v3041_v24, %v2972_v55  ;;  %v3243_v55 = vadd.f32 %v2984_v61, %v3041_v24 }
 0x137   :  { %4092 = vst [vmem:[#allocation12_spill] sm:$0xff] %v3069_v27  ;;  %v3079_v19 = vpop.f32.mrb[32].mxu0  ;;  %v3081_v30 = vpop.f32.mrb[32].mxu1  ;;  %4096 = vst [vmem:[#allocation16_spill] sm:$0xff] %v3089_v32  ;;  %v3143_v27 = vadd.f32 %v2950_v44, %v3041_v24  ;;  %v3157_v32 = vadd.f32 %v3041_v24, %v2956_v47  ;;  %v3161_v44 = vadd.f32 %v2958_v48, %v3041_v24 }
 0x138   :  { %4094 = vst [vmem:[#allocation14_spill] sm:$0xff] %v3079_v19  ;;  %4095 = vst [vmem:[#allocation15_spill] sm:$0xff] %v3081_v30  ;;  %v3091_v26 = vpop.f32.mrb[33].mxu0  ;;  %v3093_v33 = vpop.f32.mrb[33].mxu1  ;;  %v3100_v30 = vadd.f32 %v2936_v37, %v3041_v24  ;;  %v3116_v37 = vadd.f32 %v2942_v40, %v3041_v24  ;;  %v3134_v40 = vadd.f32 %v3041_v24, %v2948_v43 }
 0x139   :  { %4097 = vst [vmem:[#allocation17_spill] sm:$0xff] %v3093_v33  ;;  %v3110_v33 = vadd.f32 %v3041_v24, %v2940_v39  ;;  %v3147_v39 = vadd.f32 %v2952_v45, %v3041_v24  ;;  %4103 = vst [vmem:[#allocation23_spill] sm:$0xff] %v3161_v44  ;;  %v3171_v43 = vadd.f32 %v3041_v24, %v2962_v50 }
 0x13a   :  { %4098 = vst [vmem:[#allocation18_spill] sm:$0xff] %v3100_v30  ;;  %4099 = vst [vmem:[#allocation19_spill] sm:$0xff] %v3116_v37  ;;  %v3196_v48 = vadd.f32 %v2968_v53, %v3041_v24  ;;  %v3212_v53 = vadd.f32 %v2974_v56, %v3041_v24  ;;  %v3226_v37 = vadd.f32 %v3041_v24, %v2978_v58 }
 0x13b   :  { %v3122_v18 = vpop.f32.mrb[34].mxu0  ;;  %v3124_v38 = vpop.f32.mrb[34].mxu1  ;;  %4102 = vst [vmem:[#allocation22_spill] sm:$0xff] %v3134_v40  ;;  %4104 = vst [vmem:[#allocation24_spill] sm:$0xff] %v3167_v46  ;;  %v3230_v56 = vadd.f32 %v3041_v24, %v2980_v59  ;;  %v3239_v44 = vadd.f32 %v2982_v60, %v3041_v24  ;;  %v3247_v58 = vadd.f32 %v3041_v24, %v2986_v62 }
 0x13c   :  { %v3136_v20 = vpop.f32.mrb[35].mxu0  ;;  %v3138_v41 = vpop.f32.mrb[35].mxu1  ;;  %4105 = vst [vmem:[#allocation25_spill] sm:$0xff] %v3185_v49  ;;  %4106 = vst [vmem:[#allocation26_spill] sm:$0xff] %v3196_v48  ;;  %v3253_v49 = vadd.f32 %v3041_v24, %v2988_v63  ;;  %v3257_v60 = vadd.f32 %v2990_v0, %v3041_v24  ;;  %v3263_v62 = vadd.f32 %v2992_v1, %v3041_v24 }
 0x13d   :  { %4107 = vst [vmem:[#allocation27_spill] sm:$0xff] %v3212_v53  ;;  %4108 = vst [vmem:[#allocation28_spill] sm:$0xff] %v3216_v51  ;;  %v3267_v59 = vadd.f32 %v3041_v24, %v2994_v2  ;;  %v3277_v46 = vadd.f32 %v3041_v24, %v2996_v3  ;;  %v3281_v1 = vadd.f32 %v2998_v4, %v3041_v24 }
 0x13e   :  { %4109 = vst [vmem:[#allocation29_spill] sm:$0xff] %v3230_v56  ;;  %v3292_v0 = vadd.f32 %v3000_v5, %v3041_v24  ;;  %v3298_v4 = vadd.f32 %v3041_v24, %v3002_v6  ;;  %v3308_v5 = vadd.f32 %v3006_v8, %v3041_v24  ;;  %v3312_v3 = vadd.f32 %v3008_v9, %v3041_v24 }
 0x13f   :  { %v3173_v19 = vpop.f32.mrb[36].mxu0  ;;  %v3175_v47 = vpop.f32.mrb[36].mxu1  ;;  %4110 = vst [vmem:[#allocation30_spill] sm:$0xff] %v3281_v1  ;;  %v3322_v53 = vadd.f32 %v3041_v24, %v3010_v10  ;;  %v3326_v8 = vadd.f32 %v3041_v24, %v3012_v11  ;;  %v3343_v10 = vadd.f32 %v3041_v24, %v3018_v14  ;;  %v3359_v14 = vadd.f32 %v3024_v17, %v3041_v24  ;;  %v4129_v1 = vld [vmem:[#allocation3_spill] sm:$0xff] }
 0x140   :  { %v3187_v45 = vpop.f32.mrb[37].mxu0  ;;  %v3189_v50 = vpop.f32.mrb[37].mxu1  ;;  %4112 = vst [vmem:[#allocation32_spill] sm:$0xff] %v3292_v0  ;;  %4113 = vst [vmem:[#allocation33_spill] sm:$0xff] %v3308_v5  ;;  %v4140_v0 = vld [vmem:[#allocation8_spill] sm:$0xff] }
 0x141   :  { %4114 = vst [vmem:[#allocation34_spill] sm:$0xff] %v3312_v3  ;;  %4117 = vst [vmem:[#allocation37_spill] sm:$0xff] %v3322_v53 }
 0x142   :  { %4118 = vst [vmem:[#allocation38_spill] sm:$0xff] %v3326_v8  ;;  %4124 = vst [vmem:[#allocation44_spill] sm:$0xff] %v3359_v14 }
 0x143   :  { %v3218_v40 = vpop.f32.mrb[38].mxu0  ;;  %v3220_v54 = vpop.f32.mrb[38].mxu1 }
 0x144   :  { %v3232_v35 = vpop.f32.mrb[39].mxu0  ;;  %v3234_v57 = vpop.f32.mrb[39].mxu1 }
 0x147   :  { %v3269_v30 = vpop.f32.mrb[40].mxu0  ;;  %v3271_v63 = vpop.f32.mrb[40].mxu1 }
 0x148   :  { %v3283_v61 = vpop.f32.mrb[41].mxu0  ;;  %v3285_v2 = vpop.f32.mrb[41].mxu1 }
 0x149   :  { %4111 = vst [vmem:[#allocation31_spill] sm:$0xff] %v3285_v2  ;;  %v3302_v2 = vadd.f32 %v3041_v24, %v3004_v7  ;;  %v3339_v7 = vadd.f32 %v3016_v13, %v3041_v24  ;;  %v4130_v13 = vld [vmem:[#allocation4_spill] sm:$0xff] }
 0x14a   :  { %v3377_v17 = vadd.f32 %v4130_v13, %v3041_v24  ;;  %v4136_v13 = vld [vmem:[#allocation6_spill] sm:$0xff] }
 0x14b   :  { %v3314_v56 = vpop.f32.mrb[42].mxu0  ;;  %v3316_v6 = vpop.f32.mrb[42].mxu1  ;;  %4122 = vst [vmem:[#allocation42_spill] sm:$0xff] %v3339_v7  ;;  %v3394_v53 = vadd.f32 %v3041_v24, %v4136_v13 }
 0x14c   :  { %4115 = vst [vmem:[#allocation35_spill] sm:$0xff] %v3314_v56  ;;  %4116 = vst [vmem:[#allocation36_spill] sm:$0xff] %v3316_v6  ;;  %v3328_v51 = vpop.f32.mrb[43].mxu0  ;;  %v3330_v9 = vpop.f32.mrb[43].mxu1  ;;  %v3335_v6 = vadd.f32 %v3014_v12, %v3041_v24  ;;  %v3353_v12 = vadd.f32 %v3022_v16, %v3041_v24  ;;  %v3373_v56 = vadd.f32 %v3041_v24, %v4129_v1  ;;  %v4134_v16 = vld [vmem:[#allocation5_spill] sm:$0xff] }
 0x14d   :  { %4119 = vst [vmem:[#allocation39_spill] sm:$0xff] %v3328_v51  ;;  %4120 = vst [vmem:[#allocation40_spill] sm:$0xff] %v3330_v9  ;;  %v3349_v9 = vadd.f32 %v3041_v24, %v3020_v15  ;;  %v4125_v51 = vld [vmem:[#allocation2_spill] sm:$0xff]  ;;  %v3388_v5 = vadd.f32 %v4134_v16, %v3041_v24  ;;  %v3404_v16 = vadd.f32 %v4140_v0, %v3041_v24  ;;  %v4142_v1 = vld [vmem:[#allocation9_spill] sm:$0xff] }
 0x14e   :  { %4121 = vst [vmem:[#allocation41_spill] sm:$0xff] %v3335_v6  ;;  %4123 = vst [vmem:[#allocation43_spill] sm:$0xff] %v3353_v12  ;;  %v3363_v11 = vadd.f32 %v3041_v24, %v4125_v51  ;;  %v3408_v7 = vadd.f32 %v4142_v1, %v3041_v24  ;;  %v4146_v6 = vld [vmem:[#allocation10_spill] sm:$0xff] }
 0x14f   :  { %v3365_v48 = vpop.f32.mrb[44].mxu0  ;;  %v3367_v15 = vpop.f32.mrb[44].mxu1  ;;  %4131 = vst [vmem:[#allocation3_spill] sm:$0xff] %v3377_v17  ;;  %4135 = vst [vmem:[#allocation5_spill] sm:$0xff] %v3388_v5  ;;  %v4154_v17 = vld [vmem:[#allocation17_spill] sm:$0xff] }
 0x150   :  { %4126 = vst [vmem:[#allocation2_spill] sm:$0xff] %v3363_v11  ;;  %4127 = vst [vmem:[#allocation45_spill] sm:$0xff] %v3365_v48  ;;  %v3379_v3 = vpop.f32.mrb[45].mxu0  ;;  %v3381_v51 = vpop.f32.mrb[45].mxu1  ;;  %v4147_v48 = vld [vmem:[#allocation11_spill] sm:$0xff] }
 0x151   :  { %4128 = vst [vmem:[#allocation46_spill] sm:$0xff] %v3367_v15  ;;  %4132 = vst [vmem:[#allocation4_spill] sm:$0xff] %v3379_v3  ;;  %v4138_v3 = vld [vmem:[#allocation7_spill] sm:$0xff]  ;;  %v3418_v15 = vadd.f32 %v3041_v24, %v4146_v6  ;;  %v3422_v0 = vadd.f32 %v3041_v24, %v4147_v48  ;;  %v3439_v6 = vadd.f32 %v3041_v24, %v3091_v26 }
 0x152   :  { %4133 = vst [vmem:[#allocation47_spill] sm:$0xff] %v3381_v51  ;;  %4137 = vst [vmem:[#allocation6_spill] sm:$0xff] %v3394_v53  ;;  %v3398_v51 = vadd.f32 %v3041_v24, %v4138_v3  ;;  %v4152_v3 = vld [vmem:[#allocation15_spill] sm:$0xff]  ;;  %v3455_v26 = vadd.f32 %v3124_v38, %v3041_v24  ;;  %v3459_v48 = vadd.f32 %v3041_v24, %v3136_v20 }
 0x153   :  { %4141 = vst [vmem:[#allocation8_spill] sm:$0xff] %v3404_v16  ;;  %4143 = vst [vmem:[#allocation9_spill] sm:$0xff] %v3408_v7  ;;  %v3410_v8 = vpop.f32.mrb[46].mxu0  ;;  %v3412_v13 = vpop.f32.mrb[46].mxu1  ;;  %v3435_v12 = vadd.f32 %v4152_v3, %v3041_v24  ;;  %v3474_v53 = vadd.f32 %v3041_v24, %v3138_v41  ;;  %v3482_v38 = vadd.f32 %v3173_v19, %v3041_v24 }
 0x154   :  { %4139 = vst [vmem:[#allocation7_spill] sm:$0xff] %v3398_v51  ;;  %4144 = vst [vmem:[#allocation48_spill] sm:$0xff] %v3410_v8  ;;  %v3424_v14 = vpop.f32.mrb[47].mxu0  ;;  %v3426_v1 = vpop.f32.mrb[47].mxu1  ;;  %v3486_v7 = vadd.f32 %v3175_v47, %v3041_v24  ;;  %v4162_v51 = vmax.f32 %v3061_v22, 0.0  ;;  %v3497_v47 = vadd.f32 %v3041_v24, %v3187_v45 }
 0x155   :  { %4145 = vst [vmem:[#allocation49_spill] sm:$0xff] %v3412_v13  ;;  %4148 = vst [vmem:[#allocation10_spill] sm:$0xff] %v3424_v14  ;;  %v4150_v13 = vld [vmem:[#allocation14_spill] sm:$0xff] }
 0x156   :  { %4149 = vst [vmem:[#allocation11_spill] sm:$0xff] %v3426_v1  ;;  %v3431_v11 = vadd.f32 %v4150_v13, %v3041_v24  ;;  %4153 = vst [vmem:[#allocation15_spill] sm:$0xff] %v3435_v12  ;;  %v3445_v1 = vadd.f32 %v3041_v24, %v4154_v17  ;;  %v3449_v13 = vadd.f32 %v3122_v18, %v3041_v24 }
 0x157   :  { %4156 = vst [vmem:[#allocation50_spill] sm:$0xff] %v3455_v26  ;;  %v1993_v14 = vpop.f32.mrb[48].mxu0  ;;  %v2140_v5 = vpop.f32.mrb[48].mxu1  ;;  %4159 = vst [vmem:[#allocation53_spill] sm:$0xff] %v3474_v53 }
 0x158   :  { %4151 = vst [vmem:[#allocation14_spill] sm:$0xff] %v3431_v11  ;;  %4155 = vst [vmem:[#allocation17_spill] sm:$0xff] %v3449_v13  ;;  %v545_v18 = vadd.f32 %v1993_v14, %v3041_v24  ;;  %v1035_v8 = vadd.f32 %v2140_v5, %v3041_v24  ;;  %v3465_v16 = vpop.f32.mrb[49].mxu0  ;;  %v3467_v3 = vpop.f32.mrb[49].mxu1 }
 0x159   :  { %4157 = vst [vmem:[#allocation51_spill] sm:$0xff] %v3465_v16  ;;  %4158 = vst [vmem:[#allocation52_spill] sm:$0xff] %v3467_v3 }
 0x15a   :  { %v1327_v17 = vmax.f32 %v545_v18, 0.0  ;;  %v1425_v5 = vmax.f32 %v1035_v8, 0.0  ;;  %4160 = vst [vmem:[#allocation54_spill] sm:$0xff] %v3482_v38  ;;  %4161 = vst [vmem:[#allocation55_spill] sm:$0xff] %v3486_v7  ;;  %v4163_v18 = vmax.f32 %v3065_v25, 0.0  ;;  %v3503_v25 = vadd.f32 %v3041_v24, %v3189_v50 }
 0x15b   :  { %v1996_v41 = vpop.f32.mrb[50].mxu0  ;;  %v2143_v20 = vpop.f32.mrb[50].mxu1  ;;  %v4165_v50 = vmax.f32 %v3085_v31, 0.0 }
 0x15c   :  { %v1474_v12 = vmax.f32 %v4162_v51, %v1327_v17  ;;  %v1523_v8 = vmax.f32 %v4163_v18, %v1425_v5  ;;  %v555_v16 = vadd.f32 %v1996_v41, %v3041_v24  ;;  %v1045_v14 = vadd.f32 %v2143_v20, %v3041_v24  ;;  %v549_v3 = vpop.f32.mrb[51].mxu0  ;;  %v1039_v26 = vpop.f32.mrb[51].mxu1 }
 0x15d   :  { %v550_v13 = vadd.f32 %v3041_v24, %v549_v3  ;;  %v1040_v22 = vadd.f32 %v3041_v24, %v1039_v26  ;;  %v4164_v3 = vmax.f32 %v3077_v29, 0.0  ;;  %v4167_v20 = vmax.f32 %v3057_v23, 0.0 }
 0x15e   :  { %v1572_v51 = vmax.f32 %v1474_v12, %v1523_v8  ;;  %v1329_v17 = vmax.f32 %v555_v16, 0.0  ;;  %v1427_v5 = vmax.f32 %v1045_v14, 0.0  ;;  %v4168_v23 = vmax.f32 %v3106_v36, 0.0 }
 0x15f   :  { %v1328_v18 = vmax.f32 %v550_v13, 0.0  ;;  %v1426_v19 = vmax.f32 %v1040_v22, 0.0  ;;  %v1999_v11 = vpop.f32.mrb[52].mxu0  ;;  %v2146_v45 = vpop.f32.mrb[52].mxu1  ;;  %v4166_v13 = vmax.f32 %v3053_v21, 0.0 }
 0x160   :  { %1621 = vst [vmem:[%s4042_s3] sm:$0xff] %v1572_v51  ;;  %v1476_v26 = vmax.f32 %v4164_v3, %v1329_v17  ;;  %v1525_v12 = vmax.f32 %v4165_v50, %v1427_v5  ;;  %v565_v16 = vadd.f32 %v1999_v11, %v3041_v24  ;;  %v1055_v14 = vadd.f32 %v2146_v45, %v3041_v24  ;;  %v559_v8 = vpop.f32.mrb[53].mxu0  ;;  %v1049_v41 = vpop.f32.mrb[53].mxu1 }
 0x161   :  { %v1475_v22 = vmax.f32 %v4166_v13, %v1328_v18  ;;  %v1524_v7 = vmax.f32 %v4167_v20, %v1426_v19  ;;  %v560_v51 = vadd.f32 %v3041_v24, %v559_v8  ;;  %v1050_v29 = vadd.f32 %v3041_v24, %v1049_v41  ;;  %v4172_v13 = vld [vmem:[#allocation13_spill] sm:$0xff] }
 0x162   :  { %v1314_v17 = vmax.f32 %v3497_v47, 0.0  ;;  %v1574_v31 = vmax.f32 %v1476_v26, %v1525_v12  ;;  %v1331_v5 = vmax.f32 %v565_v16, 0.0  ;;  %v1429_v3 = vmax.f32 %v1055_v14, 0.0  ;;  %v4170_v16 = vld [vmem:[#allocation12_spill] sm:$0xff] }
 0x163   :  { %v1412_v11 = vmax.f32 %v3503_v25, 0.0  ;;  %v1573_v45 = vmax.f32 %v1475_v22, %v1524_v7  ;;  %v1330_v50 = vmax.f32 %v560_v51, 0.0  ;;  %v1428_v38 = vmax.f32 %v1050_v29, 0.0  ;;  %v2002_v53 = vpop.f32.mrb[54].mxu0  ;;  %v2149_v21 = vpop.f32.mrb[54].mxu1 }
 0x164   :  { %1623 = vst [vmem:[%s4042_s3 + $0x10] sm:$0xff] %v1574_v31  ;;  %v1478_v19 = vmax.f32 %v4168_v23, %v1331_v5  ;;  %v4169_v20 = vmax.f32 %v3110_v33, 0.0  ;;  %v575_v18 = vadd.f32 %v2002_v53, %v3041_v24  ;;  %v1065_v26 = vadd.f32 %v2149_v21, %v3041_v24  ;;  %v569_v12 = vpop.f32.mrb[55].mxu0  ;;  %v1059_v7 = vpop.f32.mrb[55].mxu1 }
 0x165   :  { %1622 = vst [vmem:[%s4042_s3 + $0x8] sm:$0xff] %v1573_v45  ;;  %v4171_v14 = vmax.f32 %v4170_v16, 0.0  ;;  %v4173_v22 = vmax.f32 %v4172_v13, 0.0  ;;  %v570_v51 = vadd.f32 %v3041_v24, %v569_v12  ;;  %v1060_v33 = vadd.f32 %v3041_v24, %v1059_v7  ;;  %v4176_v7 = vld [vmem:[#allocation22_spill] sm:$0xff] }
 0x166   :  { %v1527_v41 = vmax.f32 %v4169_v20, %v1429_v3  ;;  %v3544_v53 = vadd.f32 %v3218_v40, %v3041_v24  ;;  %v1333_v31 = vmax.f32 %v575_v18, 0.0  ;;  %v1431_v5 = vmax.f32 %v1065_v26, 0.0  ;;  %v4174_v20 = vld [vmem:[#allocation21_spill] sm:$0xff] }
 0x167   :  { %v1477_v8 = vmax.f32 %v4171_v14, %v1330_v50  ;;  %v1526_v36 = vmax.f32 %v4173_v22, %v1428_v38  ;;  %v3548_v3 = vadd.f32 %v3220_v54, %v3041_v24  ;;  %v1332_v50 = vmax.f32 %v570_v51, 0.0  ;;  %v2005_v23 = vpop.f32.mrb[56].mxu0  ;;  %v2152_v38 = vpop.f32.mrb[56].mxu1  ;;  %v4178_v14 = vld [vmem:[#allocation16_spill] sm:$0xff]  ;;  %v4180_v22 = vld [vmem:[#allocation18_spill] sm:$0xff] }
 0x168   :  { %v1576_v29 = vmax.f32 %v1478_v19, %v1527_v41  ;;  %v1430_v21 = vmax.f32 %v1060_v33, 0.0  ;;  %v4175_v12 = vmax.f32 %v4174_v20, 0.0  ;;  %v4177_v19 = vmax.f32 %v4176_v7, 0.0  ;;  %v579_v26 = vpop.f32.mrb[57].mxu0  ;;  %v1069_v16 = vpop.f32.mrb[57].mxu1 }
 0x169   :  { %v1575_v45 = vmax.f32 %v1477_v8, %v1526_v36  ;;  %v585_v18 = vadd.f32 %v2005_v23, %v3041_v24  ;;  %v1075_v54 = vadd.f32 %v2152_v38, %v3041_v24  ;;  %v4179_v8 = vmax.f32 %v4178_v14, 0.0 }
 0x16a   :  { %1625 = vst [vmem:[%s4042_s3 + $0x20] sm:$0xff] %v1576_v29  ;;  %v1480_v40 = vmax.f32 %v4175_v12, %v1333_v31  ;;  %v1529_v41 = vmax.f32 %v4177_v19, %v1431_v5  ;;  %v4181_v36 = vmax.f32 %v4180_v22, 0.0  ;;  %v580_v33 = vadd.f32 %v3041_v24, %v579_v26 }
 0x16b   :  { %1624 = vst [vmem:[%s4042_s3 + $0x18] sm:$0xff] %v1575_v45  ;;  %v1479_v13 = vmax.f32 %v4179_v8, %v1332_v50  ;;  %v1070_v29 = vadd.f32 %v3041_v24, %v1069_v16  ;;  %v3570_v31 = vadd.f32 %v3041_v24, %v3232_v35  ;;  %v1335_v23 = vmax.f32 %v585_v18, 0.0  ;;  %v2008_v7 = vpop.f32.mrb[58].mxu0  ;;  %v4184_v16 = vld [vmem:[#allocation19_spill] sm:$0xff] }
 0x16c   :  { %v1528_v51 = vmax.f32 %v4181_v36, %v1430_v21  ;;  %v1578_v5 = vmax.f32 %v1480_v40, %v1529_v41  ;;  %v1433_v38 = vmax.f32 %v1075_v54, 0.0  ;;  %v3574_v45 = vadd.f32 %v3041_v24, %v3234_v57  ;;  %v2155_v21 = vpop.f32.mrb[58].mxu1  ;;  %v589_v54 = vpop.f32.mrb[59].mxu0 }
 0x16d   :  { %v1334_v50 = vmax.f32 %v580_v33, 0.0  ;;  %v1432_v12 = vmax.f32 %v1070_v29, 0.0  ;;  %v4182_v19 = vmax.f32 %v3151_v42, 0.0  ;;  %v4183_v40 = vmax.f32 %v3157_v32, 0.0  ;;  %v1079_v26 = vpop.f32.mrb[59].mxu1 }
 0x16e   :  { %v1577_v20 = vmax.f32 %v1479_v13, %v1528_v51  ;;  %1627 = vst [vmem:[%s4042_s3 + $0x30] sm:$0xff] %v1578_v5  ;;  %v595_v18 = vadd.f32 %v2008_v7, %v3041_v24  ;;  %v1085_v57 = vadd.f32 %v2155_v21, %v3041_v24  ;;  %v4185_v14 = vmax.f32 %v4184_v16, 0.0  ;;  %v4186_v13 = vld [vmem:[#allocation20_spill] sm:$0xff] }
 0x16f   :  { %v1482_v35 = vmax.f32 %v4182_v19, %v1335_v23  ;;  %v1531_v41 = vmax.f32 %v4183_v40, %v1433_v38  ;;  %v4187_v22 = vmax.f32 %v4186_v13, 0.0  ;;  %v590_v36 = vadd.f32 %v3041_v24, %v589_v54  ;;  %v2011_v21 = vpop.f32.mrb[60].mxu0  ;;  %v2158_v19 = vpop.f32.mrb[60].mxu1 }
 0x170   :  { %1626 = vst [vmem:[%s4042_s3 + $0x28] sm:$0xff] %v1577_v20  ;;  %v1481_v8 = vmax.f32 %v4185_v14, %v1334_v50  ;;  %v1080_v32 = vadd.f32 %v3041_v24, %v1079_v26  ;;  %v1317_v51 = vmax.f32 %v3544_v53, 0.0  ;;  %v1337_v29 = vmax.f32 %v595_v18, 0.0  ;;  %v599_v18 = vpop.f32.mrb[61].mxu0 }
 0x171   :  { %v1530_v42 = vmax.f32 %v4187_v22, %v1432_v12  ;;  %v1580_v33 = vmax.f32 %v1482_v35, %v1531_v41  ;;  %v1435_v5 = vmax.f32 %v1085_v57, 0.0  ;;  %v1415_v23 = vmax.f32 %v3548_v3, 0.0  ;;  %v1089_v57 = vpop.f32.mrb[61].mxu1 }
 0x172   :  { %v1336_v7 = vmax.f32 %v590_v36, 0.0  ;;  %v1434_v20 = vmax.f32 %v1080_v32, 0.0  ;;  %v4188_v50 = vmax.f32 %v3171_v43, 0.0  ;;  %v4189_v40 = vmax.f32 %v3181_v28, 0.0 }
 0x173   :  { %v1579_v38 = vmax.f32 %v1481_v8, %v1530_v42  ;;  %1629 = vst [vmem:[%s4042_s3 + $0x40] sm:$0xff] %v1580_v33  ;;  %v605_v35 = vadd.f32 %v2011_v21, %v3041_v24  ;;  %v1095_v41 = vadd.f32 %v2158_v19, %v3041_v24  ;;  %v4190_v26 = vmax.f32 %v3143_v27, 0.0  ;;  %v2161_v27 = vpop.f32.mrb[62].mxu1 }
 0x174   :  { %v1484_v12 = vmax.f32 %v4188_v50, %v1337_v29  ;;  %v1533_v54 = vmax.f32 %v4189_v40, %v1435_v5  ;;  %v4191_v14 = vmax.f32 %v3147_v39, 0.0  ;;  %v600_v8 = vadd.f32 %v3041_v24, %v599_v18  ;;  %v1099_v40 = vpop.f32.mrb[63].mxu1  ;;  %v4196_v18 = vld [vmem:[#allocation24_spill] sm:$0xff] }
 0x175   :  { %1628 = vst [vmem:[%s4042_s3 + $0x38] sm:$0xff] %v1579_v38  ;;  %v1483_v16 = vmax.f32 %v4190_v26, %v1336_v7  ;;  %v1090_v28 = vadd.f32 %v3041_v24, %v1089_v57  ;;  %v1316_v13 = vmax.f32 %v3570_v31, 0.0  ;;  %v1339_v42 = vmax.f32 %v605_v35, 0.0  ;;  %v2014_v38 = vpop.f32.mrb[62].mxu0 }
 0x176   :  { %v1532_v43 = vmax.f32 %v4191_v14, %v1434_v20  ;;  %v1582_v22 = vmax.f32 %v1484_v12, %v1533_v54  ;;  %v1437_v36 = vmax.f32 %v1095_v41, 0.0  ;;  %v1414_v32 = vmax.f32 %v3574_v45, 0.0  ;;  %v609_v12 = vpop.f32.mrb[63].mxu0  ;;  %v4194_v54 = vld [vmem:[#allocation23_spill] sm:$0xff] }
 0x177   :  { %v1338_v29 = vmax.f32 %v600_v8, 0.0  ;;  %v1436_v5 = vmax.f32 %v1090_v28, 0.0  ;;  %v4192_v39 = vmax.f32 %v3202_v52, 0.0  ;;  %v4193_v20 = vmax.f32 %v3206_v34, 0.0 }
 0x178   :  { %v1581_v33 = vmax.f32 %v1483_v16, %v1532_v43  ;;  %1631 = vst [vmem:[%s4042_s3 + $0x50] sm:$0xff] %v1582_v22  ;;  %v615_v19 = vadd.f32 %v2014_v38, %v3041_v24  ;;  %v1105_v50 = vadd.f32 %v2161_v27, %v3041_v24  ;;  %v4195_v35 = vmax.f32 %v4194_v54, 0.0  ;;  %v4199_v38 = vld [vmem:[#allocation29_spill] sm:$0xff] }
 0x179   :  { %v1486_v7 = vmax.f32 %v4192_v39, %v1339_v42  ;;  %v1535_v21 = vmax.f32 %v4193_v20, %v1437_v36  ;;  %v4197_v57 = vmax.f32 %v4196_v18, 0.0  ;;  %v610_v26 = vadd.f32 %v3041_v24, %v609_v12 }
 0x17a   :  { %1630 = vst [vmem:[%s4042_s3 + $0x48] sm:$0xff] %v1581_v33  ;;  %v1485_v41 = vmax.f32 %v4195_v35, %v1338_v29  ;;  %v1100_v34 = vadd.f32 %v3041_v24, %v1099_v40  ;;  %v3636_v16 = vadd.f32 %v3269_v30, %v3041_v24  ;;  %v1341_v43 = vmax.f32 %v615_v19, 0.0  ;;  %v2017_v33 = vpop.f32.mrb[64].mxu0  ;;  %v2164_v29 = vpop.f32.mrb[64].mxu1  ;;  %v4201_v19 = vld [vmem:[#allocation25_spill] sm:$0xff]  ;;  %v4203_v40 = vld [vmem:[#allocation26_spill] sm:$0xff] }
 0x17b   :  { %v1534_v52 = vmax.f32 %v4197_v57, %v1436_v5  ;;  %v1584_v14 = vmax.f32 %v1486_v7, %v1535_v21  ;;  %v1439_v8 = vmax.f32 %v1105_v50, 0.0  ;;  %v3640_v28 = vadd.f32 %v3271_v63, %v3041_v24  ;;  %v619_v20 = vpop.f32.mrb[65].mxu0  ;;  %v1109_v21 = vpop.f32.mrb[65].mxu1 }
 0x17c   :  { %v1340_v42 = vmax.f32 %v610_v26, 0.0  ;;  %v1438_v36 = vmax.f32 %v1100_v34, 0.0  ;;  %v4198_v5 = vmax.f32 %v3226_v37, 0.0  ;;  %v4200_v27 = vmax.f32 %v4199_v38, 0.0  ;;  %v4205_v34 = vld [vmem:[#allocation31_spill] sm:$0xff] }
 0x17d   :  { %v1583_v22 = vmax.f32 %v1485_v41, %v1534_v52  ;;  %1633 = vst [vmem:[%s4042_s3 + $0x60] sm:$0xff] %v1584_v14  ;;  %v625_v7 = vadd.f32 %v2017_v33, %v3041_v24  ;;  %v1115_v63 = vadd.f32 %v2164_v29, %v3041_v24  ;;  %v4202_v50 = vmax.f32 %v4201_v19, 0.0 }
 0x17e   :  { %v1488_v30 = vmax.f32 %v4198_v5, %v1341_v43  ;;  %v1537_v39 = vmax.f32 %v4200_v27, %v1439_v8  ;;  %v4204_v54 = vmax.f32 %v4203_v40, 0.0  ;;  %v620_v35 = vadd.f32 %v3041_v24, %v619_v20 }
 0x17f   :  { %1632 = vst [vmem:[%s4042_s3 + $0x58] sm:$0xff] %v1583_v22  ;;  %v1487_v12 = vmax.f32 %v4202_v50, %v1340_v42  ;;  %v1110_v41 = vadd.f32 %v3041_v24, %v1109_v21  ;;  %v3662_v18 = vadd.f32 %v3041_v24, %v3283_v61  ;;  %v1343_v52 = vmax.f32 %v625_v7, 0.0  ;;  %v2020_v42 = vpop.f32.mrb[66].mxu0  ;;  %v4208_v7 = vld [vmem:[#allocation27_spill] sm:$0xff]  ;;  %v4210_v21 = vld [vmem:[#allocation28_spill] sm:$0xff] }
 0x180   :  { %v1536_v37 = vmax.f32 %v4204_v54, %v1438_v36  ;;  %v1586_v57 = vmax.f32 %v1488_v30, %v1537_v39  ;;  %v1441_v26 = vmax.f32 %v1115_v63, 0.0  ;;  %v3666_v14 = vadd.f32 %v3041_v24, %v4205_v34  ;;  %v2167_v36 = vpop.f32.mrb[66].mxu1  ;;  %v629_v27 = vpop.f32.mrb[67].mxu0 }
 0x181   :  { %v1342_v8 = vmax.f32 %v620_v35, 0.0  ;;  %v1440_v22 = vmax.f32 %v1110_v41, 0.0  ;;  %v4206_v33 = vmax.f32 %v3247_v58, 0.0  ;;  %v4207_v29 = vmax.f32 %v3253_v49, 0.0  ;;  %v1119_v39 = vpop.f32.mrb[67].mxu1 }
 0x182   :  { %v1585_v43 = vmax.f32 %v1487_v12, %v1536_v37  ;;  %1635 = vst [vmem:[%s4042_s3 + $0x70] sm:$0xff] %v1586_v57  ;;  %v635_v30 = vadd.f32 %v2020_v42, %v3041_v24  ;;  %v1125_v38 = vadd.f32 %v2167_v36, %v3041_v24  ;;  %v4209_v63 = vmax.f32 %v4208_v7, 0.0  ;;  %v2170_v34 = vpop.f32.mrb[68].mxu1 }
 0x183   :  { %v1490_v61 = vmax.f32 %v4206_v33, %v1343_v52  ;;  %v1539_v5 = vmax.f32 %v4207_v29, %v1441_v26  ;;  %v4211_v19 = vmax.f32 %v4210_v21, 0.0  ;;  %v630_v50 = vadd.f32 %v3041_v24, %v629_v27  ;;  %v2023_v26 = vpop.f32.mrb[68].mxu0  ;;  %v1129_v29 = vpop.f32.mrb[69].mxu1 }
 0x184   :  { %1634 = vst [vmem:[%s4042_s3 + $0x68] sm:$0xff] %v1585_v43  ;;  %v1489_v20 = vmax.f32 %v4209_v63, %v1342_v8  ;;  %v1120_v49 = vadd.f32 %v3041_v24, %v1119_v39  ;;  %v1319_v12 = vmax.f32 %v3636_v16, 0.0  ;;  %v1345_v54 = vmax.f32 %v635_v30, 0.0 }
 0x185   :  { %v1538_v58 = vmax.f32 %v4211_v19, %v1440_v22  ;;  %v1588_v40 = vmax.f32 %v1490_v61, %v1539_v5  ;;  %v1443_v37 = vmax.f32 %v1125_v38, 0.0  ;;  %v1417_v35 = vmax.f32 %v3640_v28, 0.0  ;;  %v639_v61 = vpop.f32.mrb[69].mxu0 }
 0x186   :  { %v1344_v57 = vmax.f32 %v630_v50, 0.0  ;;  %v1442_v52 = vmax.f32 %v1120_v49, 0.0  ;;  %v4212_v43 = vmax.f32 %v3267_v59, 0.0  ;;  %v4213_v22 = vmax.f32 %v3277_v46, 0.0  ;;  %v2026_v49 = vpop.f32.mrb[70].mxu0 }
 0x187   :  { %v1587_v41 = vmax.f32 %v1489_v20, %v1538_v58  ;;  %1637 = vst [vmem:[%s4042_s3 + $0x80] sm:$0xff] %v1588_v40  ;;  %v645_v36 = vadd.f32 %v2023_v26, %v3041_v24  ;;  %v1135_v33 = vadd.f32 %v2170_v34, %v3041_v24  ;;  %v4214_v5 = vmax.f32 %v3239_v44, 0.0  ;;  %v2173_v44 = vpop.f32.mrb[70].mxu1 }
 0x188   :  { %v1492_v8 = vmax.f32 %v4212_v43, %v1345_v54  ;;  %v1541_v42 = vmax.f32 %v4213_v22, %v1443_v37  ;;  %v4215_v38 = vmax.f32 %v3243_v55, 0.0  ;;  %v640_v27 = vadd.f32 %v3041_v24, %v639_v61  ;;  %v1139_v26 = vpop.f32.mrb[71].mxu1 }
 0x189   :  { %1636 = vst [vmem:[%s4042_s3 + $0x78] sm:$0xff] %v1587_v41  ;;  %v1491_v30 = vmax.f32 %v4214_v5, %v1344_v57  ;;  %v1130_v46 = vadd.f32 %v3041_v24, %v1129_v29  ;;  %v1318_v39 = vmax.f32 %v3662_v18, 0.0  ;;  %v1347_v63 = vmax.f32 %v645_v36, 0.0  ;;  %v4221_v5 = vld [vmem:[#allocation36_spill] sm:$0xff] }
 0x18a   :  { %v1540_v59 = vmax.f32 %v4215_v38, %v1442_v52  ;;  %v1590_v7 = vmax.f32 %v1492_v8, %v1541_v42  ;;  %v1445_v20 = vmax.f32 %v1135_v33, 0.0  ;;  %v1416_v21 = vmax.f32 %v3666_v14, 0.0  ;;  %v649_v52 = vpop.f32.mrb[71].mxu0  ;;  %v4220_v42 = vld [vmem:[#allocation35_spill] sm:$0xff] }
 0x18b   :  { %v1346_v58 = vmax.f32 %v640_v27, 0.0  ;;  %v1444_v50 = vmax.f32 %v1130_v46, 0.0  ;;  %v4216_v55 = vmax.f32 %v3298_v4, 0.0  ;;  %v4217_v54 = vmax.f32 %v3302_v2, 0.0  ;;  %v2176_v27 = vpop.f32.mrb[72].mxu1  ;;  %v4222_v46 = vld [vmem:[#allocation37_spill] sm:$0xff] }
 0x18c   :  { %v1589_v19 = vmax.f32 %v1491_v30, %v1540_v59  ;;  %1639 = vst [vmem:[%s4042_s3 + $0x90] sm:$0xff] %v1590_v7  ;;  %v655_v41 = vadd.f32 %v2026_v49, %v3041_v24  ;;  %v1145_v57 = vadd.f32 %v2173_v44, %v3041_v24  ;;  %v4218_v34 = vmax.f32 %v3257_v60, 0.0 }
 0x18d   :  { %v1494_v40 = vmax.f32 %v4216_v55, %v1347_v63  ;;  %v1543_v37 = vmax.f32 %v4217_v54, %v1445_v20  ;;  %v4219_v8 = vmax.f32 %v3263_v62, 0.0  ;;  %v650_v22 = vadd.f32 %v3041_v24, %v649_v52  ;;  %v2029_v62 = vpop.f32.mrb[72].mxu0  ;;  %v4224_v20 = vld [vmem:[#allocation38_spill] sm:$0xff]  ;;  %v1149_v55 = vpop.f32.mrb[73].mxu1 }
 0x18e   :  { %1638 = vst [vmem:[%s4042_s3 + $0x88] sm:$0xff] %v1589_v19  ;;  %v1493_v43 = vmax.f32 %v4218_v34, %v1346_v58  ;;  %v1140_v2 = vadd.f32 %v3041_v24, %v1139_v26  ;;  %v3728_v36 = vadd.f32 %v4220_v42, %v3041_v24  ;;  %v1349_v61 = vmax.f32 %v655_v41, 0.0  ;;  %v659_v44 = vpop.f32.mrb[73].mxu0  ;;  %v4228_v41 = vld [vmem:[#allocation32_spill] sm:$0xff] }
 0x18f   :  { %v1542_v4 = vmax.f32 %v4219_v8, %v1444_v50  ;;  %v1592_v33 = vmax.f32 %v1494_v40, %v1543_v37  ;;  %v1447_v29 = vmax.f32 %v1145_v57, 0.0  ;;  %v3732_v30 = vadd.f32 %v4221_v5, %v3041_v24  ;;  %v4226_v40 = vld [vmem:[#allocation30_spill] sm:$0xff]  ;;  %v4231_v42 = vld [vmem:[#allocation40_spill] sm:$0xff] }
 0x190   :  { %v1348_v38 = vmax.f32 %v650_v22, 0.0  ;;  %v1446_v59 = vmax.f32 %v1140_v2, 0.0  ;;  %v4223_v7 = vmax.f32 %v4222_v46, 0.0  ;;  %v4225_v19 = vmax.f32 %v4224_v20, 0.0 }
 0x191   :  { %v1591_v60 = vmax.f32 %v1493_v43, %v1542_v4  ;;  %1641 = vst [vmem:[%s4042_s3 + $0xa0] sm:$0xff] %v1592_v33  ;;  %v665_v50 = vadd.f32 %v2029_v62, %v3041_v24  ;;  %v1155_v49 = vadd.f32 %v2176_v27, %v3041_v24  ;;  %v4227_v54 = vmax.f32 %v4226_v40, 0.0  ;;  %v4230_v43 = vld [vmem:[#allocation39_spill] sm:$0xff] }
 0x192   :  { %v1496_v63 = vmax.f32 %v4223_v7, %v1349_v61  ;;  %v1545_v58 = vmax.f32 %v4225_v19, %v1447_v29  ;;  %v4229_v57 = vmax.f32 %v4228_v41, 0.0  ;;  %v660_v26 = vadd.f32 %v3041_v24, %v659_v44  ;;  %v4236_v44 = vld [vmem:[#allocation34_spill] sm:$0xff] }
 0x193   :  { %1640 = vst [vmem:[%s4042_s3 + $0x98] sm:$0xff] %v1591_v60  ;;  %v1495_v37 = vmax.f32 %v4227_v54, %v1348_v38  ;;  %v1150_v34 = vadd.f32 %v3041_v24, %v1149_v55  ;;  %v3754_v8 = vadd.f32 %v3041_v24, %v4230_v43  ;;  %v1351_v22 = vmax.f32 %v665_v50, 0.0  ;;  %v2032_v60 = vpop.f32.mrb[74].mxu0  ;;  %v2179_v38 = vpop.f32.mrb[74].mxu1 }
 0x194   :  { %v1544_v52 = vmax.f32 %v4229_v57, %v1446_v59  ;;  %v1594_v4 = vmax.f32 %v1496_v63, %v1545_v58  ;;  %v1449_v2 = vmax.f32 %v1155_v49, 0.0  ;;  %v3758_v33 = vadd.f32 %v3041_v24, %v4231_v42  ;;  %v669_v20 = vpop.f32.mrb[75].mxu0  ;;  %v1159_v19 = vpop.f32.mrb[75].mxu1  ;;  %v4234_v58 = vld [vmem:[#allocation33_spill] sm:$0xff] }
 0x195   :  { %v1350_v29 = vmax.f32 %v660_v26, 0.0  ;;  %v1448_v5 = vmax.f32 %v1150_v34, 0.0  ;;  %v4232_v59 = vmax.f32 %v3343_v10, 0.0  ;;  %v4233_v27 = vmax.f32 %v3349_v9, 0.0 }
 0x196   :  { %v1593_v61 = vmax.f32 %v1495_v37, %v1544_v52  ;;  %1643 = vst [vmem:[%s4042_s3 + $0xb0] sm:$0xff] %v1594_v4  ;;  %v675_v7 = vadd.f32 %v2032_v60, %v3041_v24  ;;  %v1165_v63 = vadd.f32 %v2179_v38, %v3041_v24  ;;  %v4235_v50 = vmax.f32 %v4234_v58, 0.0  ;;  %v2035_v4 = vpop.f32.mrb[76].mxu0 }
 0x197   :  { %v1498_v62 = vmax.f32 %v4232_v59, %v1351_v22  ;;  %v1547_v46 = vmax.f32 %v4233_v27, %v1449_v2  ;;  %v4237_v55 = vmax.f32 %v4236_v44, 0.0  ;;  %v670_v40 = vadd.f32 %v3041_v24, %v669_v20  ;;  %v2182_v22 = vpop.f32.mrb[76].mxu1  ;;  %v4238_v2 = vld [vmem:[#allocation2_spill] sm:$0xff]  ;;  %v679_v59 = vpop.f32.mrb[77].mxu0  ;;  %v4241_v27 = vld [vmem:[#allocation41_spill] sm:$0xff] }
 0x198   :  { %1642 = vst [vmem:[%s4042_s3 + $0xa8] sm:$0xff] %v1593_v61  ;;  %v1497_v49 = vmax.f32 %v4235_v50, %v1350_v29  ;;  %v1160_v9 = vadd.f32 %v3041_v24, %v1159_v19  ;;  %v1321_v54 = vmax.f32 %v3728_v36, 0.0  ;;  %v1353_v41 = vmax.f32 %v675_v7, 0.0 }
 0x199   :  { %v1546_v10 = vmax.f32 %v4237_v55, %v1448_v5  ;;  %v1596_v37 = vmax.f32 %v1498_v62, %v1547_v46  ;;  %v1451_v57 = vmax.f32 %v1165_v63, 0.0  ;;  %v1419_v52 = vmax.f32 %v3732_v30, 0.0  ;;  %v1169_v62 = vpop.f32.mrb[77].mxu1  ;;  %v4243_v63 = vld [vmem:[#allocation42_spill] sm:$0xff] }
 0x19a   :  { %v1352_v34 = vmax.f32 %v670_v40, 0.0  ;;  %v1450_v43 = vmax.f32 %v1160_v9, 0.0  ;;  %v4239_v42 = vmax.f32 %v4238_v2, 0.0  ;;  %v4240_v29 = vmax.f32 %v3373_v56, 0.0 }
 0x19b   :  { %v1595_v26 = vmax.f32 %v1497_v49, %v1546_v10  ;;  %1645 = vst [vmem:[%s4042_s3 + $0xc0] sm:$0xff] %v1596_v37  ;;  %v685_v60 = vadd.f32 %v2035_v4, %v3041_v24  ;;  %v1175_v38 = vadd.f32 %v2182_v22, %v3041_v24  ;;  %v4242_v46 = vmax.f32 %v4241_v27, 0.0  ;;  %v4247_v4 = vld [vmem:[#allocation7_spill] sm:$0xff] }
 0x19c   :  { %v1500_v61 = vmax.f32 %v4239_v42, %v1353_v41  ;;  %v1549_v5 = vmax.f32 %v4240_v29, %v1451_v57  ;;  %v4244_v20 = vmax.f32 %v4243_v63, 0.0  ;;  %v680_v58 = vadd.f32 %v3041_v24, %v679_v59  ;;  %v2038_v41 = vpop.f32.mrb[78].mxu0  ;;  %v2185_v57 = vpop.f32.mrb[78].mxu1 }
 0x19d   :  { %1644 = vst [vmem:[%s4042_s3 + $0xb8] sm:$0xff] %v1595_v26  ;;  %v1499_v7 = vmax.f32 %v4242_v46, %v1352_v34  ;;  %v1170_v56 = vadd.f32 %v3041_v24, %v1169_v62  ;;  %v1320_v50 = vmax.f32 %v3754_v8, 0.0  ;;  %v1355_v44 = vmax.f32 %v685_v60, 0.0  ;;  %v4245_v26 = vld [vmem:[#allocation6_spill] sm:$0xff]  ;;  %v689_v29 = vpop.f32.mrb[79].mxu0  ;;  %v4249_v60 = vld [vmem:[#allocation43_spill] sm:$0xff] }
 0x19e   :  { %v1548_v19 = vmax.f32 %v4244_v20, %v1450_v43  ;;  %v1598_v49 = vmax.f32 %v1500_v61, %v1549_v5  ;;  %v1453_v55 = vmax.f32 %v1175_v38, 0.0  ;;  %v1418_v10 = vmax.f32 %v3758_v33, 0.0  ;;  %v1179_v5 = vpop.f32.mrb[79].mxu1  ;;  %v4251_v62 = vld [vmem:[#allocation44_spill] sm:$0xff]  ;;  %v4253_v20 = vld [vmem:[#allocation45_spill] sm:$0xff] }
 0x19f   :  { %v1354_v9 = vmax.f32 %v680_v58, 0.0  ;;  %v1452_v37 = vmax.f32 %v1170_v56, 0.0  ;;  %v4246_v34 = vmax.f32 %v4245_v26, 0.0  ;;  %v4248_v22 = vmax.f32 %v4247_v4, 0.0  ;;  %v2188_v26 = vpop.f32.mrb[80].mxu1 }
 0x1a0   :  { %v1597_v40 = vmax.f32 %v1499_v7, %v1548_v19  ;;  %1647 = vst [vmem:[%s4042_s3 + $0xd0] sm:$0xff] %v1598_v49  ;;  %v695_v42 = vadd.f32 %v2038_v41, %v3041_v24  ;;  %v1185_v61 = vadd.f32 %v2185_v57, %v3041_v24  ;;  %v4250_v38 = vmax.f32 %v4249_v60, 0.0  ;;  %v2041_v57 = vpop.f32.mrb[80].mxu0 }
 0x1a1   :  { %v1502_v43 = vmax.f32 %v4246_v34, %v1355_v44  ;;  %v1551_v2 = vmax.f32 %v4248_v22, %v1453_v55  ;;  %v4252_v27 = vmax.f32 %v4251_v62, 0.0  ;;  %v690_v7 = vadd.f32 %v3041_v24, %v689_v29  ;;  %v3825_v44 = vld [vmem:[%s4041_s2] ss:$0 sm:$0xff]  ;;  %v4257_v29 = vld [vmem:[#allocation3_spill] sm:$0xff] }
 0x1a2   :  { %1646 = vst [vmem:[%s4042_s3 + $0xc8] sm:$0xff] %v1597_v40  ;;  %v1501_v59 = vmax.f32 %v4250_v38, %v1354_v9  ;;  %v1180_v63 = vadd.f32 %v3041_v24, %v1179_v5  ;;  %v3820_v19 = vadd.f32 %v4253_v20, %v3041_v24  ;;  %v1357_v56 = vmax.f32 %v695_v42, 0.0  ;;  %v4254_v55 = vld [vmem:[#allocation46_spill] sm:$0xff]  ;;  %v699_v42 = vpop.f32.mrb[81].mxu0  ;;  %v4259_v38 = vld [vmem:[#allocation5_spill] sm:$0xff] }
 0x1a3   :  { %v1550_v46 = vmax.f32 %v4252_v27, %v1452_v37  ;;  %v1600_v58 = vmax.f32 %v1502_v43, %v1551_v2  ;;  %v1455_v49 = vmax.f32 %v1185_v61, 0.0  ;;  %v3829_v40 = vadd.f32 %v3825_v44, %v4254_v55  ;;  %v1189_v61 = vpop.f32.mrb[81].mxu1  ;;  %v4261_v27 = vld [vmem:[#allocation4_spill] sm:$0xff] }
 0x1a4   :  { %v1356_v37 = vmax.f32 %v690_v7, 0.0  ;;  %v1454_v41 = vmax.f32 %v1180_v63, 0.0  ;;  %v4255_v24 = vmax.f32 %v3418_v15, 0.0  ;;  %v4256_v43 = vmax.f32 %v3422_v0, 0.0 }
 0x1a5   :  { %v1599_v9 = vmax.f32 %v1501_v59, %v1550_v46  ;;  %1649 = vst [vmem:[%s4042_s3 + $0xe0] sm:$0xff] %v1600_v58  ;;  %v705_v22 = vadd.f32 %v3825_v44, %v2041_v57  ;;  %v1195_v2 = vadd.f32 %v3825_v44, %v2188_v26  ;;  %v4258_v5 = vmax.f32 %v4257_v29, 0.0  ;;  %v4262_v58 = vld [vmem:[#allocation47_spill] sm:$0xff] }
 0x1a6   :  { %v1504_v34 = vmax.f32 %v4255_v24, %v1357_v56  ;;  %v1553_v4 = vmax.f32 %v4256_v43, %v1455_v49  ;;  %v4260_v59 = vmax.f32 %v4259_v38, 0.0  ;;  %v700_v62 = vadd.f32 %v3825_v44, %v699_v42  ;;  %v4265_v42 = vld [vmem:[#allocation8_spill] sm:$0xff] }
 0x1a7   :  { %1648 = vst [vmem:[%s4042_s3 + $0xd8] sm:$0xff] %v1599_v9  ;;  %v1503_v60 = vmax.f32 %v4258_v5, %v1356_v37  ;;  %v1190_v0 = vadd.f32 %v3825_v44, %v1189_v61  ;;  %v3851_v46 = vadd.f32 %v3825_v44, %v4261_v27  ;;  %v1359_v63 = vmax.f32 %v705_v22, 0.0  ;;  %v2044_v37 = vpop.f32.mrb[82].mxu0  ;;  %v4267_v5 = vld [vmem:[#allocation9_spill] sm:$0xff] }
 0x1a8   :  { %v1552_v15 = vmax.f32 %v4260_v59, %v1454_v41  ;;  %v1602_v7 = vmax.f32 %v1504_v34, %v1553_v4  ;;  %v1457_v20 = vmax.f32 %v1195_v2, 0.0  ;;  %v3855_v56 = vadd.f32 %v3825_v44, %v4262_v58  ;;  %v2191_v41 = vpop.f32.mrb[82].mxu1  ;;  %v709_v22 = vpop.f32.mrb[83].mxu0 }
 0x1a9   :  { %v1358_v55 = vmax.f32 %v700_v62, 0.0  ;;  %v1456_v9 = vmax.f32 %v1190_v0, 0.0  ;;  %v4263_v57 = vmax.f32 %v3439_v6, 0.0  ;;  %v4264_v24 = vmax.f32 %v3445_v1, 0.0  ;;  %v1199_v2 = vpop.f32.mrb[83].mxu1  ;;  %v2047_v58 = vpop.f32.mrb[84].mxu0 }
 0x1aa   :  { %v1601_v49 = vmax.f32 %v1503_v60, %v1552_v15  ;;  %1651 = vst [vmem:[%s4042_s3 + $0xf0] sm:$0xff] %v1602_v7  ;;  %v715_v43 = vadd.f32 %v3825_v44, %v2044_v37  ;;  %v1205_v4 = vadd.f32 %v3825_v44, %v2191_v41  ;;  %v4266_v61 = vmax.f32 %v4265_v42, 0.0  ;;  %v4270_v37 = vld [vmem:[#allocation53_spill] sm:$0xff]  ;;  %v4274_v42 = vld [vmem:[#allocation15_spill] sm:$0xff] }
 0x1ab   :  { %v1506_v26 = vmax.f32 %v4263_v57, %v1359_v63  ;;  %v1555_v34 = vmax.f32 %v4264_v24, %v1457_v20  ;;  %v4268_v60 = vmax.f32 %v4267_v5, 0.0  ;;  %v710_v38 = vadd.f32 %v3825_v44, %v709_v22 }
 0x1ac   :  { %1650 = vst [vmem:[%s4042_s3 + $0xe8] sm:$0xff] %v1601_v49  ;;  %v1505_v29 = vmax.f32 %v4266_v61, %v1358_v55  ;;  %v1200_v1 = vadd.f32 %v3825_v44, %v1199_v2  ;;  %v1323_v59 = vmax.f32 %v3820_v19, 0.0  ;;  %v1361_v62 = vmax.f32 %v715_v43, 0.0  ;;  %v2194_v49 = vpop.f32.mrb[84].mxu1 }
 0x1ad   :  { %v1554_v6 = vmax.f32 %v4268_v60, %v1456_v9  ;;  %v1604_v15 = vmax.f32 %v1506_v26, %v1555_v34  ;;  %v1459_v0 = vmax.f32 %v1205_v4, 0.0  ;;  %v1421_v27 = vmax.f32 %v3829_v40, 0.0  ;;  %v719_v34 = vpop.f32.mrb[85].mxu0  ;;  %v1209_v43 = vpop.f32.mrb[85].mxu1  ;;  %v4272_v4 = vld [vmem:[#allocation14_spill] sm:$0xff] }
 0x1ae   :  { %v1360_v63 = vmax.f32 %v710_v38, 0.0  ;;  %v1458_v20 = vmax.f32 %v1200_v1, 0.0  ;;  %v4269_v55 = vmax.f32 %v3459_v48, 0.0  ;;  %v4271_v41 = vmax.f32 %v4270_v37, 0.0 }
 0x1af   :  { %v1603_v7 = vmax.f32 %v1505_v29, %v1554_v6  ;;  %1653 = vst [vmem:[%s4042_s3 + $0x100] sm:$0xff] %v1604_v15  ;;  %v725_v26 = vadd.f32 %v3825_v44, %v2047_v58  ;;  %v1215_v24 = vadd.f32 %v3825_v44, %v2194_v49  ;;  %v4273_v22 = vmax.f32 %v4272_v4, 0.0  ;;  %v2050_v58 = vpop.f32.mrb[86].mxu0  ;;  %v2197_v49 = vpop.f32.mrb[86].mxu1 }
 0x1b0   :  { %v1508_v9 = vmax.f32 %v4269_v55, %v1361_v62  ;;  %v1557_v57 = vmax.f32 %v4271_v41, %v1459_v0  ;;  %v4275_v61 = vmax.f32 %v4274_v42, 0.0  ;;  %v720_v29 = vadd.f32 %v3825_v44, %v719_v34  ;;  %v729_v37 = vpop.f32.mrb[87].mxu0  ;;  %v1219_v41 = vpop.f32.mrb[87].mxu1  ;;  %v4278_v34 = vld [vmem:[#allocation50_spill] sm:$0xff] }
 0x1b1   :  { %1652 = vst [vmem:[%s4042_s3 + $0xf8] sm:$0xff] %v1603_v7  ;;  %v1507_v2 = vmax.f32 %v4273_v22, %v1360_v63  ;;  %v1210_v5 = vadd.f32 %v3825_v44, %v1209_v43  ;;  %v1322_v60 = vmax.f32 %v3851_v46, 0.0  ;;  %v1363_v38 = vmax.f32 %v725_v26, 0.0 }
 0x1b2   :  { %v1556_v48 = vmax.f32 %v4275_v61, %v1458_v20  ;;  %v1606_v6 = vmax.f32 %v1508_v9, %v1557_v57  ;;  %v1461_v1 = vmax.f32 %v1215_v24, 0.0  ;;  %v1420_v15 = vmax.f32 %v3855_v56, 0.0  ;;  %v4276_v57 = vld [vmem:[#allocation17_spill] sm:$0xff] }
 0x1b3   :  { %v1362_v0 = vmax.f32 %v720_v29, 0.0  ;;  %v1460_v7 = vmax.f32 %v1210_v5, 0.0  ;;  %v1510_v63 = vmax.f32 %v1314_v17, %v1363_v38  ;;  %v735_v55 = vadd.f32 %v3825_v44, %v2050_v58  ;;  %v4281_v61 = vld [vmem:[#allocation49_spill] sm:$0xff]  ;;  %v2053_v38 = vpop.f32.mrb[88].mxu0 }
 0x1b4   :  { %v1605_v62 = vmax.f32 %v1507_v2, %v1556_v48  ;;  %1655 = vst [vmem:[%s4042_s3 + $0x110] sm:$0xff] %v1606_v6  ;;  %v1559_v20 = vmax.f32 %v1412_v11, %v1461_v1  ;;  %v1225_v9 = vadd.f32 %v3825_v44, %v2197_v49  ;;  %v4277_v26 = vmax.f32 %v4276_v57, 0.0  ;;  %v4280_v11 = vld [vmem:[#allocation48_spill] sm:$0xff]  ;;  %v2200_v1 = vpop.f32.mrb[88].mxu1  ;;  %v739_v49 = vpop.f32.mrb[89].mxu0 }
 0x1b5   :  { %v4279_v43 = vmax.f32 %v4278_v34, 0.0  ;;  %v730_v17 = vadd.f32 %v3825_v44, %v729_v37  ;;  %v1220_v25 = vadd.f32 %v3825_v44, %v1219_v41  ;;  %v3917_v4 = vadd.f32 %v3825_v44, %v4280_v11  ;;  %v4284_v37 = vld [vmem:[#allocation55_spill] sm:$0xff] }
 0x1b6   :  { %1654 = vst [vmem:[%s4042_s3 + $0x108] sm:$0xff] %v1605_v62  ;;  %v1509_v24 = vmax.f32 %v4277_v26, %v1362_v0  ;;  %v1608_v22 = vmax.f32 %v1510_v63, %v1559_v20  ;;  %v1365_v2 = vmax.f32 %v735_v55, 0.0  ;;  %v1463_v42 = vmax.f32 %v1225_v9, 0.0  ;;  %v1229_v63 = vpop.f32.mrb[89].mxu1  ;;  %v4282_v20 = vld [vmem:[#allocation54_spill] sm:$0xff] }
 0x1b7   :  { %v1558_v47 = vmax.f32 %v4279_v43, %v1460_v7  ;;  %v3921_v48 = vadd.f32 %v3825_v44, %v4281_v61  ;;  %v1364_v5 = vmax.f32 %v730_v17, 0.0  ;;  %v1462_v6 = vmax.f32 %v1220_v25, 0.0  ;;  %v4287_v43 = vld [vmem:[#allocation11_spill] sm:$0xff] }
 0x1b8   :  { %1657 = vst [vmem:[%s4042_s3 + $0x120] sm:$0xff] %v1608_v22  ;;  %v1512_v62 = vmax.f32 %v1316_v13, %v1365_v2  ;;  %v1561_v0 = vmax.f32 %v1414_v32, %v1463_v42  ;;  %v745_v7 = vadd.f32 %v3825_v44, %v2053_v38  ;;  %v1235_v58 = vadd.f32 %v3825_v44, %v2200_v1  ;;  %v4286_v32 = vld [vmem:[#allocation10_spill] sm:$0xff]  ;;  %v2056_v22 = vpop.f32.mrb[90].mxu0  ;;  %v2203_v2 = vpop.f32.mrb[90].mxu1 }
 0x1b9   :  { %v1607_v29 = vmax.f32 %v1509_v24, %v1558_v47  ;;  %v4283_v55 = vmax.f32 %v4282_v20, 0.0  ;;  %v4285_v41 = vmax.f32 %v4284_v37, 0.0  ;;  %v740_v13 = vadd.f32 %v3825_v44, %v739_v49  ;;  %v1239_v38 = vpop.f32.mrb[91].mxu1 }
 0x1ba   :  { %v1230_v45 = vadd.f32 %v3825_v44, %v1229_v63  ;;  %v3943_v57 = vadd.f32 %v3825_v44, %v4286_v32  ;;  %v1610_v26 = vmax.f32 %v1512_v62, %v1561_v0  ;;  %v1367_v24 = vmax.f32 %v745_v7, 0.0  ;;  %v2206_v53 = vpop.f32.mrb[92].mxu1 }
 0x1bb   :  { %1656 = vst [vmem:[%s4042_s3 + $0x118] sm:$0xff] %v1607_v29  ;;  %v1511_v9 = vmax.f32 %v4283_v55, %v1364_v5  ;;  %v1560_v31 = vmax.f32 %v4285_v41, %v1462_v6  ;;  %v1465_v34 = vmax.f32 %v1235_v58, 0.0  ;;  %v3947_v47 = vadd.f32 %v3825_v44, %v4287_v43  ;;  %v749_v6 = vpop.f32.mrb[91].mxu0  ;;  %v1249_v41 = vpop.f32.mrb[93].mxu1 }
 0x1bc   :  { %v1366_v25 = vmax.f32 %v740_v13, 0.0  ;;  %v1464_v11 = vmax.f32 %v1230_v45, 0.0  ;;  %1659 = vst [vmem:[%s4042_s3 + $0x130] sm:$0xff] %v1610_v26  ;;  %v1514_v42 = vmax.f32 %v1318_v39, %v1367_v24  ;;  %v755_v29 = vadd.f32 %v3825_v44, %v2056_v22  ;;  %v2059_v55 = vpop.f32.mrb[92].mxu0 }
 0x1bd   :  { %v1609_v17 = vmax.f32 %v1511_v9, %v1560_v31  ;;  %v1563_v61 = vmax.f32 %v1416_v21, %v1465_v34  ;;  %v1245_v5 = vadd.f32 %v3825_v44, %v2203_v2  ;;  %v750_v39 = vadd.f32 %v3825_v44, %v749_v6  ;;  %v759_v37 = vpop.f32.mrb[93].mxu0 }
 0x1be   :  { %v1513_v1 = vmax.f32 %v1317_v51, %v1366_v25  ;;  %v1562_v18 = vmax.f32 %v1415_v23, %v1464_v11  ;;  %v1240_v14 = vadd.f32 %v3825_v44, %v1239_v38  ;;  %v1325_v21 = vmax.f32 %v3917_v4, 0.0  ;;  %v2062_v16 = vpop.f32.mrb[94].mxu0 }
 0x1bf   :  { %1658 = vst [vmem:[%s4042_s3 + $0x128] sm:$0xff] %v1609_v17  ;;  %v1612_v62 = vmax.f32 %v1514_v42, %v1563_v61  ;;  %v1369_v0 = vmax.f32 %v755_v29, 0.0  ;;  %v1467_v7 = vmax.f32 %v1245_v5, 0.0  ;;  %v1324_v58 = vmax.f32 %v3943_v57, 0.0  ;;  %v4288_v57 = vld [vmem:[#allocation51_spill] sm:$0xff]  ;;  %v769_v25 = vpop.f32.mrb[95].mxu0 }
 0x1c0   :  { %v1611_v49 = vmax.f32 %v1513_v1, %v1562_v18  ;;  %v1368_v63 = vmax.f32 %v750_v39, 0.0  ;;  %v1466_v20 = vmax.f32 %v1240_v14, 0.0  ;;  %v765_v23 = vadd.f32 %v3825_v44, %v2059_v55  ;;  %v2065_v18 = vpop.f32.mrb[96].mxu0 }
 0x1c1   :  { %1661 = vst [vmem:[%s4042_s3 + $0x140] sm:$0xff] %v1612_v62  ;;  %v1516_v3 = vmax.f32 %v1320_v50, %v1369_v0  ;;  %v1565_v51 = vmax.f32 %v1418_v10, %v1467_v7  ;;  %v1255_v9 = vadd.f32 %v3825_v44, %v2206_v53  ;;  %v760_v50 = vadd.f32 %v3825_v44, %v759_v37  ;;  %v779_v14 = vpop.f32.mrb[97].mxu0 }
 0x1c2   :  { %1660 = vst [vmem:[%s4042_s3 + $0x138] sm:$0xff] %v1611_v49  ;;  %v1515_v31 = vmax.f32 %v1319_v12, %v1368_v63  ;;  %v1564_v8 = vmax.f32 %v1417_v35, %v1466_v20  ;;  %v1250_v33 = vadd.f32 %v3825_v44, %v1249_v41  ;;  %v1422_v10 = vmax.f32 %v3947_v47, 0.0  ;;  %v2209_v12 = vpop.f32.mrb[94].mxu1 }
 0x1c3   :  { %v1614_v13 = vmax.f32 %v1516_v3, %v1565_v51  ;;  %v1371_v45 = vmax.f32 %v765_v23, 0.0  ;;  %v1469_v32 = vmax.f32 %v1255_v9, 0.0  ;;  %v540_v26 = vadd.f32 %v3825_v44, %v4288_v57  ;;  %v1259_v11 = vpop.f32.mrb[95].mxu1 }
 0x1c4   :  { %v1613_v24 = vmax.f32 %v1515_v31, %v1564_v8  ;;  %v1370_v34 = vmax.f32 %v760_v50, 0.0  ;;  %v1468_v43 = vmax.f32 %v1250_v33, 0.0  ;;  %v775_v47 = vadd.f32 %v3825_v44, %v2062_v16  ;;  %v2212_v36 = vpop.f32.mrb[96].mxu1 }
 0x1c5   :  { %1663 = vst [vmem:[%s4042_s3 + $0x150] sm:$0xff] %v1614_v13  ;;  %v1518_v28 = vmax.f32 %v1322_v60, %v1371_v45  ;;  %v1567_v35 = vmax.f32 %v1420_v15, %v1469_v32  ;;  %v1265_v17 = vadd.f32 %v3825_v44, %v2209_v12  ;;  %v770_v60 = vadd.f32 %v3825_v44, %v769_v25  ;;  %v4289_v15 = vld [vmem:[#allocation52_spill] sm:$0xff]  ;;  %v1269_v62 = vpop.f32.mrb[97].mxu1 }
 0x1c6   :  { %1662 = vst [vmem:[%s4042_s3 + $0x148] sm:$0xff] %v1613_v24  ;;  %v1517_v22 = vmax.f32 %v1321_v54, %v1370_v34  ;;  %v1566_v46 = vmax.f32 %v1419_v52, %v1468_v43  ;;  %v1260_v56 = vadd.f32 %v3825_v44, %v1259_v11  ;;  %v1030_v2 = vadd.f32 %v3825_v44, %v4289_v15 }
 0x1c7   :  { %v1616_v42 = vmax.f32 %v1518_v28, %v1567_v35  ;;  %v1373_v61 = vmax.f32 %v775_v47, 0.0  ;;  %v1471_v29 = vmax.f32 %v1265_v17, 0.0  ;;  %v1326_v5 = vmax.f32 %v540_v26, 0.0 }
 0x1c8   :  { %v1615_v6 = vmax.f32 %v1517_v22, %v1566_v46  ;;  %v1372_v38 = vmax.f32 %v770_v60, 0.0  ;;  %v1470_v1 = vmax.f32 %v1260_v56, 0.0  ;;  %v785_v52 = vadd.f32 %v3825_v44, %v2065_v18 }
 0x1c9   :  { %1665 = vst [vmem:[%s4042_s3 + $0x160] sm:$0xff] %v1616_v42  ;;  %v1520_v30 = vmax.f32 %v1324_v58, %v1373_v61  ;;  %v1569_v54 = vmax.f32 %v1422_v10, %v1471_v29  ;;  %v1275_v39 = vadd.f32 %v3825_v44, %v2212_v36  ;;  %v780_v49 = vadd.f32 %v3825_v44, %v779_v14 }
 0x1ca   :  { %1664 = vst [vmem:[%s4042_s3 + $0x158] sm:$0xff] %v1615_v6  ;;  %v1519_v0 = vmax.f32 %v1323_v59, %v1372_v38  ;;  %v1568_v7 = vmax.f32 %v1421_v27, %v1470_v1  ;;  %v1270_v58 = vadd.f32 %v3825_v44, %v1269_v62  ;;  %v1424_v63 = vmax.f32 %v1030_v2, 0.0 }
 0x1cb   :  { %v1618_v20 = vmax.f32 %v1520_v30, %v1569_v54  ;;  %v1375_v55 = vmax.f32 %v785_v52, 0.0  ;;  %v1473_v53 = vmax.f32 %v1275_v39, 0.0  ;;  %v1423_v3 = vmax.f32 %v3921_v48, 0.0 }
 0x1cc   :  { %v1617_v51 = vmax.f32 %v1519_v0, %v1568_v7  ;;  %v1374_v23 = vmax.f32 %v780_v49, 0.0  ;;  %v1472_v9 = vmax.f32 %v1270_v58, 0.0 }
 0x1cd   :  { %1667 = vst [vmem:[%s4042_s3 + $0x170] sm:$0xff] %v1618_v20  ;;  %v1522_v19 = vmax.f32 %v1326_v5, %v1375_v55  ;;  %v1571_v40 = vmax.f32 %v1424_v63, %v1473_v53 }
 0x1ce   :  { %1666 = vst [vmem:[%s4042_s3 + $0x168] sm:$0xff] %v1617_v51  ;;  %v1521_v44 = vmax.f32 %v1325_v21, %v1374_v23  ;;  %v1570_v59 = vmax.f32 %v1423_v3, %v1472_v9 }
 0x1cf   :  { %v1620_v27 = vmax.f32 %v1522_v19, %v1571_v40 }
 0x1d0   :  { %v1619_v37 = vmax.f32 %v1521_v44, %v1570_v59 }
 0x1d1   :  { %1669 = vst [vmem:[%s4042_s3 + $0x180] sm:$0xff] %v1620_v27 }
 0x1d2   :  { %1668 = vst [vmem:[%s4042_s3 + $0x178] sm:$0xff] %v1619_v37 }

// kernel: cnn3_forward.4
= control target key start
LH: loop header
LB: loop body
LE: loop exit
PB: predicated region body
PF: predicated region fallthrough
CT: control target
= control target key end

     0   :  { %v1253_v0 = vmov 0.0|0.0   ;;  %s2335_s1 = inlined_call_operand.vmem [shape: f32[512,128], index: 1, kind: input, shape index: {}]   ;;  %s2336_s0 = inlined_call_operand.vmem [shape: f32[416,512], index: 0, kind: input, shape index: {}]   ;;  %s2337_s2 = inlined_call_operand.vmem [shape: f32[1,128], index: 2, kind: input, shape index: {}]   ;;  %s2338_s3 = inlined_call_operand.vmem [shape: f32[104,128], index: 3, kind: output, shape index: {}]  }
   0x1   :  { %1052 = vmatprep.subr.bf16.mxu1 %v1253_v0  ;;  %v222_v1 = vld [vmem:[%s2335_s1] sm:$0xff]  ;;  %v223_v2 = vld [vmem:[%s2335_s1 + $0x8] sm:$0xff]  ;;  %1100 = vmatprep.subr.bf16.mxu0 %v1253_v0  ;;  %v224_v6 = vld [vmem:[%s2335_s1 + $0x10] sm:$0xff] }
   0x2   :  { %v254_v3 = vld [vmem:[%s2335_s1 + $0x100] sm:$0xff]  ;;  %v1053_v4 = vpack.c.bf16 %v223_v2, %v222_v1  ;;  %v255_v5 = vld [vmem:[%s2335_s1 + $0x108] sm:$0xff]  ;;  %v225_v7 = vld [vmem:[%s2335_s1 + $0x18] sm:$0xff] }
   0x3   :  { %v1101_v8 = vpack.c.bf16 %v255_v5, %v254_v3  ;;  %v256_v9 = vld [vmem:[%s2335_s1 + $0x110] sm:$0xff]  ;;  %v257_v10 = vld [vmem:[%s2335_s1 + $0x118] sm:$0xff]  ;;  %v1056_v11 = vpack.c.bf16 %v225_v7, %v224_v6  ;;  %v226_v13 = vld [vmem:[%s2335_s1 + $0x20] sm:$0xff] }
   0x4   :  { %1054 = vmatpush1.bf16.msra.mxu1 %v1053_v4  ;;  %v1104_v12 = vpack.c.bf16 %v257_v10, %v256_v9  ;;  %v227_v14 = vld [vmem:[%s2335_s1 + $0x28] sm:$0xff]  ;;  %v258_v15 = vld [vmem:[%s2335_s1 + $0x120] sm:$0xff]  ;;  %v228_v19 = vld [vmem:[%s2335_s1 + $0x30] sm:$0xff] }
   0x5   :  { %1102 = vmatpush1.bf16.msra.mxu0 %v1101_v8  ;;  %1055 = vmatprep.subr.bf16.mxu1 %v1253_v0  ;;  %v259_v16 = vld [vmem:[%s2335_s1 + $0x128] sm:$0xff]  ;;  %v1059_v17 = vpack.c.bf16 %v227_v14, %v226_v13  ;;  %v229_v20 = vld [vmem:[%s2335_s1 + $0x38] sm:$0xff]  ;;  %v260_v21 = vld [vmem:[%s2335_s1 + $0x130] sm:$0xff] }
   0x6   :  { %1103 = vmatprep.subr.bf16.mxu0 %v1253_v0  ;;  %v1107_v18 = vpack.c.bf16 %v259_v16, %v258_v15  ;;  %v261_v22 = vld [vmem:[%s2335_s1 + $0x138] sm:$0xff]  ;;  %v1062_v23 = vpack.c.bf16 %v229_v20, %v228_v19  ;;  %v230_v25 = vld [vmem:[%s2335_s1 + $0x40] sm:$0xff]  ;;  %v231_v26 = vld [vmem:[%s2335_s1 + $0x48] sm:$0xff] }
   0x7   :  { %v1110_v24 = vpack.c.bf16 %v261_v22, %v260_v21  ;;  %v262_v27 = vld [vmem:[%s2335_s1 + $0x140] sm:$0xff]  ;;  %v263_v28 = vld [vmem:[%s2335_s1 + $0x148] sm:$0xff]  ;;  %v1065_v29 = vpack.c.bf16 %v231_v26, %v230_v25  ;;  %v232_v31 = vld [vmem:[%s2335_s1 + $0x50] sm:$0xff] }
   0x8   :  { %1057 = vmatpush1.bf16.msra.mxu1 %v1056_v11  ;;  %v1113_v30 = vpack.c.bf16 %v263_v28, %v262_v27  ;;  %v233_v32 = vld [vmem:[%s2335_s1 + $0x58] sm:$0xff]  ;;  %v264_v33 = vld [vmem:[%s2335_s1 + $0x150] sm:$0xff]  ;;  %v234_v37 = vld [vmem:[%s2335_s1 + $0x60] sm:$0xff] }
   0x9   :  { %1105 = vmatpush1.bf16.msra.mxu0 %v1104_v12  ;;  %1058 = vmatprep.subr.bf16.mxu1 %v1253_v0  ;;  %v265_v34 = vld [vmem:[%s2335_s1 + $0x158] sm:$0xff]  ;;  %v1068_v35 = vpack.c.bf16 %v233_v32, %v232_v31  ;;  %v235_v38 = vld [vmem:[%s2335_s1 + $0x68] sm:$0xff]  ;;  %v266_v39 = vld [vmem:[%s2335_s1 + $0x160] sm:$0xff] }
   0xa   :  { %1106 = vmatprep.subr.bf16.mxu0 %v1253_v0  ;;  %v1116_v36 = vpack.c.bf16 %v265_v34, %v264_v33  ;;  %v267_v40 = vld [vmem:[%s2335_s1 + $0x168] sm:$0xff]  ;;  %v17_v42 = vld [vmem:[%s2336_s0 + $0x18] sm:$0xff]  ;;  %v1071_v43 = vpack.c.bf16 %v235_v38, %v234_v37  ;;  %v236_v45 = vld [vmem:[%s2335_s1 + $0x70] sm:$0xff] }
   0xb   :  { %v15_v41 = vld [vmem:[%s2336_s0 + $0x8] sm:$0xff]  ;;  %682 = vmatprep.mubr.f32.mxu0 %v17_v42  ;;  %v1119_v44 = vpack.c.bf16 %v267_v40, %v266_v39  ;;  %v237_v46 = vld [vmem:[%s2335_s1 + $0x78] sm:$0xff]  ;;  %v268_v47 = vld [vmem:[%s2335_s1 + $0x170] sm:$0xff] }
   0xc   :  { %1060 = vmatpush1.bf16.msra.mxu1 %v1059_v17  ;;  %357 = vmatprep.mubr.f32.mxu1 %v15_v41  ;;  %v269_v48 = vld [vmem:[%s2335_s1 + $0x178] sm:$0xff]  ;;  %v1074_v49 = vpack.c.bf16 %v237_v46, %v236_v45  ;;  %v238_v51 = vld [vmem:[%s2335_s1 + $0x80] sm:$0xff]  ;;  %v239_v52 = vld [vmem:[%s2335_s1 + $0x88] sm:$0xff] }
   0xd   :  { %1108 = vmatpush1.bf16.msra.mxu0 %v1107_v18  ;;  %1061 = vmatprep.subr.bf16.mxu1 %v1253_v0  ;;  %v1122_v50 = vpack.c.bf16 %v269_v48, %v268_v47  ;;  %v270_v53 = vld [vmem:[%s2335_s1 + $0x180] sm:$0xff]  ;;  %v271_v54 = vld [vmem:[%s2335_s1 + $0x188] sm:$0xff]  ;;  %v1077_v55 = vpack.c.bf16 %v239_v52, %v238_v51  ;;  %v240_v57 = vld [vmem:[%s2335_s1 + $0x90] sm:$0xff] }
   0xe   :  { %1109 = vmatprep.subr.bf16.mxu0 %v1253_v0  ;;  %v1125_v56 = vpack.c.bf16 %v271_v54, %v270_v53  ;;  %v241_v58 = vld [vmem:[%s2335_s1 + $0x98] sm:$0xff]  ;;  %v272_v59 = vld [vmem:[%s2335_s1 + $0x190] sm:$0xff]  ;;  %v242_v63 = vld [vmem:[%s2335_s1 + $0xa0] sm:$0xff] }
   0xf   :  { %v273_v60 = vld [vmem:[%s2335_s1 + $0x198] sm:$0xff]  ;;  %v1080_v61 = vpack.c.bf16 %v241_v58, %v240_v57  ;;  %v243_v1 = vld [vmem:[%s2335_s1 + $0xa8] sm:$0xff]  ;;  %v274_v2 = vld [vmem:[%s2335_s1 + $0x1a0] sm:$0xff] }
  0x10   :  { %1063 = vmatpush1.bf16.msra.mxu1 %v1062_v23  ;;  %v1128_v62 = vpack.c.bf16 %v273_v60, %v272_v59  ;;  %v275_v3 = vld [vmem:[%s2335_s1 + $0x1a8] sm:$0xff]  ;;  %v1083_v4 = vpack.c.bf16 %v243_v1, %v242_v63  ;;  %v244_v6 = vld [vmem:[%s2335_s1 + $0xb0] sm:$0xff]  ;;  %v245_v7 = vld [vmem:[%s2335_s1 + $0xb8] sm:$0xff] }
  0x11   :  { %1111 = vmatpush1.bf16.msra.mxu0 %v1110_v24  ;;  %1064 = vmatprep.subr.bf16.mxu1 %v1253_v0  ;;  %v1131_v5 = vpack.c.bf16 %v275_v3, %v274_v2  ;;  %v276_v8 = vld [vmem:[%s2335_s1 + $0x1b0] sm:$0xff]  ;;  %v277_v9 = vld [vmem:[%s2335_s1 + $0x1b8] sm:$0xff]  ;;  %v1086_v10 = vpack.c.bf16 %v245_v7, %v244_v6  ;;  %v246_v12 = vld [vmem:[%s2335_s1 + $0xc0] sm:$0xff] }
  0x12   :  { %1112 = vmatprep.subr.bf16.mxu0 %v1253_v0  ;;  %v1134_v11 = vpack.c.bf16 %v277_v9, %v276_v8  ;;  %v247_v13 = vld [vmem:[%s2335_s1 + $0xc8] sm:$0xff]  ;;  %v278_v14 = vld [vmem:[%s2335_s1 + $0x1c0] sm:$0xff]  ;;  %v248_v18 = vld [vmem:[%s2335_s1 + $0xd0] sm:$0xff] }
  0x13   :  { %v279_v15 = vld [vmem:[%s2335_s1 + $0x1c8] sm:$0xff]  ;;  %v1089_v16 = vpack.c.bf16 %v247_v13, %v246_v12  ;;  %v249_v19 = vld [vmem:[%s2335_s1 + $0xd8] sm:$0xff]  ;;  %v280_v20 = vld [vmem:[%s2335_s1 + $0x1d0] sm:$0xff] }
  0x14   :  { %1066 = vmatpush1.bf16.msra.mxu1 %v1065_v29  ;;  %v1137_v17 = vpack.c.bf16 %v279_v15, %v278_v14  ;;  %v281_v21 = vld [vmem:[%s2335_s1 + $0x1d8] sm:$0xff]  ;;  %v1092_v22 = vpack.c.bf16 %v249_v19, %v248_v18  ;;  %v250_v24 = vld [vmem:[%s2335_s1 + $0xe0] sm:$0xff]  ;;  %v251_v25 = vld [vmem:[%s2335_s1 + $0xe8] sm:$0xff] }
  0x15   :  { %1114 = vmatpush1.bf16.msra.mxu0 %v1113_v30  ;;  %1067 = vmatprep.subr.bf16.mxu1 %v1253_v0  ;;  %v1140_v23 = vpack.c.bf16 %v281_v21, %v280_v20  ;;  %v282_v26 = vld [vmem:[%s2335_s1 + $0x1e0] sm:$0xff]  ;;  %v283_v27 = vld [vmem:[%s2335_s1 + $0x1e8] sm:$0xff]  ;;  %v1095_v28 = vpack.c.bf16 %v251_v25, %v250_v24  ;;  %v252_v30 = vld [vmem:[%s2335_s1 + $0xf0] sm:$0xff] }
  0x16   :  { %1115 = vmatprep.subr.bf16.mxu0 %v1253_v0  ;;  %v1143_v29 = vpack.c.bf16 %v283_v27, %v282_v26  ;;  %v253_v31 = vld [vmem:[%s2335_s1 + $0xf8] sm:$0xff]  ;;  %v284_v32 = vld [vmem:[%s2335_s1 + $0x1f0] sm:$0xff]  ;;  %v19_v38 = vld [vmem:[%s2336_s0 + $0x28] sm:$0xff] }
  0x17   :  { %v285_v33 = vld [vmem:[%s2335_s1 + $0x1f8] sm:$0xff]  ;;  %v1098_v34 = vpack.c.bf16 %v253_v31, %v252_v30  ;;  %v16_v37 = vld [vmem:[%s2336_s0 + $0x10] sm:$0xff]  ;;  %v23_v41 = vld [vmem:[%s2336_s0 + $0x48] sm:$0xff] }
  0x18   :  { %1069 = vmatpush1.bf16.msra.mxu1 %v1068_v35  ;;  %v1146_v35 = vpack.c.bf16 %v285_v33, %v284_v32  ;;  %v21_v39 = vld [vmem:[%s2336_s0 + $0x38] sm:$0xff]  ;;  %v20_v40 = vld [vmem:[%s2336_s0 + $0x30] sm:$0xff]  ;;  %v27_v45 = vld [vmem:[%s2336_s0 + $0x68] sm:$0xff] }
  0x19   :  { %1117 = vmatpush1.bf16.msra.mxu0 %v1116_v36  ;;  %1070 = vmatprep.subr.bf16.mxu1 %v1253_v0  ;;  %v14_v36 = vld [vmem:[%s2336_s0] sm:$0xff]  ;;  %v25_v42 = vld [vmem:[%s2336_s0 + $0x58] sm:$0xff]  ;;  %v28_v48 = vld [vmem:[%s2336_s0 + $0x70] sm:$0xff] }
  0x1a   :  { %1118 = vmatprep.subr.bf16.mxu0 %v1253_v0  ;;  %v29_v46 = vld [vmem:[%s2336_s0 + $0x78] sm:$0xff]  ;;  %v26_v47 = vld [vmem:[%s2336_s0 + $0x60] sm:$0xff]  ;;  %v32_v52 = vld [vmem:[%s2336_s0 + $0x90] sm:$0xff] }
  0x1b   :  { %v30_v51 = vld [vmem:[%s2336_s0 + $0x80] sm:$0xff]  ;;  %v35_v53 = vld [vmem:[%s2336_s0 + $0xa8] sm:$0xff]  ;;  %v37_v54 = vld [vmem:[%s2336_s0 + $0xb8] sm:$0xff] }
  0x1c   :  { %1072 = vmatpush1.bf16.msra.mxu1 %v1071_v43  ;;  %v22_v43 = vld [vmem:[%s2336_s0 + $0x40] sm:$0xff]  ;;  %v39_v57 = vld [vmem:[%s2336_s0 + $0xc8] sm:$0xff]  ;;  %v41_v58 = vld [vmem:[%s2336_s0 + $0xd8] sm:$0xff] }
  0x1d   :  { %1120 = vmatpush1.bf16.msra.mxu0 %v1119_v44  ;;  %1073 = vmatprep.subr.bf16.mxu1 %v1253_v0  ;;  %v24_v44 = vld [vmem:[%s2336_s0 + $0x50] sm:$0xff]  ;;  %v38_v59 = vld [vmem:[%s2336_s0 + $0xc0] sm:$0xff]  ;;  %v47_v2 = vld [vmem:[%s2336_s0 + $0x108] sm:$0xff] }
  0x1e   :  { %1121 = vmatprep.subr.bf16.mxu0 %v1253_v0  ;;  %v40_v60 = vld [vmem:[%s2336_s0 + $0xd0] sm:$0xff]  ;;  %v42_v63 = vld [vmem:[%s2336_s0 + $0xe0] sm:$0xff]  ;;  %v49_v3 = vld [vmem:[%s2336_s0 + $0x118] sm:$0xff] }
  0x1f   :  { %v44_v1 = vld [vmem:[%s2336_s0 + $0xf0] sm:$0xff]  ;;  %v51_v6 = vld [vmem:[%s2336_s0 + $0x128] sm:$0xff]  ;;  %v53_v7 = vld [vmem:[%s2336_s0 + $0x138] sm:$0xff] }
  0x20   :  { %1075 = vmatpush1.bf16.msra.mxu1 %v1074_v49  ;;  %v31_v49 = vld [vmem:[%s2336_s0 + $0x88] sm:$0xff]  ;;  %v50_v8 = vld [vmem:[%s2336_s0 + $0x120] sm:$0xff]  ;;  %v52_v9 = vld [vmem:[%s2336_s0 + $0x130] sm:$0xff] }
  0x21   :  { %1123 = vmatpush1.bf16.msra.mxu0 %v1122_v50  ;;  %1076 = vmatprep.subr.bf16.mxu1 %v1253_v0  ;;  %v33_v50 = vld [vmem:[%s2336_s0 + $0x98] sm:$0xff]  ;;  %v54_v12 = vld [vmem:[%s2336_s0 + $0x140] sm:$0xff]  ;;  %v56_v13 = vld [vmem:[%s2336_s0 + $0x150] sm:$0xff] }
  0x22   :  { %1124 = vmatprep.subr.bf16.mxu0 %v1253_v0  ;;  %v59_v14 = vld [vmem:[%s2336_s0 + $0x168] sm:$0xff]  ;;  %v61_v15 = vld [vmem:[%s2336_s0 + $0x178] sm:$0xff]  ;;  %v62_v20 = vld [vmem:[%s2336_s0 + $0x180] sm:$0xff] }
  0x23   :  { %v63_v18 = vld [vmem:[%s2336_s0 + $0x188] sm:$0xff]  ;;  %v65_v19 = vld [vmem:[%s2336_s0 + $0x198] sm:$0xff]  ;;  %v64_v21 = vld [vmem:[%s2336_s0 + $0x190] sm:$0xff] }
  0x24   :  { %1078 = vmatpush1.bf16.msra.mxu1 %v1077_v55  ;;  %v34_v55 = vld [vmem:[%s2336_s0 + $0xa0] sm:$0xff]  ;;  %v68_v25 = vld [vmem:[%s2336_s0 + $0x1b0] sm:$0xff]  ;;  %v71_v26 = vld [vmem:[%s2336_s0 + $0x1c8] sm:$0xff] }
  0x25   :  { %1126 = vmatpush1.bf16.msra.mxu0 %v1125_v56  ;;  %1079 = vmatprep.subr.bf16.mxu1 %v1253_v0  ;;  %v36_v56 = vld [vmem:[%s2336_s0 + $0xb0] sm:$0xff]  ;;  %v66_v24 = vld [vmem:[%s2336_s0 + $0x1a0] sm:$0xff]  ;;  %v73_v27 = vld [vmem:[%s2336_s0 + $0x1d8] sm:$0xff] }
  0x26   :  { %1127 = vmatprep.subr.bf16.mxu0 %v1253_v0  ;;  %v75_v30 = vld [vmem:[%s2336_s0 + $0x1e8] sm:$0xff]  ;;  %v77_v31 = vld [vmem:[%s2336_s0 + $0x1f8] sm:$0xff]  ;;  %v74_v32 = vld [vmem:[%s2336_s0 + $0x1e0] sm:$0xff] }
  0x27   :  { %v76_v33 = vld [vmem:[%s2336_s0 + $0x1f0] sm:$0xff] }
  0x28   :  { %1081 = vmatpush1.bf16.msra.mxu1 %v1080_v61  ;;  %v43_v61 = vld [vmem:[%s2336_s0 + $0xe8] sm:$0xff] }
  0x29   :  { %1129 = vmatpush1.bf16.msra.mxu0 %v1128_v62  ;;  %1082 = vmatprep.subr.bf16.mxu1 %v1253_v0  ;;  %v45_v62 = vld [vmem:[%s2336_s0 + $0xf8] sm:$0xff] }
  0x2a   :  { %1130 = vmatprep.subr.bf16.mxu0 %v1253_v0 }
  0x2c   :  { %1084 = vmatpush1.bf16.msra.mxu1 %v1083_v4  ;;  %v46_v4 = vld [vmem:[%s2336_s0 + $0x100] sm:$0xff] }
  0x2d   :  { %1132 = vmatpush1.bf16.msra.mxu0 %v1131_v5  ;;  %1085 = vmatprep.subr.bf16.mxu1 %v1253_v0  ;;  %v48_v5 = vld [vmem:[%s2336_s0 + $0x110] sm:$0xff] }
  0x2e   :  { %1133 = vmatprep.subr.bf16.mxu0 %v1253_v0 }
  0x30   :  { %1087 = vmatpush1.bf16.msra.mxu1 %v1086_v10  ;;  %v55_v10 = vld [vmem:[%s2336_s0 + $0x148] sm:$0xff] }
  0x31   :  { %1135 = vmatpush1.bf16.msra.mxu0 %v1134_v11  ;;  %1088 = vmatprep.subr.bf16.mxu1 %v1253_v0  ;;  %v57_v11 = vld [vmem:[%s2336_s0 + $0x158] sm:$0xff] }
  0x32   :  { %1136 = vmatprep.subr.bf16.mxu0 %v1253_v0 }
  0x34   :  { %1090 = vmatpush1.bf16.msra.mxu1 %v1089_v16  ;;  %v58_v16 = vld [vmem:[%s2336_s0 + $0x160] sm:$0xff] }
  0x35   :  { %1138 = vmatpush1.bf16.msra.mxu0 %v1137_v17  ;;  %1091 = vmatprep.subr.bf16.mxu1 %v1253_v0  ;;  %v60_v17 = vld [vmem:[%s2336_s0 + $0x170] sm:$0xff] }
  0x36   :  { %1139 = vmatprep.subr.bf16.mxu0 %v1253_v0 }
  0x38   :  { %1093 = vmatpush1.bf16.msra.mxu1 %v1092_v22  ;;  %v67_v22 = vld [vmem:[%s2336_s0 + $0x1a8] sm:$0xff] }
  0x39   :  { %1141 = vmatpush1.bf16.msra.mxu0 %v1140_v23  ;;  %1094 = vmatprep.subr.bf16.mxu1 %v1253_v0  ;;  %v69_v23 = vld [vmem:[%s2336_s0 + $0x1b8] sm:$0xff] }
  0x3a   :  { %1142 = vmatprep.subr.bf16.mxu0 %v1253_v0 }
  0x3c   :  { %1096 = vmatpush1.bf16.msra.mxu1 %v1095_v28  ;;  %v70_v28 = vld [vmem:[%s2336_s0 + $0x1c0] sm:$0xff] }
  0x3d   :  { %1144 = vmatpush1.bf16.msra.mxu0 %v1143_v29  ;;  %1097 = vmatprep.subr.bf16.mxu1 %v1253_v0  ;;  %v72_v29 = vld [vmem:[%s2336_s0 + $0x1d0] sm:$0xff] }
  0x3e   :  { %1145 = vmatprep.subr.bf16.mxu0 %v1253_v0  ;;  %v18_v0 = vld [vmem:[%s2336_s0 + $0x20] sm:$0xff] }
  0x40   :  { %1099 = vmatpush1.bf16.msra.mxu1 %v1098_v34  ;;  %v79_v34 = vld [vmem:[%s2336_s0 + $0x208] sm:$0xff] }
  0x41   :  { %1147 = vmatpush1.bf16.msra.mxu0 %v1146_v35  ;;  %v81_v35 = vld [vmem:[%s2336_s0 + $0x218] sm:$0xff] }
  0x43   :  { %358 = vmatmul.mubr.f32.vlgmr.msra.gmra.mrb[0].mxu1 %v14_v36  ;;  %v78_v36 = vld [vmem:[%s2336_s0 + $0x200] sm:$0xff] }
  0x44   :  { %683 = vmatmul.mubr.f32.vlgmr.msra.gmra.mrb[0].mxu0 %v16_v37  ;;  %362 = vmatprep.mubr.f32.mxu1 %v19_v38  ;;  %v80_v37 = vld [vmem:[%s2336_s0 + $0x210] sm:$0xff]  ;;  %v83_v38 = vld [vmem:[%s2336_s0 + $0x228] sm:$0xff] }
  0x45   :  { %687 = vmatprep.mubr.f32.mxu0 %v21_v39  ;;  %v85_v39 = vld [vmem:[%s2336_s0 + $0x238] sm:$0xff] }
  0x47   :  { %363 = vmatmul.mubr.f32.gmra.mrb[2].mxu1 %v18_v0  ;;  %v82_v0 = vld [vmem:[%s2336_s0 + $0x220] sm:$0xff] }
  0x48   :  { %688 = vmatmul.mubr.f32.gmra.mrb[2].mxu0 %v20_v40  ;;  %367 = vmatprep.mubr.f32.mxu1 %v23_v41  ;;  %v84_v40 = vld [vmem:[%s2336_s0 + $0x230] sm:$0xff]  ;;  %v87_v41 = vld [vmem:[%s2336_s0 + $0x248] sm:$0xff] }
  0x49   :  { %692 = vmatprep.mubr.f32.mxu0 %v25_v42  ;;  %v89_v42 = vld [vmem:[%s2336_s0 + $0x258] sm:$0xff] }
  0x4b   :  { %368 = vmatmul.mubr.f32.gmra.mrb[4].mxu1 %v22_v43  ;;  %v86_v43 = vld [vmem:[%s2336_s0 + $0x240] sm:$0xff] }
  0x4c   :  { %693 = vmatmul.mubr.f32.gmra.mrb[4].mxu0 %v24_v44  ;;  %372 = vmatprep.mubr.f32.mxu1 %v27_v45  ;;  %v88_v44 = vld [vmem:[%s2336_s0 + $0x250] sm:$0xff]  ;;  %v91_v45 = vld [vmem:[%s2336_s0 + $0x268] sm:$0xff] }
  0x4d   :  { %697 = vmatprep.mubr.f32.mxu0 %v29_v46  ;;  %v93_v46 = vld [vmem:[%s2336_s0 + $0x278] sm:$0xff] }
  0x4f   :  { %373 = vmatmul.mubr.f32.gmra.mrb[6].mxu1 %v26_v47  ;;  %v90_v47 = vld [vmem:[%s2336_s0 + $0x260] sm:$0xff] }
  0x50   :  { %698 = vmatmul.mubr.f32.gmra.mrb[6].mxu0 %v28_v48  ;;  %377 = vmatprep.mubr.f32.mxu1 %v31_v49  ;;  %v92_v48 = vld [vmem:[%s2336_s0 + $0x270] sm:$0xff]  ;;  %v95_v49 = vld [vmem:[%s2336_s0 + $0x288] sm:$0xff] }
  0x51   :  { %702 = vmatprep.mubr.f32.mxu0 %v33_v50  ;;  %v97_v50 = vld [vmem:[%s2336_s0 + $0x298] sm:$0xff] }
  0x53   :  { %378 = vmatmul.mubr.f32.gmra.mrb[8].mxu1 %v30_v51  ;;  %v94_v51 = vld [vmem:[%s2336_s0 + $0x280] sm:$0xff] }
  0x54   :  { %703 = vmatmul.mubr.f32.gmra.mrb[8].mxu0 %v32_v52  ;;  %382 = vmatprep.mubr.f32.mxu1 %v35_v53  ;;  %v96_v52 = vld [vmem:[%s2336_s0 + $0x290] sm:$0xff]  ;;  %v99_v53 = vld [vmem:[%s2336_s0 + $0x2a8] sm:$0xff] }
  0x55   :  { %707 = vmatprep.mubr.f32.mxu0 %v37_v54  ;;  %v101_v54 = vld [vmem:[%s2336_s0 + $0x2b8] sm:$0xff] }
  0x57   :  { %383 = vmatmul.mubr.f32.gmra.mrb[10].mxu1 %v34_v55  ;;  %v98_v55 = vld [vmem:[%s2336_s0 + $0x2a0] sm:$0xff] }
  0x58   :  { %708 = vmatmul.mubr.f32.gmra.mrb[10].mxu0 %v36_v56  ;;  %387 = vmatprep.mubr.f32.mxu1 %v39_v57  ;;  %v100_v56 = vld [vmem:[%s2336_s0 + $0x2b0] sm:$0xff]  ;;  %v103_v57 = vld [vmem:[%s2336_s0 + $0x2c8] sm:$0xff] }
  0x59   :  { %712 = vmatprep.mubr.f32.mxu0 %v41_v58  ;;  %v105_v58 = vld [vmem:[%s2336_s0 + $0x2d8] sm:$0xff] }
  0x5b   :  { %388 = vmatmul.mubr.f32.gmra.mrb[12].mxu1 %v38_v59  ;;  %v102_v59 = vld [vmem:[%s2336_s0 + $0x2c0] sm:$0xff] }
  0x5c   :  { %713 = vmatmul.mubr.f32.gmra.mrb[12].mxu0 %v40_v60  ;;  %392 = vmatprep.mubr.f32.mxu1 %v43_v61  ;;  %v104_v60 = vld [vmem:[%s2336_s0 + $0x2d0] sm:$0xff]  ;;  %v107_v61 = vld [vmem:[%s2336_s0 + $0x2e8] sm:$0xff] }
  0x5d   :  { %717 = vmatprep.mubr.f32.mxu0 %v45_v62  ;;  %v109_v62 = vld [vmem:[%s2336_s0 + $0x2f8] sm:$0xff] }
  0x5f   :  { %393 = vmatmul.mubr.f32.gmra.mrb[14].mxu1 %v42_v63  ;;  %v106_v63 = vld [vmem:[%s2336_s0 + $0x2e0] sm:$0xff] }
  0x60   :  { %718 = vmatmul.mubr.f32.gmra.mrb[14].mxu0 %v44_v1  ;;  %397 = vmatprep.mubr.f32.mxu1 %v47_v2  ;;  %v108_v1 = vld [vmem:[%s2336_s0 + $0x2f0] sm:$0xff]  ;;  %v111_v2 = vld [vmem:[%s2336_s0 + $0x308] sm:$0xff] }
  0x61   :  { %722 = vmatprep.mubr.f32.mxu0 %v49_v3  ;;  %v113_v3 = vld [vmem:[%s2336_s0 + $0x318] sm:$0xff] }
  0x63   :  { %398 = vmatmul.mubr.f32.gmra.mrb[16].mxu1 %v46_v4  ;;  %v110_v4 = vld [vmem:[%s2336_s0 + $0x300] sm:$0xff] }
  0x64   :  { %723 = vmatmul.mubr.f32.gmra.mrb[16].mxu0 %v48_v5  ;;  %402 = vmatprep.mubr.f32.mxu1 %v51_v6  ;;  %v112_v5 = vld [vmem:[%s2336_s0 + $0x310] sm:$0xff]  ;;  %v115_v6 = vld [vmem:[%s2336_s0 + $0x328] sm:$0xff] }
  0x65   :  { %727 = vmatprep.mubr.f32.mxu0 %v53_v7  ;;  %v117_v7 = vld [vmem:[%s2336_s0 + $0x338] sm:$0xff] }
  0x67   :  { %403 = vmatmul.mubr.f32.gmra.mrb[18].mxu1 %v50_v8  ;;  %v114_v8 = vld [vmem:[%s2336_s0 + $0x320] sm:$0xff] }
  0x68   :  { %728 = vmatmul.mubr.f32.gmra.mrb[18].mxu0 %v52_v9  ;;  %407 = vmatprep.mubr.f32.mxu1 %v55_v10  ;;  %v116_v9 = vld [vmem:[%s2336_s0 + $0x330] sm:$0xff]  ;;  %v119_v10 = vld [vmem:[%s2336_s0 + $0x348] sm:$0xff] }
  0x69   :  { %732 = vmatprep.mubr.f32.mxu0 %v57_v11  ;;  %v121_v11 = vld [vmem:[%s2336_s0 + $0x358] sm:$0xff] }
  0x6b   :  { %408 = vmatmul.mubr.f32.gmra.mrb[20].mxu1 %v54_v12  ;;  %v118_v12 = vld [vmem:[%s2336_s0 + $0x340] sm:$0xff] }
  0x6c   :  { %733 = vmatmul.mubr.f32.gmra.mrb[20].mxu0 %v56_v13  ;;  %412 = vmatprep.mubr.f32.mxu1 %v59_v14  ;;  %v120_v13 = vld [vmem:[%s2336_s0 + $0x350] sm:$0xff]  ;;  %v123_v14 = vld [vmem:[%s2336_s0 + $0x368] sm:$0xff] }
  0x6d   :  { %737 = vmatprep.mubr.f32.mxu0 %v61_v15  ;;  %v125_v15 = vld [vmem:[%s2336_s0 + $0x378] sm:$0xff] }
  0x6f   :  { %413 = vmatmul.mubr.f32.gmra.mrb[22].mxu1 %v58_v16  ;;  %v122_v16 = vld [vmem:[%s2336_s0 + $0x360] sm:$0xff] }
  0x70   :  { %738 = vmatmul.mubr.f32.gmra.mrb[22].mxu0 %v60_v17  ;;  %417 = vmatprep.mubr.f32.mxu1 %v63_v18  ;;  %v124_v17 = vld [vmem:[%s2336_s0 + $0x370] sm:$0xff]  ;;  %v127_v18 = vld [vmem:[%s2336_s0 + $0x388] sm:$0xff] }
  0x71   :  { %742 = vmatprep.mubr.f32.mxu0 %v65_v19  ;;  %v129_v19 = vld [vmem:[%s2336_s0 + $0x398] sm:$0xff] }
  0x73   :  { %418 = vmatmul.mubr.f32.gmra.mrb[24].mxu1 %v62_v20  ;;  %v126_v20 = vld [vmem:[%s2336_s0 + $0x380] sm:$0xff] }
  0x74   :  { %743 = vmatmul.mubr.f32.gmra.mrb[24].mxu0 %v64_v21  ;;  %422 = vmatprep.mubr.f32.mxu1 %v67_v22  ;;  %v128_v21 = vld [vmem:[%s2336_s0 + $0x390] sm:$0xff]  ;;  %v131_v22 = vld [vmem:[%s2336_s0 + $0x3a8] sm:$0xff] }
  0x75   :  { %747 = vmatprep.mubr.f32.mxu0 %v69_v23  ;;  %v133_v23 = vld [vmem:[%s2336_s0 + $0x3b8] sm:$0xff] }
  0x77   :  { %423 = vmatmul.mubr.f32.gmra.mrb[26].mxu1 %v66_v24  ;;  %v130_v24 = vld [vmem:[%s2336_s0 + $0x3a0] sm:$0xff] }
  0x78   :  { %748 = vmatmul.mubr.f32.gmra.mrb[26].mxu0 %v68_v25  ;;  %427 = vmatprep.mubr.f32.mxu1 %v71_v26  ;;  %v132_v25 = vld [vmem:[%s2336_s0 + $0x3b0] sm:$0xff]  ;;  %v135_v26 = vld [vmem:[%s2336_s0 + $0x3c8] sm:$0xff] }
  0x79   :  { %752 = vmatprep.mubr.f32.mxu0 %v73_v27  ;;  %v137_v27 = vld [vmem:[%s2336_s0 + $0x3d8] sm:$0xff] }
  0x7b   :  { %428 = vmatmul.mubr.f32.gmra.mrb[28].mxu1 %v70_v28  ;;  %v134_v28 = vld [vmem:[%s2336_s0 + $0x3c0] sm:$0xff] }
  0x7c   :  { %753 = vmatmul.mubr.f32.gmra.mrb[28].mxu0 %v72_v29  ;;  %432 = vmatprep.mubr.f32.mxu1 %v75_v30  ;;  %v136_v29 = vld [vmem:[%s2336_s0 + $0x3d0] sm:$0xff]  ;;  %v139_v30 = vld [vmem:[%s2336_s0 + $0x3e8] sm:$0xff] }
  0x7d   :  { %757 = vmatprep.mubr.f32.mxu0 %v77_v31  ;;  %v141_v31 = vld [vmem:[%s2336_s0 + $0x3f8] sm:$0xff] }
  0x7f   :  { %433 = vmatmul.mubr.f32.gmra.mrb[30].mxu1 %v74_v32  ;;  %v138_v32 = vld [vmem:[%s2336_s0 + $0x3e0] sm:$0xff] }
  0x80   :  { %758 = vmatmul.mubr.f32.gmra.mrb[30].mxu0 %v76_v33  ;;  %437 = vmatprep.mubr.f32.mxu1 %v79_v34  ;;  %v140_v33 = vld [vmem:[%s2336_s0 + $0x3f0] sm:$0xff]  ;;  %v143_v34 = vld [vmem:[%s2336_s0 + $0x408] sm:$0xff] }
  0x81   :  { %762 = vmatprep.mubr.f32.mxu0 %v81_v35  ;;  %v145_v35 = vld [vmem:[%s2336_s0 + $0x418] sm:$0xff] }
  0x83   :  { %438 = vmatmul.mubr.f32.gmra.mrb[32].mxu1 %v78_v36  ;;  %v142_v36 = vld [vmem:[%s2336_s0 + $0x400] sm:$0xff] }
  0x84   :  { %763 = vmatmul.mubr.f32.gmra.mrb[32].mxu0 %v80_v37  ;;  %442 = vmatprep.mubr.f32.mxu1 %v83_v38  ;;  %v144_v37 = vld [vmem:[%s2336_s0 + $0x410] sm:$0xff]  ;;  %v147_v38 = vld [vmem:[%s2336_s0 + $0x428] sm:$0xff] }
  0x85   :  { %767 = vmatprep.mubr.f32.mxu0 %v85_v39  ;;  %v149_v39 = vld [vmem:[%s2336_s0 + $0x438] sm:$0xff] }
  0x87   :  { %443 = vmatmul.mubr.f32.gmra.mrb[34].mxu1 %v82_v0  ;;  %v146_v0 = vld [vmem:[%s2336_s0 + $0x420] sm:$0xff] }
  0x88   :  { %768 = vmatmul.mubr.f32.gmra.mrb[34].mxu0 %v84_v40  ;;  %447 = vmatprep.mubr.f32.mxu1 %v87_v41  ;;  %v148_v40 = vld [vmem:[%s2336_s0 + $0x430] sm:$0xff]  ;;  %v151_v41 = vld [vmem:[%s2336_s0 + $0x448] sm:$0xff] }
  0x89   :  { %772 = vmatprep.mubr.f32.mxu0 %v89_v42  ;;  %v153_v42 = vld [vmem:[%s2336_s0 + $0x458] sm:$0xff] }
  0x8b   :  { %448 = vmatmul.mubr.f32.gmra.mrb[36].mxu1 %v86_v43  ;;  %v150_v43 = vld [vmem:[%s2336_s0 + $0x440] sm:$0xff] }
  0x8c   :  { %773 = vmatmul.mubr.f32.gmra.mrb[36].mxu0 %v88_v44  ;;  %452 = vmatprep.mubr.f32.mxu1 %v91_v45  ;;  %v152_v44 = vld [vmem:[%s2336_s0 + $0x450] sm:$0xff]  ;;  %v155_v45 = vld [vmem:[%s2336_s0 + $0x468] sm:$0xff] }
  0x8d   :  { %777 = vmatprep.mubr.f32.mxu0 %v93_v46  ;;  %v157_v46 = vld [vmem:[%s2336_s0 + $0x478] sm:$0xff] }
  0x8f   :  { %453 = vmatmul.mubr.f32.gmra.mrb[38].mxu1 %v90_v47  ;;  %v154_v47 = vld [vmem:[%s2336_s0 + $0x460] sm:$0xff] }
  0x90   :  { %778 = vmatmul.mubr.f32.gmra.mrb[38].mxu0 %v92_v48  ;;  %457 = vmatprep.mubr.f32.mxu1 %v95_v49  ;;  %v156_v48 = vld [vmem:[%s2336_s0 + $0x470] sm:$0xff]  ;;  %v159_v49 = vld [vmem:[%s2336_s0 + $0x488] sm:$0xff] }
  0x91   :  { %782 = vmatprep.mubr.f32.mxu0 %v97_v50  ;;  %v161_v50 = vld [vmem:[%s2336_s0 + $0x498] sm:$0xff] }
  0x93   :  { %458 = vmatmul.mubr.f32.gmra.mrb[40].mxu1 %v94_v51  ;;  %v158_v51 = vld [vmem:[%s2336_s0 + $0x480] sm:$0xff] }
  0x94   :  { %783 = vmatmul.mubr.f32.gmra.mrb[40].mxu0 %v96_v52  ;;  %462 = vmatprep.mubr.f32.mxu1 %v99_v53  ;;  %v160_v52 = vld [vmem:[%s2336_s0 + $0x490] sm:$0xff]  ;;  %v163_v53 = vld [vmem:[%s2336_s0 + $0x4a8] sm:$0xff] }
  0x95   :  { %787 = vmatprep.mubr.f32.mxu0 %v101_v54  ;;  %v165_v54 = vld [vmem:[%s2336_s0 + $0x4b8] sm:$0xff] }
  0x97   :  { %463 = vmatmul.mubr.f32.gmra.mrb[42].mxu1 %v98_v55  ;;  %v162_v55 = vld [vmem:[%s2336_s0 + $0x4a0] sm:$0xff] }
  0x98   :  { %788 = vmatmul.mubr.f32.gmra.mrb[42].mxu0 %v100_v56  ;;  %467 = vmatprep.mubr.f32.mxu1 %v103_v57  ;;  %v164_v56 = vld [vmem:[%s2336_s0 + $0x4b0] sm:$0xff]  ;;  %v167_v57 = vld [vmem:[%s2336_s0 + $0x4c8] sm:$0xff] }
  0x99   :  { %792 = vmatprep.mubr.f32.mxu0 %v105_v58  ;;  %v169_v58 = vld [vmem:[%s2336_s0 + $0x4d8] sm:$0xff] }
  0x9b   :  { %468 = vmatmul.mubr.f32.gmra.mrb[44].mxu1 %v102_v59  ;;  %v166_v59 = vld [vmem:[%s2336_s0 + $0x4c0] sm:$0xff] }
  0x9c   :  { %793 = vmatmul.mubr.f32.gmra.mrb[44].mxu0 %v104_v60  ;;  %472 = vmatprep.mubr.f32.mxu1 %v107_v61  ;;  %v168_v60 = vld [vmem:[%s2336_s0 + $0x4d0] sm:$0xff]  ;;  %v171_v61 = vld [vmem:[%s2336_s0 + $0x4e8] sm:$0xff] }
  0x9d   :  { %797 = vmatprep.mubr.f32.mxu0 %v109_v62  ;;  %v173_v62 = vld [vmem:[%s2336_s0 + $0x4f8] sm:$0xff] }
  0x9f   :  { %473 = vmatmul.mubr.f32.gmra.mrb[46].mxu1 %v106_v63  ;;  %v170_v63 = vld [vmem:[%s2336_s0 + $0x4e0] sm:$0xff] }
  0xa0   :  { %798 = vmatmul.mubr.f32.gmra.mrb[46].mxu0 %v108_v1  ;;  %477 = vmatprep.mubr.f32.mxu1 %v111_v2  ;;  %v172_v1 = vld [vmem:[%s2336_s0 + $0x4f0] sm:$0xff]  ;;  %v175_v2 = vld [vmem:[%s2336_s0 + $0x508] sm:$0xff] }
  0xa1   :  { %802 = vmatprep.mubr.f32.mxu0 %v113_v3  ;;  %v177_v3 = vld [vmem:[%s2336_s0 + $0x518] sm:$0xff] }
  0xa3   :  { %478 = vmatmul.mubr.f32.gmra.mrb[48].mxu1 %v110_v4  ;;  %v174_v4 = vld [vmem:[%s2336_s0 + $0x500] sm:$0xff] }
  0xa4   :  { %803 = vmatmul.mubr.f32.gmra.mrb[48].mxu0 %v112_v5  ;;  %482 = vmatprep.mubr.f32.mxu1 %v115_v6  ;;  %v176_v5 = vld [vmem:[%s2336_s0 + $0x510] sm:$0xff]  ;;  %v179_v6 = vld [vmem:[%s2336_s0 + $0x528] sm:$0xff] }
  0xa5   :  { %807 = vmatprep.mubr.f32.mxu0 %v117_v7  ;;  %v181_v7 = vld [vmem:[%s2336_s0 + $0x538] sm:$0xff] }
  0xa7   :  { %483 = vmatmul.mubr.f32.gmra.mrb[50].mxu1 %v114_v8  ;;  %v178_v8 = vld [vmem:[%s2336_s0 + $0x520] sm:$0xff] }
  0xa8   :  { %808 = vmatmul.mubr.f32.gmra.mrb[50].mxu0 %v116_v9  ;;  %487 = vmatprep.mubr.f32.mxu1 %v119_v10  ;;  %v180_v9 = vld [vmem:[%s2336_s0 + $0x530] sm:$0xff]  ;;  %v183_v10 = vld [vmem:[%s2336_s0 + $0x548] sm:$0xff] }
  0xa9   :  { %812 = vmatprep.mubr.f32.mxu0 %v121_v11  ;;  %v185_v11 = vld [vmem:[%s2336_s0 + $0x558] sm:$0xff] }
  0xab   :  { %488 = vmatmul.mubr.f32.gmra.mrb[52].mxu1 %v118_v12  ;;  %v182_v12 = vld [vmem:[%s2336_s0 + $0x540] sm:$0xff] }
  0xac   :  { %813 = vmatmul.mubr.f32.gmra.mrb[52].mxu0 %v120_v13  ;;  %492 = vmatprep.mubr.f32.mxu1 %v123_v14  ;;  %v184_v13 = vld [vmem:[%s2336_s0 + $0x550] sm:$0xff]  ;;  %v187_v14 = vld [vmem:[%s2336_s0 + $0x568] sm:$0xff] }
  0xad   :  { %817 = vmatprep.mubr.f32.mxu0 %v125_v15  ;;  %v189_v15 = vld [vmem:[%s2336_s0 + $0x578] sm:$0xff] }
  0xaf   :  { %493 = vmatmul.mubr.f32.gmra.mrb[54].mxu1 %v122_v16  ;;  %v186_v16 = vld [vmem:[%s2336_s0 + $0x560] sm:$0xff] }
  0xb0   :  { %818 = vmatmul.mubr.f32.gmra.mrb[54].mxu0 %v124_v17  ;;  %497 = vmatprep.mubr.f32.mxu1 %v127_v18  ;;  %v188_v17 = vld [vmem:[%s2336_s0 + $0x570] sm:$0xff]  ;;  %v191_v18 = vld [vmem:[%s2336_s0 + $0x588] sm:$0xff] }
  0xb1   :  { %822 = vmatprep.mubr.f32.mxu0 %v129_v19  ;;  %v193_v19 = vld [vmem:[%s2336_s0 + $0x598] sm:$0xff] }
  0xb3   :  { %498 = vmatmul.mubr.f32.gmra.mrb[56].mxu1 %v126_v20  ;;  %v190_v20 = vld [vmem:[%s2336_s0 + $0x580] sm:$0xff] }
  0xb4   :  { %823 = vmatmul.mubr.f32.gmra.mrb[56].mxu0 %v128_v21  ;;  %502 = vmatprep.mubr.f32.mxu1 %v131_v22  ;;  %v192_v21 = vld [vmem:[%s2336_s0 + $0x590] sm:$0xff]  ;;  %v195_v22 = vld [vmem:[%s2336_s0 + $0x5a8] sm:$0xff] }
  0xb5   :  { %827 = vmatprep.mubr.f32.mxu0 %v133_v23  ;;  %v197_v23 = vld [vmem:[%s2336_s0 + $0x5b8] sm:$0xff] }
  0xb7   :  { %503 = vmatmul.mubr.f32.gmra.mrb[58].mxu1 %v130_v24  ;;  %v194_v24 = vld [vmem:[%s2336_s0 + $0x5a0] sm:$0xff] }
  0xb8   :  { %828 = vmatmul.mubr.f32.gmra.mrb[58].mxu0 %v132_v25  ;;  %507 = vmatprep.mubr.f32.mxu1 %v135_v26  ;;  %v196_v25 = vld [vmem:[%s2336_s0 + $0x5b0] sm:$0xff]  ;;  %v199_v26 = vld [vmem:[%s2336_s0 + $0x5c8] sm:$0xff] }
  0xb9   :  { %832 = vmatprep.mubr.f32.mxu0 %v137_v27  ;;  %v201_v27 = vld [vmem:[%s2336_s0 + $0x5d8] sm:$0xff] }
  0xbb   :  { %508 = vmatmul.mubr.f32.gmra.mrb[60].mxu1 %v134_v28  ;;  %v198_v28 = vld [vmem:[%s2336_s0 + $0x5c0] sm:$0xff] }
  0xbc   :  { %833 = vmatmul.mubr.f32.gmra.mrb[60].mxu0 %v136_v29  ;;  %512 = vmatprep.mubr.f32.mxu1 %v139_v30  ;;  %v200_v29 = vld [vmem:[%s2336_s0 + $0x5d0] sm:$0xff]  ;;  %v203_v30 = vld [vmem:[%s2336_s0 + $0x5e8] sm:$0xff] }
  0xbd   :  { %837 = vmatprep.mubr.f32.mxu0 %v141_v31  ;;  %v205_v31 = vld [vmem:[%s2336_s0 + $0x5f8] sm:$0xff] }
  0xbf   :  { %513 = vmatmul.mubr.f32.gmra.mrb[62].mxu1 %v138_v32  ;;  %v202_v32 = vld [vmem:[%s2336_s0 + $0x5e0] sm:$0xff] }
  0xc0   :  { %838 = vmatmul.mubr.f32.gmra.mrb[62].mxu0 %v140_v33  ;;  %517 = vmatprep.mubr.f32.mxu1 %v143_v34  ;;  %v204_v33 = vld [vmem:[%s2336_s0 + $0x5f0] sm:$0xff]  ;;  %v207_v34 = vld [vmem:[%s2336_s0 + $0x608] sm:$0xff] }
  0xc1   :  { %842 = vmatprep.mubr.f32.mxu0 %v145_v35  ;;  %v209_v35 = vld [vmem:[%s2336_s0 + $0x618] sm:$0xff] }
  0xc3   :  { %518 = vmatmul.mubr.f32.gmra.mrb[64].mxu1 %v142_v36  ;;  %v206_v36 = vld [vmem:[%s2336_s0 + $0x600] sm:$0xff] }
  0xc4   :  { %843 = vmatmul.mubr.f32.gmra.mrb[64].mxu0 %v144_v37  ;;  %522 = vmatprep.mubr.f32.mxu1 %v147_v38  ;;  %v208_v37 = vld [vmem:[%s2336_s0 + $0x610] sm:$0xff]  ;;  %v211_v38 = vld [vmem:[%s2336_s0 + $0x628] sm:$0xff] }
  0xc5   :  { %847 = vmatprep.mubr.f32.mxu0 %v149_v39  ;;  %v213_v39 = vld [vmem:[%s2336_s0 + $0x638] sm:$0xff] }
  0xc7   :  { %523 = vmatmul.mubr.f32.gmra.mrb[66].mxu1 %v146_v0  ;;  %v210_v0 = vld [vmem:[%s2336_s0 + $0x620] sm:$0xff] }
  0xc8   :  { %848 = vmatmul.mubr.f32.gmra.mrb[66].mxu0 %v148_v40  ;;  %527 = vmatprep.mubr.f32.mxu1 %v151_v41  ;;  %v212_v40 = vld [vmem:[%s2336_s0 + $0x630] sm:$0xff]  ;;  %v215_v41 = vld [vmem:[%s2336_s0 + $0x648] sm:$0xff] }
  0xc9   :  { %852 = vmatprep.mubr.f32.mxu0 %v153_v42  ;;  %v217_v42 = vld [vmem:[%s2336_s0 + $0x658] sm:$0xff] }
  0xcb   :  { %528 = vmatmul.mubr.f32.gmra.mrb[68].mxu1 %v150_v43  ;;  %v214_v43 = vld [vmem:[%s2336_s0 + $0x640] sm:$0xff] }
  0xcc   :  { %853 = vmatmul.mubr.f32.gmra.mrb[68].mxu0 %v152_v44  ;;  %532 = vmatprep.mubr.f32.mxu1 %v155_v45  ;;  %v216_v44 = vld [vmem:[%s2336_s0 + $0x650] sm:$0xff]  ;;  %v219_v45 = vld [vmem:[%s2336_s0 + $0x668] sm:$0xff] }
  0xcd   :  { %857 = vmatprep.mubr.f32.mxu0 %v157_v46  ;;  %v221_v46 = vld [vmem:[%s2336_s0 + $0x678] sm:$0xff] }
  0xcf   :  { %533 = vmatmul.mubr.f32.gmra.mrb[70].mxu1 %v154_v47  ;;  %v218_v47 = vld [vmem:[%s2336_s0 + $0x660] sm:$0xff] }
  0xd0   :  { %858 = vmatmul.mubr.f32.gmra.mrb[70].mxu0 %v156_v48  ;;  %537 = vmatprep.mubr.f32.mxu1 %v159_v49  ;;  %v220_v48 = vld [vmem:[%s2336_s0 + $0x670] sm:$0xff]  ;;  %v2125_v49 = vld [vmem:[%s2337_s2] ss:$0 sm:$0xff] }
  0xd1   :  { %862 = vmatprep.mubr.f32.mxu0 %v161_v50 }
  0xd3   :  { %538 = vmatmul.mubr.f32.gmra.mrb[72].mxu1 %v158_v51 }
  0xd4   :  { %863 = vmatmul.mubr.f32.gmra.mrb[72].mxu0 %v160_v52  ;;  %542 = vmatprep.mubr.f32.mxu1 %v163_v53 }
  0xd5   :  { %867 = vmatprep.mubr.f32.mxu0 %v165_v54 }
  0xd7   :  { %543 = vmatmul.mubr.f32.gmra.mrb[74].mxu1 %v162_v55 }
  0xd8   :  { %868 = vmatmul.mubr.f32.gmra.mrb[74].mxu0 %v164_v56  ;;  %547 = vmatprep.mubr.f32.mxu1 %v167_v57 }
  0xd9   :  { %872 = vmatprep.mubr.f32.mxu0 %v169_v58 }
  0xdb   :  { %548 = vmatmul.mubr.f32.gmra.mrb[76].mxu1 %v166_v59 }
  0xdc   :  { %873 = vmatmul.mubr.f32.gmra.mrb[76].mxu0 %v168_v60  ;;  %552 = vmatprep.mubr.f32.mxu1 %v171_v61 }
  0xdd   :  { %877 = vmatprep.mubr.f32.mxu0 %v173_v62 }
  0xdf   :  { %553 = vmatmul.mubr.f32.gmra.mrb[78].mxu1 %v170_v63 }
  0xe0   :  { %878 = vmatmul.mubr.f32.gmra.mrb[78].mxu0 %v172_v1  ;;  %557 = vmatprep.mubr.f32.mxu1 %v175_v2 }
  0xe1   :  { %882 = vmatprep.mubr.f32.mxu0 %v177_v3 }
  0xe3   :  { %558 = vmatmul.mubr.f32.gmra.mrb[80].mxu1 %v174_v4 }
  0xe4   :  { %883 = vmatmul.mubr.f32.gmra.mrb[80].mxu0 %v176_v5  ;;  %562 = vmatprep.mubr.f32.mxu1 %v179_v6 }
  0xe5   :  { %887 = vmatprep.mubr.f32.mxu0 %v181_v7 }
  0xe7   :  { %563 = vmatmul.mubr.f32.gmra.mrb[82].mxu1 %v178_v8 }
  0xe8   :  { %888 = vmatmul.mubr.f32.gmra.mrb[82].mxu0 %v180_v9  ;;  %567 = vmatprep.mubr.f32.mxu1 %v183_v10 }
  0xe9   :  { %892 = vmatprep.mubr.f32.mxu0 %v185_v11 }
  0xeb   :  { %568 = vmatmul.mubr.f32.gmra.mrb[84].mxu1 %v182_v12 }
  0xec   :  { %893 = vmatmul.mubr.f32.gmra.mrb[84].mxu0 %v184_v13  ;;  %572 = vmatprep.mubr.f32.mxu1 %v187_v14 }
  0xed   :  { %897 = vmatprep.mubr.f32.mxu0 %v189_v15 }
  0xef   :  { %573 = vmatmul.mubr.f32.gmra.mrb[86].mxu1 %v186_v16 }
  0xf0   :  { %898 = vmatmul.mubr.f32.gmra.mrb[86].mxu0 %v188_v17  ;;  %577 = vmatprep.mubr.f32.mxu1 %v191_v18 }
  0xf1   :  { %902 = vmatprep.mubr.f32.mxu0 %v193_v19 }
  0xf3   :  { %578 = vmatmul.mubr.f32.gmra.mrb[88].mxu1 %v190_v20 }
  0xf4   :  { %903 = vmatmul.mubr.f32.gmra.mrb[88].mxu0 %v192_v21  ;;  %582 = vmatprep.mubr.f32.mxu1 %v195_v22 }
  0xf5   :  { %907 = vmatprep.mubr.f32.mxu0 %v197_v23 }
  0xf7   :  { %583 = vmatmul.mubr.f32.gmra.mrb[90].mxu1 %v194_v24 }
  0xf8   :  { %908 = vmatmul.mubr.f32.gmra.mrb[90].mxu0 %v196_v25  ;;  %587 = vmatprep.mubr.f32.mxu1 %v199_v26 }
  0xf9   :  { %912 = vmatprep.mubr.f32.mxu0 %v201_v27 }
  0xfb   :  { %588 = vmatmul.mubr.f32.gmra.mrb[92].mxu1 %v198_v28 }
  0xfc   :  { %913 = vmatmul.mubr.f32.gmra.mrb[92].mxu0 %v200_v29  ;;  %592 = vmatprep.mubr.f32.mxu1 %v203_v30 }
  0xfd   :  { %917 = vmatprep.mubr.f32.mxu0 %v205_v31 }
  0xff   :  { %593 = vmatmul.mubr.f32.gmra.mrb[94].mxu1 %v202_v32 }
 0x100   :  { %918 = vmatmul.mubr.f32.gmra.mrb[94].mxu0 %v204_v33  ;;  %597 = vmatprep.mubr.f32.mxu1 %v207_v34 }
 0x101   :  { %922 = vmatprep.mubr.f32.mxu0 %v209_v35 }
 0x103   :  { %598 = vmatmul.mubr.f32.gmra.mrb[96].mxu1 %v206_v36 }
 0x104   :  { %923 = vmatmul.mubr.f32.gmra.mrb[96].mxu0 %v208_v37  ;;  %602 = vmatprep.mubr.f32.mxu1 %v211_v38 }
 0x105   :  { %927 = vmatprep.mubr.f32.mxu0 %v213_v39 }
 0x107   :  { %603 = vmatmul.mubr.f32.gmra.mrb[98].mxu1 %v210_v0 }
 0x108   :  { %928 = vmatmul.mubr.f32.gmra.mrb[98].mxu0 %v212_v40  ;;  %607 = vmatprep.mubr.f32.mxu1 %v215_v41 }
 0x109   :  { %932 = vmatprep.mubr.f32.mxu0 %v217_v42 }
 0x10b   :  { %608 = vmatmul.mubr.f32.gmra.mrb[100].mxu1 %v214_v43 }
 0x10c   :  { %933 = vmatmul.mubr.f32.gmra.mrb[100].mxu0 %v216_v44  ;;  %612 = vmatprep.mubr.f32.mxu1 %v219_v45 }
 0x10d   :  { %937 = vmatprep.mubr.f32.mxu0 %v221_v46 }
 0x10f   :  { %613 = vmatmul.mubr.f32.gmra.mrb[102].mxu1 %v218_v47 }
 0x110   :  { %938 = vmatmul.mubr.f32.gmra.mrb[102].mxu0 %v220_v48 }
 0x116   :  { %v359_v50 = vpop.f32.mrb[0].mxu1 }
 0x117   :  { %v360_v51 = vadd.f32 %v2125_v49, %v359_v50  ;;  %v361_v52 = vpop.f32.mrb[1].mxu1  ;;  %v684_v53 = vpop.f32.mrb[0].mxu0 }
 0x118   :  { %v686_v54 = vpop.f32.mrb[1].mxu0 }
 0x119   :  { %v2128_v55 = vadd.f32 %v684_v53, %v360_v51 }
 0x11a   :  { %v364_v56 = vpop.f32.mrb[2].mxu1 }
 0x11b   :  { %v365_v57 = vadd.f32 %v2125_v49, %v364_v56  ;;  %v366_v58 = vpop.f32.mrb[3].mxu1  ;;  %v689_v59 = vpop.f32.mrb[2].mxu0 }
 0x11c   :  { %v691_v60 = vpop.f32.mrb[3].mxu0 }
 0x11d   :  { %v2131_v61 = vadd.f32 %v689_v59, %v365_v57 }
 0x11e   :  { %v369_v62 = vpop.f32.mrb[4].mxu1 }
 0x11f   :  { %v370_v63 = vadd.f32 %v2125_v49, %v369_v62  ;;  %v371_v1 = vpop.f32.mrb[5].mxu1  ;;  %v694_v2 = vpop.f32.mrb[4].mxu0 }
 0x120   :  { %v696_v3 = vpop.f32.mrb[5].mxu0 }
 0x121   :  { %v2134_v4 = vadd.f32 %v694_v2, %v370_v63 }
 0x122   :  { %v374_v5 = vpop.f32.mrb[6].mxu1 }
 0x123   :  { %v375_v6 = vadd.f32 %v2125_v49, %v374_v5  ;;  %v376_v7 = vpop.f32.mrb[7].mxu1  ;;  %v699_v8 = vpop.f32.mrb[6].mxu0 }
 0x124   :  { %v701_v9 = vpop.f32.mrb[7].mxu0 }
 0x125   :  { %v2137_v10 = vadd.f32 %v699_v8, %v375_v6 }
 0x126   :  { %v379_v11 = vpop.f32.mrb[8].mxu1 }
 0x127   :  { %v380_v12 = vadd.f32 %v2125_v49, %v379_v11  ;;  %v381_v13 = vpop.f32.mrb[9].mxu1  ;;  %v704_v14 = vpop.f32.mrb[8].mxu0 }
 0x128   :  { %v706_v15 = vpop.f32.mrb[9].mxu0  ;;  %v943_v13 = vmax.f32 %v2128_v55, 0.0 }
 0x129   :  { %v2140_v16 = vadd.f32 %v704_v14, %v380_v12 }
 0x12a   :  { %v384_v17 = vpop.f32.mrb[10].mxu1 }
 0x12b   :  { %v385_v18 = vadd.f32 %v2125_v49, %v384_v17  ;;  %v386_v19 = vpop.f32.mrb[11].mxu1  ;;  %v709_v20 = vpop.f32.mrb[10].mxu0 }
 0x12c   :  { %v711_v21 = vpop.f32.mrb[11].mxu0 }
 0x12d   :  { %v2143_v22 = vadd.f32 %v709_v20, %v385_v18 }
 0x12e   :  { %v389_v23 = vpop.f32.mrb[12].mxu1 }
 0x12f   :  { %v390_v24 = vadd.f32 %v2125_v49, %v389_v23  ;;  %v391_v25 = vpop.f32.mrb[13].mxu1  ;;  %v714_v26 = vpop.f32.mrb[12].mxu0 }
 0x130   :  { %v716_v27 = vpop.f32.mrb[13].mxu0 }
 0x131   :  { %v2146_v28 = vadd.f32 %v714_v26, %v390_v24  ;;  %v944_v24 = vmax.f32 %v2131_v61, 0.0 }
 0x132   :  { %v394_v29 = vpop.f32.mrb[14].mxu1 }
 0x133   :  { %v395_v30 = vadd.f32 %v2125_v49, %v394_v29  ;;  %v396_v31 = vpop.f32.mrb[15].mxu1  ;;  %v719_v32 = vpop.f32.mrb[14].mxu0 }
 0x134   :  { %v721_v33 = vpop.f32.mrb[15].mxu0 }
 0x135   :  { %v2149_v34 = vadd.f32 %v719_v32, %v395_v30  ;;  %v945_v33 = vmax.f32 %v2134_v4, 0.0 }
 0x136   :  { %v399_v35 = vpop.f32.mrb[16].mxu1 }
 0x137   :  { %v400_v36 = vadd.f32 %v2125_v49, %v399_v35  ;;  %v401_v37 = vpop.f32.mrb[17].mxu1  ;;  %v724_v38 = vpop.f32.mrb[16].mxu0 }
 0x138   :  { %v726_v39 = vpop.f32.mrb[17].mxu0 }
 0x139   :  { %v2152_v0 = vadd.f32 %v724_v38, %v400_v36 }
 0x13a   :  { %v404_v40 = vpop.f32.mrb[18].mxu1 }
 0x13b   :  { %v405_v41 = vadd.f32 %v2125_v49, %v404_v40  ;;  %v406_v42 = vpop.f32.mrb[19].mxu1  ;;  %v729_v43 = vpop.f32.mrb[18].mxu0 }
 0x13c   :  { %v731_v44 = vpop.f32.mrb[19].mxu0  ;;  %v946_v42 = vmax.f32 %v2137_v10, 0.0 }
 0x13d   :  { %v2155_v45 = vadd.f32 %v729_v43, %v405_v41 }
 0x13e   :  { %v409_v46 = vpop.f32.mrb[20].mxu1 }
 0x13f   :  { %v410_v47 = vadd.f32 %v2125_v49, %v409_v46  ;;  %v411_v48 = vpop.f32.mrb[21].mxu1  ;;  %v734_v50 = vpop.f32.mrb[20].mxu0 }
 0x140   :  { %v736_v51 = vpop.f32.mrb[21].mxu0 }
 0x141   :  { %v2158_v52 = vadd.f32 %v734_v50, %v410_v47 }
 0x142   :  { %v414_v53 = vpop.f32.mrb[22].mxu1 }
 0x143   :  { %v415_v54 = vadd.f32 %v2125_v49, %v414_v53  ;;  %v416_v56 = vpop.f32.mrb[23].mxu1  ;;  %v739_v57 = vpop.f32.mrb[22].mxu0  ;;  %v947_v53 = vmax.f32 %v2140_v16, 0.0 }
 0x144   :  { %v741_v58 = vpop.f32.mrb[23].mxu0 }
 0x145   :  { %v2161_v59 = vadd.f32 %v739_v57, %v415_v54 }
 0x146   :  { %v419_v60 = vpop.f32.mrb[24].mxu1 }
 0x147   :  { %v420_v62 = vadd.f32 %v2125_v49, %v419_v60  ;;  %v421_v63 = vpop.f32.mrb[25].mxu1  ;;  %v744_v1 = vpop.f32.mrb[24].mxu0 }
 0x148   :  { %v746_v2 = vpop.f32.mrb[25].mxu0 }
 0x149   :  { %v2164_v3 = vadd.f32 %v744_v1, %v420_v62  ;;  %v948_v1 = vmax.f32 %v2143_v22, 0.0 }
 0x14a   :  { %v424_v5 = vpop.f32.mrb[26].mxu1 }
 0x14b   :  { %v425_v6 = vadd.f32 %v2125_v49, %v424_v5  ;;  %v426_v7 = vpop.f32.mrb[27].mxu1  ;;  %v749_v8 = vpop.f32.mrb[26].mxu0 }
 0x14c   :  { %v751_v9 = vpop.f32.mrb[27].mxu0 }
 0x14d   :  { %v750_v11 = vadd.f32 %v749_v8, %v425_v6 }
 0x14e   :  { %v429_v12 = vpop.f32.mrb[28].mxu1 }
 0x14f   :  { %v956_v14 = vmax.f32 %v750_v11, 0.0  ;;  %v430_v15 = vadd.f32 %v2125_v49, %v429_v12  ;;  %v431_v17 = vpop.f32.mrb[29].mxu1  ;;  %v754_v18 = vpop.f32.mrb[28].mxu0  ;;  %v949_v12 = vmax.f32 %v2146_v28, 0.0 }
 0x150   :  { %v756_v19 = vpop.f32.mrb[29].mxu0 }
 0x151   :  { %v2169_v20 = vmax.f32 %v943_v13, %v956_v14  ;;  %v755_v21 = vadd.f32 %v754_v18, %v430_v15 }
 0x152   :  { %v434_v23 = vpop.f32.mrb[30].mxu1 }
 0x153   :  { %v957_v25 = vmax.f32 %v755_v21, 0.0  ;;  %v435_v26 = vadd.f32 %v2125_v49, %v434_v23  ;;  %v436_v27 = vpop.f32.mrb[31].mxu1  ;;  %v759_v29 = vpop.f32.mrb[30].mxu0  ;;  %v950_v23 = vmax.f32 %v2149_v34, 0.0 }
 0x154   :  { %v761_v30 = vpop.f32.mrb[31].mxu0 }
 0x155   :  { %v2173_v31 = vmax.f32 %v944_v24, %v957_v25  ;;  %v760_v55 = vadd.f32 %v759_v29, %v435_v26 }
 0x156   :  { %v439_v32 = vpop.f32.mrb[32].mxu1 }
 0x157   :  { %v958_v35 = vmax.f32 %v760_v55, 0.0  ;;  %v440_v36 = vadd.f32 %v2125_v49, %v439_v32  ;;  %v441_v37 = vpop.f32.mrb[33].mxu1  ;;  %v764_v38 = vpop.f32.mrb[32].mxu0  ;;  %v951_v32 = vmax.f32 %v2152_v0, 0.0 }
 0x158   :  { %v766_v39 = vpop.f32.mrb[33].mxu0 }
 0x159   :  { %v2177_v40 = vmax.f32 %v945_v33, %v958_v35  ;;  %v765_v61 = vadd.f32 %v764_v38, %v440_v36 }
 0x15a   :  { %v444_v41 = vpop.f32.mrb[34].mxu1 }
 0x15b   :  { %v959_v43 = vmax.f32 %v765_v61, 0.0  ;;  %v445_v44 = vadd.f32 %v2125_v49, %v444_v41  ;;  %v446_v46 = vpop.f32.mrb[35].mxu1  ;;  %v769_v47 = vpop.f32.mrb[34].mxu0  ;;  %v952_v41 = vmax.f32 %v2155_v45, 0.0 }
 0x15c   :  { %v771_v48 = vpop.f32.mrb[35].mxu0 }
 0x15d   :  { %v2181_v50 = vmax.f32 %v946_v42, %v959_v43  ;;  %v770_v4 = vadd.f32 %v769_v47, %v445_v44 }
 0x15e   :  { %v449_v51 = vpop.f32.mrb[36].mxu1 }
 0x15f   :  { %v960_v54 = vmax.f32 %v770_v4, 0.0  ;;  %v450_v56 = vadd.f32 %v2125_v49, %v449_v51  ;;  %v451_v57 = vpop.f32.mrb[37].mxu1  ;;  %v774_v58 = vpop.f32.mrb[36].mxu0  ;;  %v953_v51 = vmax.f32 %v2158_v52, 0.0 }
 0x160   :  { %v776_v60 = vpop.f32.mrb[37].mxu0 }
 0x161   :  { %v2185_v62 = vmax.f32 %v947_v53, %v960_v54  ;;  %v775_v10 = vadd.f32 %v774_v58, %v450_v56 }
 0x162   :  { %v454_v63 = vpop.f32.mrb[38].mxu1 }
 0x163   :  { %v961_v2 = vmax.f32 %v775_v10, 0.0  ;;  %v455_v5 = vadd.f32 %v2125_v49, %v454_v63  ;;  %v456_v6 = vpop.f32.mrb[39].mxu1  ;;  %v779_v7 = vpop.f32.mrb[38].mxu0  ;;  %v954_v63 = vmax.f32 %v2161_v59, 0.0 }
 0x164   :  { %v781_v8 = vpop.f32.mrb[39].mxu0 }
 0x165   :  { %v2189_v9 = vmax.f32 %v948_v1, %v961_v2  ;;  %v780_v16 = vadd.f32 %v779_v7, %v455_v5 }
 0x166   :  { %v459_v11 = vpop.f32.mrb[40].mxu1 }
 0x167   :  { %v962_v13 = vmax.f32 %v780_v16, 0.0  ;;  %v460_v14 = vadd.f32 %v2125_v49, %v459_v11  ;;  %v461_v15 = vpop.f32.mrb[41].mxu1  ;;  %v784_v17 = vpop.f32.mrb[40].mxu0  ;;  %v955_v11 = vmax.f32 %v2164_v3, 0.0 }
 0x168   :  { %v786_v18 = vpop.f32.mrb[41].mxu0 }
 0x169   :  { %v2193_v19 = vmax.f32 %v949_v12, %v962_v13  ;;  %v785_v22 = vadd.f32 %v784_v17, %v460_v14 }
 0x16a   :  { %v464_v21 = vpop.f32.mrb[42].mxu1 }
 0x16b   :  { %v963_v24 = vmax.f32 %v785_v22, 0.0  ;;  %v465_v25 = vadd.f32 %v2125_v49, %v464_v21  ;;  %v466_v26 = vpop.f32.mrb[43].mxu1  ;;  %v789_v27 = vpop.f32.mrb[42].mxu0 }
 0x16c   :  { %v791_v29 = vpop.f32.mrb[43].mxu0 }
 0x16d   :  { %v2197_v30 = vmax.f32 %v950_v23, %v963_v24  ;;  %v790_v28 = vadd.f32 %v789_v27, %v465_v25 }
 0x16e   :  { %v469_v55 = vpop.f32.mrb[44].mxu1 }
 0x16f   :  { %v964_v33 = vmax.f32 %v790_v28, 0.0  ;;  %v470_v35 = vadd.f32 %v2125_v49, %v469_v55  ;;  %v471_v36 = vpop.f32.mrb[45].mxu1  ;;  %v794_v37 = vpop.f32.mrb[44].mxu0 }
 0x170   :  { %v796_v38 = vpop.f32.mrb[45].mxu0 }
 0x171   :  { %v2201_v39 = vmax.f32 %v951_v32, %v964_v33  ;;  %v795_v34 = vadd.f32 %v794_v37, %v470_v35 }
 0x172   :  { %v474_v61 = vpop.f32.mrb[46].mxu1 }
 0x173   :  { %v965_v42 = vmax.f32 %v795_v34, 0.0  ;;  %v475_v43 = vadd.f32 %v2125_v49, %v474_v61  ;;  %v476_v44 = vpop.f32.mrb[47].mxu1  ;;  %v799_v46 = vpop.f32.mrb[46].mxu0 }
 0x174   :  { %v801_v47 = vpop.f32.mrb[47].mxu0 }
 0x175   :  { %v2205_v48 = vmax.f32 %v952_v41, %v965_v42  ;;  %v800_v0 = vadd.f32 %v799_v46, %v475_v43 }
 0x176   :  { %v479_v4 = vpop.f32.mrb[48].mxu1 }
 0x177   :  { %v966_v53 = vmax.f32 %v800_v0, 0.0  ;;  %v480_v54 = vadd.f32 %v2125_v49, %v479_v4  ;;  %v481_v56 = vpop.f32.mrb[49].mxu1  ;;  %v804_v57 = vpop.f32.mrb[48].mxu0 }
 0x178   :  { %v806_v58 = vpop.f32.mrb[49].mxu0 }
 0x179   :  { %v2209_v60 = vmax.f32 %v953_v51, %v966_v53  ;;  %v805_v45 = vadd.f32 %v804_v57, %v480_v54 }
 0x17a   :  { %v484_v10 = vpop.f32.mrb[50].mxu1 }
 0x17b   :  { %v967_v1 = vmax.f32 %v805_v45, 0.0  ;;  %v485_v2 = vadd.f32 %v2125_v49, %v484_v10  ;;  %v486_v5 = vpop.f32.mrb[51].mxu1  ;;  %v809_v6 = vpop.f32.mrb[50].mxu0 }
 0x17c   :  { %v811_v7 = vpop.f32.mrb[51].mxu0 }
 0x17d   :  { %v2213_v8 = vmax.f32 %v954_v63, %v967_v1  ;;  %v810_v52 = vadd.f32 %v809_v6, %v485_v2 }
 0x17e   :  { %v489_v16 = vpop.f32.mrb[52].mxu1 }
 0x17f   :  { %v968_v12 = vmax.f32 %v810_v52, 0.0  ;;  %v490_v13 = vadd.f32 %v2125_v49, %v489_v16  ;;  %v491_v14 = vpop.f32.mrb[53].mxu1  ;;  %v814_v15 = vpop.f32.mrb[52].mxu0 }
 0x180   :  { %v816_v17 = vpop.f32.mrb[53].mxu0 }
 0x181   :  { %v2217_v18 = vmax.f32 %v955_v11, %v968_v12  ;;  %v2219_v59 = vadd.f32 %v814_v15, %v490_v13 }
 0x182   :  { %v494_v22 = vpop.f32.mrb[54].mxu1 }
 0x183   :  { %v495_v21 = vadd.f32 %v2125_v49, %v494_v22  ;;  %v496_v23 = vpop.f32.mrb[55].mxu1  ;;  %v819_v24 = vpop.f32.mrb[54].mxu0 }
 0x184   :  { %v821_v25 = vpop.f32.mrb[55].mxu0 }
 0x185   :  { %v2222_v26 = vadd.f32 %v819_v24, %v495_v21 }
 0x186   :  { %v499_v27 = vpop.f32.mrb[56].mxu1 }
 0x187   :  { %v500_v3 = vadd.f32 %v2125_v49, %v499_v27  ;;  %v501_v29 = vpop.f32.mrb[57].mxu1  ;;  %v824_v28 = vpop.f32.mrb[56].mxu0 }
 0x188   :  { %v826_v55 = vpop.f32.mrb[57].mxu0 }
 0x189   :  { %v2225_v32 = vadd.f32 %v824_v28, %v500_v3 }
 0x18a   :  { %v504_v33 = vpop.f32.mrb[58].mxu1 }
 0x18b   :  { %v505_v35 = vadd.f32 %v2125_v49, %v504_v33  ;;  %v506_v36 = vpop.f32.mrb[59].mxu1  ;;  %v829_v37 = vpop.f32.mrb[58].mxu0 }
 0x18c   :  { %v831_v38 = vpop.f32.mrb[59].mxu0 }
 0x18d   :  { %v2228_v34 = vadd.f32 %v829_v37, %v505_v35 }
 0x18e   :  { %v509_v61 = vpop.f32.mrb[60].mxu1 }
 0x18f   :  { %v510_v41 = vadd.f32 %v2125_v49, %v509_v61  ;;  %v511_v42 = vpop.f32.mrb[61].mxu1  ;;  %v834_v43 = vpop.f32.mrb[60].mxu0 }
 0x190   :  { %v836_v44 = vpop.f32.mrb[61].mxu0 }
 0x191   :  { %v2231_v46 = vadd.f32 %v834_v43, %v510_v41 }
 0x192   :  { %v514_v47 = vpop.f32.mrb[62].mxu1 }
 0x193   :  { %v515_v0 = vadd.f32 %v2125_v49, %v514_v47  ;;  %v516_v4 = vpop.f32.mrb[63].mxu1  ;;  %v839_v51 = vpop.f32.mrb[62].mxu0 }
 0x194   :  { %v841_v53 = vpop.f32.mrb[63].mxu0 }
 0x195   :  { %v2234_v54 = vadd.f32 %v839_v51, %v515_v0 }
 0x196   :  { %v519_v56 = vpop.f32.mrb[64].mxu1 }
 0x197   :  { %v520_v57 = vadd.f32 %v2125_v49, %v519_v56  ;;  %v521_v58 = vpop.f32.mrb[65].mxu1  ;;  %v844_v45 = vpop.f32.mrb[64].mxu0 }
 0x198   :  { %v846_v10 = vpop.f32.mrb[65].mxu0 }
 0x199   :  { %v2237_v63 = vadd.f32 %v844_v45, %v520_v57 }
 0x19a   :  { %v524_v1 = vpop.f32.mrb[66].mxu1 }
 0x19b   :  { %v525_v2 = vadd.f32 %v2125_v49, %v524_v1  ;;  %v526_v5 = vpop.f32.mrb[67].mxu1  ;;  %v849_v6 = vpop.f32.mrb[66].mxu0  ;;  %v969_v1 = vmax.f32 %v2219_v59, 0.0 }
 0x19c   :  { %v851_v7 = vpop.f32.mrb[67].mxu0 }
 0x19d   :  { %v2240_v52 = vadd.f32 %v849_v6, %v525_v2 }
 0x19e   :  { %v529_v16 = vpop.f32.mrb[68].mxu1 }
 0x19f   :  { %v530_v11 = vadd.f32 %v2125_v49, %v529_v16  ;;  %v531_v12 = vpop.f32.mrb[69].mxu1  ;;  %v854_v13 = vpop.f32.mrb[68].mxu0 }
 0x1a0   :  { %v856_v14 = vpop.f32.mrb[69].mxu0 }
 0x1a1   :  { %v2243_v15 = vadd.f32 %v854_v13, %v530_v11  ;;  %v970_v14 = vmax.f32 %v2222_v26, 0.0 }
 0x1a2   :  { %v534_v17 = vpop.f32.mrb[70].mxu1 }
 0x1a3   :  { %v535_v22 = vadd.f32 %v2125_v49, %v534_v17  ;;  %v536_v21 = vpop.f32.mrb[71].mxu1  ;;  %v859_v23 = vpop.f32.mrb[70].mxu0 }
 0x1a4   :  { %v861_v24 = vpop.f32.mrb[71].mxu0 }
 0x1a5   :  { %v2246_v25 = vadd.f32 %v859_v23, %v535_v22 }
 0x1a6   :  { %v539_v27 = vpop.f32.mrb[72].mxu1 }
 0x1a7   :  { %v540_v3 = vadd.f32 %v2125_v49, %v539_v27  ;;  %v541_v29 = vpop.f32.mrb[73].mxu1  ;;  %v864_v28 = vpop.f32.mrb[72].mxu0 }
 0x1a8   :  { %v866_v55 = vpop.f32.mrb[73].mxu0 }
 0x1a9   :  { %v2249_v33 = vadd.f32 %v864_v28, %v540_v3  ;;  %v971_v28 = vmax.f32 %v2225_v32, 0.0 }
 0x1aa   :  { %v544_v35 = vpop.f32.mrb[74].mxu1 }
 0x1ab   :  { %v545_v36 = vadd.f32 %v2125_v49, %v544_v35  ;;  %v546_v37 = vpop.f32.mrb[75].mxu1  ;;  %v869_v38 = vpop.f32.mrb[74].mxu0 }
 0x1ac   :  { %v871_v61 = vpop.f32.mrb[75].mxu0 }
 0x1ad   :  { %v2252_v41 = vadd.f32 %v869_v38, %v545_v36 }
 0x1ae   :  { %v549_v42 = vpop.f32.mrb[76].mxu1 }
 0x1af   :  { %v550_v43 = vadd.f32 %v2125_v49, %v549_v42  ;;  %v551_v44 = vpop.f32.mrb[77].mxu1  ;;  %v874_v47 = vpop.f32.mrb[76].mxu0 }
 0x1b0   :  { %v876_v0 = vpop.f32.mrb[77].mxu0 }
 0x1b1   :  { %v2255_v4 = vadd.f32 %v874_v47, %v550_v43  ;;  %v972_v43 = vmax.f32 %v2228_v34, 0.0 }
 0x1b2   :  { %v554_v51 = vpop.f32.mrb[78].mxu1 }
 0x1b3   :  { %v555_v53 = vadd.f32 %v2125_v49, %v554_v51  ;;  %v556_v56 = vpop.f32.mrb[79].mxu1  ;;  %v879_v57 = vpop.f32.mrb[78].mxu0 }
 0x1b4   :  { %v881_v58 = vpop.f32.mrb[79].mxu0 }
 0x1b5   :  { %v880_v45 = vadd.f32 %v879_v57, %v555_v53  ;;  %v973_v58 = vmax.f32 %v2231_v46, 0.0 }
 0x1b6   :  { %v559_v10 = vpop.f32.mrb[80].mxu1 }
 0x1b7   :  { %v982_v2 = vmax.f32 %v880_v45, 0.0  ;;  %v560_v5 = vadd.f32 %v2125_v49, %v559_v10  ;;  %v561_v6 = vpop.f32.mrb[81].mxu1  ;;  %v884_v7 = vpop.f32.mrb[80].mxu0 }
 0x1b8   :  { %v886_v16 = vpop.f32.mrb[81].mxu0 }
 0x1b9   :  { %v1008_v11 = vmax.f32 %v969_v1, %v982_v2  ;;  %v885_v12 = vadd.f32 %v884_v7, %v560_v5  ;;  %v974_v16 = vmax.f32 %v2234_v54, 0.0 }
 0x1ba   :  { %v564_v13 = vpop.f32.mrb[82].mxu1 }
 0x1bb   :  { %v1021_v17 = vmax.f32 %v2169_v20, %v1008_v11  ;;  %v983_v22 = vmax.f32 %v885_v12, 0.0  ;;  %v565_v21 = vadd.f32 %v2125_v49, %v564_v13  ;;  %v566_v23 = vpop.f32.mrb[83].mxu1  ;;  %v889_v24 = vpop.f32.mrb[82].mxu0 }
 0x1bc   :  { %v891_v27 = vpop.f32.mrb[83].mxu0  ;;  %v975_v23 = vmax.f32 %v2237_v63, 0.0 }
 0x1bd   :  { %1034 = vst [vmem:[%s2338_s3] sm:$0xff] %v1021_v17  ;;  %v1009_v59 = vmax.f32 %v970_v14, %v983_v22  ;;  %v890_v3 = vadd.f32 %v889_v24, %v565_v21 }
 0x1be   :  { %v569_v29 = vpop.f32.mrb[84].mxu1 }
 0x1bf   :  { %v1022_v55 = vmax.f32 %v2173_v31, %v1009_v59  ;;  %v984_v26 = vmax.f32 %v890_v3, 0.0  ;;  %v570_v20 = vadd.f32 %v2125_v49, %v569_v29  ;;  %v571_v35 = vpop.f32.mrb[85].mxu1  ;;  %v894_v36 = vpop.f32.mrb[84].mxu0 }
 0x1c0   :  { %v896_v37 = vpop.f32.mrb[85].mxu0 }
 0x1c1   :  { %1035 = vst [vmem:[%s2338_s3 + $0x8] sm:$0xff] %v1022_v55  ;;  %v1010_v38 = vmax.f32 %v971_v28, %v984_v26  ;;  %v895_v61 = vadd.f32 %v894_v36, %v570_v20  ;;  %v976_v26 = vmax.f32 %v2240_v52, 0.0 }
 0x1c2   :  { %v574_v42 = vpop.f32.mrb[86].mxu1 }
 0x1c3   :  { %v1023_v44 = vmax.f32 %v2177_v40, %v1010_v38  ;;  %v985_v32 = vmax.f32 %v895_v61, 0.0  ;;  %v575_v31 = vadd.f32 %v2125_v49, %v574_v42  ;;  %v576_v47 = vpop.f32.mrb[87].mxu1  ;;  %v899_v0 = vpop.f32.mrb[86].mxu0 }
 0x1c4   :  { %v901_v51 = vpop.f32.mrb[87].mxu0 }
 0x1c5   :  { %1036 = vst [vmem:[%s2338_s3 + $0x10] sm:$0xff] %v1023_v44  ;;  %v1011_v53 = vmax.f32 %v972_v43, %v985_v32  ;;  %v900_v56 = vadd.f32 %v899_v0, %v575_v31  ;;  %v977_v43 = vmax.f32 %v2243_v15, 0.0 }
 0x1c6   :  { %v579_v57 = vpop.f32.mrb[88].mxu1 }
 0x1c7   :  { %v1024_v45 = vmax.f32 %v2181_v50, %v1011_v53  ;;  %v986_v34 = vmax.f32 %v900_v56, 0.0  ;;  %v580_v40 = vadd.f32 %v2125_v49, %v579_v57  ;;  %v581_v10 = vpop.f32.mrb[89].mxu1  ;;  %v904_v1 = vpop.f32.mrb[88].mxu0  ;;  %v978_v56 = vmax.f32 %v2246_v25, 0.0 }
 0x1c8   :  { %v906_v2 = vpop.f32.mrb[89].mxu0 }
 0x1c9   :  { %1037 = vst [vmem:[%s2338_s3 + $0x18] sm:$0xff] %v1024_v45  ;;  %v1012_v5 = vmax.f32 %v973_v58, %v986_v34  ;;  %v905_v6 = vadd.f32 %v904_v1, %v580_v40  ;;  %v979_v2 = vmax.f32 %v2249_v33, 0.0 }
 0x1ca   :  { %v584_v7 = vpop.f32.mrb[90].mxu1 }
 0x1cb   :  { %v1025_v11 = vmax.f32 %v2185_v62, %v1012_v5  ;;  %v987_v46 = vmax.f32 %v905_v6, 0.0  ;;  %v585_v50 = vadd.f32 %v2125_v49, %v584_v7  ;;  %v586_v12 = vpop.f32.mrb[91].mxu1  ;;  %v909_v13 = vpop.f32.mrb[90].mxu0 }
 0x1cc   :  { %v911_v14 = vpop.f32.mrb[91].mxu0  ;;  %v980_v12 = vmax.f32 %v2252_v41, 0.0 }
 0x1cd   :  { %1038 = vst [vmem:[%s2338_s3 + $0x20] sm:$0xff] %v1025_v11  ;;  %v1013_v17 = vmax.f32 %v974_v16, %v987_v46  ;;  %v910_v22 = vadd.f32 %v909_v13, %v585_v50 }
 0x1ce   :  { %v589_v21 = vpop.f32.mrb[92].mxu1 }
 0x1cf   :  { %v1026_v24 = vmax.f32 %v2189_v9, %v1013_v17  ;;  %v988_v54 = vmax.f32 %v910_v22, 0.0  ;;  %v590_v62 = vadd.f32 %v2125_v49, %v589_v21  ;;  %v591_v27 = vpop.f32.mrb[93].mxu1  ;;  %v914_v59 = vpop.f32.mrb[92].mxu0 }
 0x1d0   :  { %v916_v3 = vpop.f32.mrb[93].mxu0 }
 0x1d1   :  { %1039 = vst [vmem:[%s2338_s3 + $0x28] sm:$0xff] %v1026_v24  ;;  %v1014_v29 = vmax.f32 %v975_v23, %v988_v54  ;;  %v915_v28 = vadd.f32 %v914_v59, %v590_v62  ;;  %v981_v24 = vmax.f32 %v2255_v4, 0.0 }
 0x1d2   :  { %v594_v55 = vpop.f32.mrb[94].mxu1 }
 0x1d3   :  { %v1027_v20 = vmax.f32 %v2193_v19, %v1014_v29  ;;  %v989_v63 = vmax.f32 %v915_v28, 0.0  ;;  %v595_v9 = vadd.f32 %v2125_v49, %v594_v55  ;;  %v596_v35 = vpop.f32.mrb[95].mxu1  ;;  %v919_v36 = vpop.f32.mrb[94].mxu0 }
 0x1d4   :  { %v921_v37 = vpop.f32.mrb[95].mxu0 }
 0x1d5   :  { %1040 = vst [vmem:[%s2338_s3 + $0x30] sm:$0xff] %v1027_v20  ;;  %v1015_v38 = vmax.f32 %v976_v26, %v989_v63  ;;  %v920_v61 = vadd.f32 %v919_v36, %v595_v9 }
 0x1d6   :  { %v599_v42 = vpop.f32.mrb[96].mxu1 }
 0x1d7   :  { %v1028_v44 = vmax.f32 %v2197_v30, %v1015_v38  ;;  %v990_v52 = vmax.f32 %v920_v61, 0.0  ;;  %v600_v19 = vadd.f32 %v2125_v49, %v599_v42  ;;  %v601_v32 = vpop.f32.mrb[97].mxu1  ;;  %v924_v31 = vpop.f32.mrb[96].mxu0 }
 0x1d8   :  { %v926_v47 = vpop.f32.mrb[97].mxu0 }
 0x1d9   :  { %1041 = vst [vmem:[%s2338_s3 + $0x38] sm:$0xff] %v1028_v44  ;;  %v1016_v0 = vmax.f32 %v977_v43, %v990_v52  ;;  %v925_v51 = vadd.f32 %v924_v31, %v600_v19 }
 0x1da   :  { %v604_v53 = vpop.f32.mrb[98].mxu1 }
 0x1db   :  { %v1029_v57 = vmax.f32 %v2201_v39, %v1016_v0  ;;  %v991_v15 = vmax.f32 %v925_v51, 0.0  ;;  %v605_v30 = vadd.f32 %v2125_v49, %v604_v53  ;;  %v606_v58 = vpop.f32.mrb[99].mxu1  ;;  %v929_v45 = vpop.f32.mrb[98].mxu0 }
 0x1dc   :  { %v931_v34 = vpop.f32.mrb[99].mxu0 }
 0x1dd   :  { %1042 = vst [vmem:[%s2338_s3 + $0x40] sm:$0xff] %v1029_v57  ;;  %v1017_v40 = vmax.f32 %v978_v56, %v991_v15  ;;  %v930_v10 = vadd.f32 %v929_v45, %v605_v30 }
 0x1de   :  { %v609_v1 = vpop.f32.mrb[100].mxu1 }
 0x1df   :  { %v1030_v5 = vmax.f32 %v2205_v48, %v1017_v40  ;;  %v992_v25 = vmax.f32 %v930_v10, 0.0  ;;  %v610_v39 = vadd.f32 %v2125_v49, %v609_v1  ;;  %v611_v6 = vpop.f32.mrb[101].mxu1  ;;  %v934_v7 = vpop.f32.mrb[100].mxu0 }
 0x1e0   :  { %v936_v16 = vpop.f32.mrb[101].mxu0 }
 0x1e1   :  { %1043 = vst [vmem:[%s2338_s3 + $0x48] sm:$0xff] %v1030_v5  ;;  %v1018_v11 = vmax.f32 %v979_v2, %v992_v25  ;;  %v935_v46 = vadd.f32 %v934_v7, %v610_v39 }
 0x1e2   :  { %v614_v50 = vpop.f32.mrb[102].mxu1 }
 0x1e3   :  { %v1031_v13 = vmax.f32 %v2209_v60, %v1018_v11  ;;  %v993_v33 = vmax.f32 %v935_v46, 0.0  ;;  %v615_v48 = vadd.f32 %v2125_v49, %v614_v50  ;;  %v616_v14 = vpop.f32.mrb[103].mxu1  ;;  %v939_v17 = vpop.f32.mrb[102].mxu0 }
 0x1e4   :  { %v941_v22 = vpop.f32.mrb[103].mxu0 }
 0x1e5   :  { %1044 = vst [vmem:[%s2338_s3 + $0x50] sm:$0xff] %v1031_v13  ;;  %v1019_v21 = vmax.f32 %v980_v12, %v993_v33  ;;  %v940_v23 = vadd.f32 %v939_v17, %v615_v48 }
 0x1e7   :  { %v1032_v54 = vmax.f32 %v2213_v8, %v1019_v21  ;;  %v994_v62 = vmax.f32 %v940_v23, 0.0 }
 0x1e9   :  { %1045 = vst [vmem:[%s2338_s3 + $0x58] sm:$0xff] %v1032_v54  ;;  %v1020_v60 = vmax.f32 %v981_v24, %v994_v62 }
 0x1eb   :  { %v1033_v49 = vmax.f32 %v2217_v18, %v1020_v60 }
 0x1ed   :  { %1046 = vst [vmem:[%s2338_s3 + $0x60] sm:$0xff] %v1033_v49 }

// kernel: cnn3_forward.5
= control target key start
LH: loop header
LB: loop body
LE: loop exit
PB: predicated region body
PF: predicated region fallthrough
CT: control target
= control target key end

     0   :  { %s1023_s1 = inlined_call_operand.vmem [shape: f32[384,128], index: 1, kind: input, shape index: {}]   ;;  %s1024_s0 = inlined_call_operand.vmem [shape: f32[128,384], index: 0, kind: input, shape index: {}]   ;;  %s1025_s2 = inlined_call_operand.vmem [shape: f32[1,128], index: 2, kind: input, shape index: {}]   ;;  %s1026_s3 = inlined_call_operand.vmem [shape: f32[32,128], index: 3, kind: output, shape index: {}]  }
   0x1   :  { %v78_v0 = vld [vmem:[%s1023_s1 + $0x80] sm:$0xff]  ;;  %v79_v1 = vld [vmem:[%s1023_s1 + $0x88] sm:$0xff]  ;;  %v80_v5 = vld [vmem:[%s1023_s1 + $0x90] sm:$0xff] }
   0x2   :  { %v62_v2 = vld [vmem:[%s1023_s1] sm:$0xff]  ;;  %v612_v3 = vpack.c.bf16 %v79_v1, %v78_v0  ;;  %v63_v4 = vld [vmem:[%s1023_s1 + $0x8] sm:$0xff]  ;;  %v81_v6 = vld [vmem:[%s1023_s1 + $0x98] sm:$0xff] }
   0x3   :  { %v614_v7 = vpack.c.bf16 %v63_v4, %v62_v2  ;;  %v616_v8 = vpack.c.bf16 %v81_v6, %v80_v5  ;;  %v94_v9 = vld [vmem:[%s1023_s1 + $0x100] sm:$0xff]  ;;  %v95_v10 = vld [vmem:[%s1023_s1 + $0x108] sm:$0xff]  ;;  %v64_v11 = vld [vmem:[%s1023_s1 + $0x10] sm:$0xff] }
   0x4   :  { %613 = vmatprep.subr.bf16.mxu0 %v612_v3  ;;  %v644_v12 = vpack.c.bf16 %v95_v10, %v94_v9  ;;  %v65_v13 = vld [vmem:[%s1023_s1 + $0x18] sm:$0xff]  ;;  %v82_v14 = vld [vmem:[%s1023_s1 + $0xa0] sm:$0xff]  ;;  %v83_v15 = vld [vmem:[%s1023_s1 + $0xa8] sm:$0xff] }
   0x5   :  { %615 = vmatpush3.bf16.msra.mxu0 %v614_v7  ;;  %v618_v16 = vpack.c.bf16 %v65_v13, %v64_v11  ;;  %v96_v17 = vld [vmem:[%s1023_s1 + $0x110] sm:$0xff]  ;;  %v97_v18 = vld [vmem:[%s1023_s1 + $0x118] sm:$0xff]  ;;  %v620_v19 = vpack.c.bf16 %v83_v15, %v82_v14  ;;  %v66_v21 = vld [vmem:[%s1023_s1 + $0x20] sm:$0xff] }
   0x6   :  { %617 = vmatprep.subr.bf16.mxu0 %v616_v8  ;;  %645 = vmatprep.subr.bf16.mxu1 %v644_v12  ;;  %v648_v20 = vpack.c.bf16 %v97_v18, %v96_v17  ;;  %v67_v22 = vld [vmem:[%s1023_s1 + $0x28] sm:$0xff]  ;;  %v84_v23 = vld [vmem:[%s1023_s1 + $0xb0] sm:$0xff]  ;;  %v85_v24 = vld [vmem:[%s1023_s1 + $0xb8] sm:$0xff] }
   0x7   :  { %647 = vmatpush3.bf16.msra.mxu1 %v644_v12  ;;  %v98_v25 = vld [vmem:[%s1023_s1 + $0x120] sm:$0xff]  ;;  %v99_v26 = vld [vmem:[%s1023_s1 + $0x128] sm:$0xff]  ;;  %v622_v28 = vpack.c.bf16 %v67_v22, %v66_v21  ;;  %v100_v29 = vld [vmem:[%s1023_s1 + $0x130] sm:$0xff]  ;;  %v624_v31 = vpack.c.bf16 %v85_v24, %v84_v23 }
   0x8   :  { %649 = vmatprep.subr.bf16.mxu1 %v648_v20  ;;  %v652_v27 = vpack.c.bf16 %v99_v26, %v98_v25  ;;  %v101_v30 = vld [vmem:[%s1023_s1 + $0x138] sm:$0xff]  ;;  %v68_v32 = vld [vmem:[%s1023_s1 + $0x30] sm:$0xff]  ;;  %v86_v34 = vld [vmem:[%s1023_s1 + $0xc0] sm:$0xff] }
   0x9   :  { %619 = vmatpush3.bf16.msra.mxu0 %v618_v16  ;;  %v69_v33 = vld [vmem:[%s1023_s1 + $0x38] sm:$0xff]  ;;  %v87_v35 = vld [vmem:[%s1023_s1 + $0xc8] sm:$0xff]  ;;  %v656_v36 = vpack.c.bf16 %v101_v30, %v100_v29  ;;  %v102_v38 = vld [vmem:[%s1023_s1 + $0x140] sm:$0xff] }
   0xa   :  { %621 = vmatprep.subr.bf16.mxu0 %v620_v19  ;;  %v626_v37 = vpack.c.bf16 %v69_v33, %v68_v32  ;;  %v103_v39 = vld [vmem:[%s1023_s1 + $0x148] sm:$0xff]  ;;  %v628_v40 = vpack.c.bf16 %v87_v35, %v86_v34  ;;  %v70_v41 = vld [vmem:[%s1023_s1 + $0x40] sm:$0xff]  ;;  %v88_v43 = vld [vmem:[%s1023_s1 + $0xd0] sm:$0xff] }
   0xb   :  { %651 = vmatpush3.bf16.msra.mxu1 %v648_v20  ;;  %v71_v42 = vld [vmem:[%s1023_s1 + $0x48] sm:$0xff]  ;;  %v89_v44 = vld [vmem:[%s1023_s1 + $0xd8] sm:$0xff]  ;;  %v660_v45 = vpack.c.bf16 %v103_v39, %v102_v38  ;;  %v104_v48 = vld [vmem:[%s1023_s1 + $0x150] sm:$0xff] }
   0xc   :  { %653 = vmatprep.subr.bf16.mxu1 %v652_v27  ;;  %v15_v46 = vld [vmem:[%s1024_s0 + $0x8] sm:$0xff]  ;;  %v630_v47 = vpack.c.bf16 %v71_v42, %v70_v41  ;;  %v105_v49 = vld [vmem:[%s1023_s1 + $0x158] sm:$0xff]  ;;  %v632_v50 = vpack.c.bf16 %v89_v44, %v88_v43  ;;  %v72_v51 = vld [vmem:[%s1023_s1 + $0x50] sm:$0xff] }
   0xd   :  { %623 = vmatpush3.bf16.msra.mxu0 %v622_v28  ;;  %181 = vmatprep.mubr.f32.mxu0 %v15_v46  ;;  %v73_v52 = vld [vmem:[%s1023_s1 + $0x58] sm:$0xff]  ;;  %v16_v53 = vld [vmem:[%s1024_s0 + $0x10] sm:$0xff]  ;;  %v90_v54 = vld [vmem:[%s1023_s1 + $0xe0] sm:$0xff]  ;;  %v664_v56 = vpack.c.bf16 %v105_v49, %v104_v48 }
   0xe   :  { %625 = vmatprep.subr.bf16.mxu0 %v624_v31  ;;  %v91_v55 = vld [vmem:[%s1023_s1 + $0xe8] sm:$0xff]  ;;  %588 = vmatprep.mubr.f32.mxu1 %v16_v53  ;;  %v634_v57 = vpack.c.bf16 %v73_v52, %v72_v51  ;;  %v106_v58 = vld [vmem:[%s1023_s1 + $0x160] sm:$0xff]  ;;  %v92_v63 = vld [vmem:[%s1023_s1 + $0xf0] sm:$0xff] }
   0xf   :  { %655 = vmatpush3.bf16.msra.mxu1 %v652_v27  ;;  %v107_v59 = vld [vmem:[%s1023_s1 + $0x168] sm:$0xff]  ;;  %v636_v60 = vpack.c.bf16 %v91_v55, %v90_v54  ;;  %v74_v61 = vld [vmem:[%s1023_s1 + $0x60] sm:$0xff]  ;;  %v93_v0 = vld [vmem:[%s1023_s1 + $0xf8] sm:$0xff] }
  0x10   :  { %657 = vmatprep.subr.bf16.mxu1 %v656_v36  ;;  %v75_v62 = vld [vmem:[%s1023_s1 + $0x68] sm:$0xff]  ;;  %v668_v1 = vpack.c.bf16 %v107_v59, %v106_v58  ;;  %v108_v3 = vld [vmem:[%s1023_s1 + $0x170] sm:$0xff]  ;;  %v109_v4 = vld [vmem:[%s1023_s1 + $0x178] sm:$0xff]  ;;  %v640_v5 = vpack.c.bf16 %v93_v0, %v92_v63 }
  0x11   :  { %627 = vmatpush3.bf16.msra.mxu0 %v626_v37  ;;  %v638_v2 = vpack.c.bf16 %v75_v62, %v74_v61  ;;  %v76_v6 = vld [vmem:[%s1023_s1 + $0x70] sm:$0xff]  ;;  %v77_v7 = vld [vmem:[%s1023_s1 + $0x78] sm:$0xff]  ;;  %v672_v8 = vpack.c.bf16 %v109_v4, %v108_v3  ;;  %v14_v10 = vld [vmem:[%s1024_s0] sm:$0xff] }
  0x12   :  { %629 = vmatprep.subr.bf16.mxu0 %v628_v40  ;;  %v642_v9 = vpack.c.bf16 %v77_v7, %v76_v6  ;;  %v18_v11 = vld [vmem:[%s1024_s0 + $0x20] sm:$0xff]  ;;  %v19_v12 = vld [vmem:[%s1024_s0 + $0x28] sm:$0xff]  ;;  %v17_v14 = vld [vmem:[%s1024_s0 + $0x18] sm:$0xff] }
  0x13   :  { %659 = vmatpush3.bf16.msra.mxu1 %v656_v36  ;;  %v22_v13 = vld [vmem:[%s1024_s0 + $0x40] sm:$0xff]  ;;  %v21_v15 = vld [vmem:[%s1024_s0 + $0x38] sm:$0xff]  ;;  %v28_v17 = vld [vmem:[%s1024_s0 + $0x70] sm:$0xff] }
  0x14   :  { %661 = vmatprep.subr.bf16.mxu1 %v660_v45  ;;  %v25_v16 = vld [vmem:[%s1024_s0 + $0x58] sm:$0xff]  ;;  %v20_v18 = vld [vmem:[%s1024_s0 + $0x30] sm:$0xff]  ;;  %v31_v20 = vld [vmem:[%s1024_s0 + $0x88] sm:$0xff] }
  0x15   :  { %631 = vmatpush3.bf16.msra.mxu0 %v630_v47  ;;  %v24_v19 = vld [vmem:[%s1024_s0 + $0x50] sm:$0xff]  ;;  %v34_v21 = vld [vmem:[%s1024_s0 + $0xa0] sm:$0xff]  ;;  %v23_v22 = vld [vmem:[%s1024_s0 + $0x48] sm:$0xff] }
  0x16   :  { %633 = vmatprep.subr.bf16.mxu0 %v632_v50  ;;  %v27_v23 = vld [vmem:[%s1024_s0 + $0x68] sm:$0xff]  ;;  %v37_v24 = vld [vmem:[%s1024_s0 + $0xb8] sm:$0xff]  ;;  %v40_v25 = vld [vmem:[%s1024_s0 + $0xd0] sm:$0xff] }
  0x17   :  { %663 = vmatpush3.bf16.msra.mxu1 %v660_v45  ;;  %v26_v26 = vld [vmem:[%s1024_s0 + $0x60] sm:$0xff]  ;;  %v43_v28 = vld [vmem:[%s1024_s0 + $0xe8] sm:$0xff]  ;;  %v29_v30 = vld [vmem:[%s1024_s0 + $0x78] sm:$0xff] }
  0x18   :  { %665 = vmatprep.subr.bf16.mxu1 %v664_v56  ;;  %v30_v27 = vld [vmem:[%s1024_s0 + $0x80] sm:$0xff]  ;;  %v33_v31 = vld [vmem:[%s1024_s0 + $0x98] sm:$0xff]  ;;  %v52_v33 = vld [vmem:[%s1024_s0 + $0x130] sm:$0xff] }
  0x19   :  { %635 = vmatpush3.bf16.msra.mxu0 %v634_v57  ;;  %v46_v29 = vld [vmem:[%s1024_s0 + $0x100] sm:$0xff]  ;;  %v49_v32 = vld [vmem:[%s1024_s0 + $0x118] sm:$0xff]  ;;  %v32_v34 = vld [vmem:[%s1024_s0 + $0x90] sm:$0xff] }
  0x1a   :  { %637 = vmatprep.subr.bf16.mxu0 %v636_v60  ;;  %v36_v35 = vld [vmem:[%s1024_s0 + $0xb0] sm:$0xff]  ;;  %v55_v36 = vld [vmem:[%s1024_s0 + $0x148] sm:$0xff]  ;;  %v58_v37 = vld [vmem:[%s1024_s0 + $0x160] sm:$0xff] }
  0x1b   :  { %667 = vmatpush3.bf16.msra.mxu1 %v664_v56  ;;  %v35_v38 = vld [vmem:[%s1024_s0 + $0xa8] sm:$0xff]  ;;  %v61_v40 = vld [vmem:[%s1024_s0 + $0x178] sm:$0xff]  ;;  %v38_v41 = vld [vmem:[%s1024_s0 + $0xc0] sm:$0xff] }
  0x1c   :  { %669 = vmatprep.subr.bf16.mxu1 %v668_v1  ;;  %v39_v39 = vld [vmem:[%s1024_s0 + $0xc8] sm:$0xff]  ;;  %v42_v42 = vld [vmem:[%s1024_s0 + $0xe0] sm:$0xff]  ;;  %v41_v43 = vld [vmem:[%s1024_s0 + $0xd8] sm:$0xff] }
  0x1d   :  { %639 = vmatpush3.bf16.msra.mxu0 %v638_v2  ;;  %v45_v44 = vld [vmem:[%s1024_s0 + $0xf8] sm:$0xff]  ;;  %v44_v45 = vld [vmem:[%s1024_s0 + $0xf0] sm:$0xff]  ;;  %v47_v47 = vld [vmem:[%s1024_s0 + $0x108] sm:$0xff] }
  0x1e   :  { %641 = vmatprep.subr.bf16.mxu0 %v640_v5  ;;  %v48_v46 = vld [vmem:[%s1024_s0 + $0x110] sm:$0xff]  ;;  %v51_v48 = vld [vmem:[%s1024_s0 + $0x128] sm:$0xff]  ;;  %v50_v49 = vld [vmem:[%s1024_s0 + $0x120] sm:$0xff] }
  0x1f   :  { %671 = vmatpush3.bf16.msra.mxu1 %v668_v1  ;;  %v54_v50 = vld [vmem:[%s1024_s0 + $0x140] sm:$0xff]  ;;  %v53_v51 = vld [vmem:[%s1024_s0 + $0x138] sm:$0xff]  ;;  %v56_v53 = vld [vmem:[%s1024_s0 + $0x150] sm:$0xff] }
  0x20   :  { %673 = vmatprep.subr.bf16.mxu1 %v672_v8  ;;  %v57_v52 = vld [vmem:[%s1024_s0 + $0x158] sm:$0xff]  ;;  %v60_v54 = vld [vmem:[%s1024_s0 + $0x170] sm:$0xff]  ;;  %v59_v55 = vld [vmem:[%s1024_s0 + $0x168] sm:$0xff] }
  0x21   :  { %643 = vmatpush3.bf16.msra.mxu0 %v642_v9  ;;  %v987_v58 = vld [vmem:[%s1025_s2] ss:$0 sm:$0xff] }
  0x23   :  { %675 = vmatpush3.bf16.msra.mxu1 %v672_v8 }
  0x24   :  { %182 = vmatmul.mubr.f32.vlgmr.msra.gmra.mrb[0].mxu0 %v14_v10 }
  0x25   :  { %186 = vmatprep.mubr.f32.mxu0 %v18_v11 }
  0x26   :  { %589 = vmatmul.mubr.f32.vlgmr.msra.gmra.mrb[0].mxu1 %v19_v12 }
  0x27   :  { %591 = vmatprep.mubr.f32.mxu1 %v22_v13 }
  0x28   :  { %187 = vmatmul.mubr.f32.gmra.mrb[2].mxu0 %v17_v14 }
  0x29   :  { %191 = vmatprep.mubr.f32.mxu0 %v21_v15 }
  0x2a   :  { %592 = vmatmul.mubr.f32.gmra.mrb[2].mxu1 %v25_v16 }
  0x2b   :  { %594 = vmatprep.mubr.f32.mxu1 %v28_v17 }
  0x2c   :  { %192 = vmatmul.mubr.f32.gmra.mrb[4].mxu0 %v20_v18 }
  0x2d   :  { %196 = vmatprep.mubr.f32.mxu0 %v24_v19 }
  0x2e   :  { %595 = vmatmul.mubr.f32.gmra.mrb[4].mxu1 %v31_v20 }
  0x2f   :  { %597 = vmatprep.mubr.f32.mxu1 %v34_v21 }
  0x30   :  { %197 = vmatmul.mubr.f32.gmra.mrb[6].mxu0 %v23_v22 }
  0x31   :  { %201 = vmatprep.mubr.f32.mxu0 %v27_v23 }
  0x32   :  { %598 = vmatmul.mubr.f32.gmra.mrb[6].mxu1 %v37_v24 }
  0x33   :  { %600 = vmatprep.mubr.f32.mxu1 %v40_v25 }
  0x34   :  { %202 = vmatmul.mubr.f32.gmra.mrb[8].mxu0 %v26_v26 }
  0x35   :  { %206 = vmatprep.mubr.f32.mxu0 %v30_v27 }
  0x36   :  { %601 = vmatmul.mubr.f32.gmra.mrb[8].mxu1 %v43_v28 }
  0x37   :  { %603 = vmatprep.mubr.f32.mxu1 %v46_v29 }
  0x38   :  { %207 = vmatmul.mubr.f32.gmra.mrb[10].mxu0 %v29_v30 }
  0x39   :  { %211 = vmatprep.mubr.f32.mxu0 %v33_v31 }
  0x3a   :  { %604 = vmatmul.mubr.f32.gmra.mrb[10].mxu1 %v49_v32 }
  0x3b   :  { %606 = vmatprep.mubr.f32.mxu1 %v52_v33 }
  0x3c   :  { %212 = vmatmul.mubr.f32.gmra.mrb[12].mxu0 %v32_v34 }
  0x3d   :  { %216 = vmatprep.mubr.f32.mxu0 %v36_v35 }
  0x3e   :  { %607 = vmatmul.mubr.f32.gmra.mrb[12].mxu1 %v55_v36 }
  0x3f   :  { %609 = vmatprep.mubr.f32.mxu1 %v58_v37 }
  0x40   :  { %217 = vmatmul.mubr.f32.gmra.mrb[14].mxu0 %v35_v38 }
  0x41   :  { %221 = vmatprep.mubr.f32.mxu0 %v39_v39 }
  0x42   :  { %610 = vmatmul.mubr.f32.gmra.mrb[14].mxu1 %v61_v40 }
  0x44   :  { %222 = vmatmul.mubr.f32.gmra.mrb[16].mxu0 %v38_v41 }
  0x45   :  { %226 = vmatprep.mubr.f32.mxu0 %v42_v42 }
  0x48   :  { %227 = vmatmul.mubr.f32.gmra.mrb[18].mxu0 %v41_v43 }
  0x49   :  { %231 = vmatprep.mubr.f32.mxu0 %v45_v44 }
  0x4c   :  { %232 = vmatmul.mubr.f32.gmra.mrb[20].mxu0 %v44_v45 }
  0x4d   :  { %236 = vmatprep.mubr.f32.mxu0 %v48_v46 }
  0x50   :  { %237 = vmatmul.mubr.f32.gmra.mrb[22].mxu0 %v47_v47 }
  0x51   :  { %241 = vmatprep.mubr.f32.mxu0 %v51_v48 }
  0x54   :  { %242 = vmatmul.mubr.f32.gmra.mrb[24].mxu0 %v50_v49 }
  0x55   :  { %246 = vmatprep.mubr.f32.mxu0 %v54_v50 }
  0x58   :  { %247 = vmatmul.mubr.f32.gmra.mrb[26].mxu0 %v53_v51 }
  0x59   :  { %251 = vmatprep.mubr.f32.mxu0 %v57_v52 }
  0x5c   :  { %252 = vmatmul.mubr.f32.gmra.mrb[28].mxu0 %v56_v53 }
  0x5d   :  { %256 = vmatprep.mubr.f32.mxu0 %v60_v54 }
  0x60   :  { %257 = vmatmul.mubr.f32.gmra.mrb[30].mxu0 %v59_v55 }
  0xf7   :  { %v476_v56 = vpop.f32.mrb[0].mxu0 }
  0xf8   :  { %v477_v57 = vpop.f32.mrb[1].mxu0 }
  0xf9   :  { %v478_v59 = vadd.f32 %v477_v57, %v476_v56  ;;  %v590_v60 = vpop.f32.mrb[0].mxu1 }
  0xfa   :  { %v328_v61 = vpop.f32.mrb[1].mxu1 }
  0xfb   :  { %v479_v62 = vpop.f32.mrb[2].mxu0  ;;  %v184_v63 = vadd.f32 %v478_v59, %v987_v58 }
  0xfc   :  { %v480_v0 = vpop.f32.mrb[3].mxu0 }
  0xfd   :  { %v481_v1 = vadd.f32 %v480_v0, %v479_v62  ;;  %v329_v2 = vadd.f32 %v328_v61, %v184_v63  ;;  %v593_v3 = vpop.f32.mrb[2].mxu1 }
  0xfe   :  { %v338_v4 = vpop.f32.mrb[3].mxu1 }
  0xff   :  { %v189_v5 = vadd.f32 %v481_v1, %v987_v58  ;;  %v482_v6 = vpop.f32.mrb[4].mxu0  ;;  %v407_v33 = vmax.f32 %v329_v2, 0.0 }
 0x100   :  { %v483_v7 = vpop.f32.mrb[5].mxu0 }
 0x101   :  { %v334_v8 = vadd.f32 %v590_v60, %v189_v5  ;;  %v484_v9 = vadd.f32 %v483_v7, %v482_v6  ;;  %v596_v10 = vpop.f32.mrb[4].mxu1 }
 0x102   :  { %v348_v11 = vpop.f32.mrb[5].mxu1 }
 0x103   :  { %v485_v12 = vpop.f32.mrb[6].mxu0  ;;  %v194_v13 = vadd.f32 %v484_v9, %v987_v58  ;;  %v408_v43 = vmax.f32 %v334_v8, 0.0 }
 0x104   :  { %v486_v14 = vpop.f32.mrb[7].mxu0 }
 0x105   :  { %v487_v15 = vadd.f32 %v486_v14, %v485_v12  ;;  %v339_v16 = vadd.f32 %v338_v4, %v194_v13  ;;  %v599_v17 = vpop.f32.mrb[6].mxu1 }
 0x106   :  { %v358_v18 = vpop.f32.mrb[7].mxu1 }
 0x107   :  { %v199_v19 = vadd.f32 %v487_v15, %v987_v58  ;;  %v488_v20 = vpop.f32.mrb[8].mxu0  ;;  %v409_v53 = vmax.f32 %v339_v16, 0.0 }
 0x108   :  { %v489_v21 = vpop.f32.mrb[9].mxu0 }
 0x109   :  { %v344_v22 = vadd.f32 %v593_v3, %v199_v19  ;;  %v490_v23 = vadd.f32 %v489_v21, %v488_v20  ;;  %v602_v24 = vpop.f32.mrb[8].mxu1 }
 0x10a   :  { %v368_v25 = vpop.f32.mrb[9].mxu1 }
 0x10b   :  { %v491_v26 = vpop.f32.mrb[10].mxu0  ;;  %v204_v27 = vadd.f32 %v490_v23, %v987_v58  ;;  %v410_v62 = vmax.f32 %v344_v22, 0.0 }
 0x10c   :  { %v492_v28 = vpop.f32.mrb[11].mxu0 }
 0x10d   :  { %v493_v29 = vadd.f32 %v492_v28, %v491_v26  ;;  %v349_v30 = vadd.f32 %v348_v11, %v204_v27  ;;  %v605_v31 = vpop.f32.mrb[10].mxu1 }
 0x10e   :  { %v378_v32 = vpop.f32.mrb[11].mxu1 }
 0x10f   :  { %v209_v34 = vadd.f32 %v493_v29, %v987_v58  ;;  %v411_v35 = vmax.f32 %v349_v30, 0.0  ;;  %v494_v36 = vpop.f32.mrb[12].mxu0 }
 0x110   :  { %v495_v37 = vpop.f32.mrb[13].mxu0 }
 0x111   :  { %v354_v38 = vadd.f32 %v596_v10, %v209_v34  ;;  %v995_v39 = vmax.f32 %v407_v33, %v411_v35  ;;  %v496_v40 = vadd.f32 %v495_v37, %v494_v36  ;;  %v608_v41 = vpop.f32.mrb[12].mxu1 }
 0x112   :  { %v388_v42 = vpop.f32.mrb[13].mxu1 }
 0x113   :  { %v412_v44 = vmax.f32 %v354_v38, 0.0  ;;  %v497_v45 = vpop.f32.mrb[14].mxu0  ;;  %v214_v46 = vadd.f32 %v496_v40, %v987_v58 }
 0x114   :  { %v498_v47 = vpop.f32.mrb[15].mxu0 }
 0x115   :  { %v998_v48 = vmax.f32 %v408_v43, %v412_v44  ;;  %v499_v49 = vadd.f32 %v498_v47, %v497_v45  ;;  %v359_v50 = vadd.f32 %v358_v18, %v214_v46  ;;  %v611_v51 = vpop.f32.mrb[14].mxu1 }
 0x116   :  { %v398_v52 = vpop.f32.mrb[15].mxu1 }
 0x117   :  { %v219_v54 = vadd.f32 %v499_v49, %v987_v58  ;;  %v413_v55 = vmax.f32 %v359_v50, 0.0  ;;  %v500_v56 = vpop.f32.mrb[16].mxu0 }
 0x118   :  { %v501_v57 = vpop.f32.mrb[17].mxu0 }
 0x119   :  { %v364_v59 = vadd.f32 %v599_v17, %v219_v54  ;;  %v425_v60 = vmax.f32 %v409_v53, %v413_v55  ;;  %v502_v61 = vadd.f32 %v501_v57, %v500_v56 }
 0x11b   :  { %v414_v63 = vmax.f32 %v364_v59, 0.0  ;;  %v503_v0 = vpop.f32.mrb[18].mxu0  ;;  %v224_v1 = vadd.f32 %v502_v61, %v987_v58 }
 0x11c   :  { %v504_v2 = vpop.f32.mrb[19].mxu0 }
 0x11d   :  { %v426_v3 = vmax.f32 %v410_v62, %v414_v63  ;;  %v505_v4 = vadd.f32 %v504_v2, %v503_v0  ;;  %v369_v5 = vadd.f32 %v368_v25, %v224_v1 }
 0x11f   :  { %v229_v6 = vadd.f32 %v505_v4, %v987_v58  ;;  %v506_v7 = vpop.f32.mrb[20].mxu0 }
 0x120   :  { %v507_v8 = vpop.f32.mrb[21].mxu0 }
 0x121   :  { %v374_v9 = vadd.f32 %v602_v24, %v229_v6  ;;  %v508_v10 = vadd.f32 %v507_v8, %v506_v7  ;;  %v415_v24 = vmax.f32 %v369_v5, 0.0 }
 0x123   :  { %v509_v11 = vpop.f32.mrb[22].mxu0  ;;  %v234_v12 = vadd.f32 %v508_v10, %v987_v58  ;;  %v416_v35 = vmax.f32 %v374_v9, 0.0 }
 0x124   :  { %v510_v13 = vpop.f32.mrb[23].mxu0 }
 0x125   :  { %v511_v14 = vadd.f32 %v510_v13, %v509_v11  ;;  %v379_v15 = vadd.f32 %v378_v32, %v234_v12 }
 0x127   :  { %v239_v16 = vadd.f32 %v511_v14, %v987_v58  ;;  %v512_v17 = vpop.f32.mrb[24].mxu0  ;;  %v417_v45 = vmax.f32 %v379_v15, 0.0 }
 0x128   :  { %v513_v18 = vpop.f32.mrb[25].mxu0 }
 0x129   :  { %v384_v19 = vadd.f32 %v605_v31, %v239_v16  ;;  %v514_v20 = vadd.f32 %v513_v18, %v512_v17 }
 0x12b   :  { %v515_v21 = vpop.f32.mrb[26].mxu0  ;;  %v244_v22 = vadd.f32 %v514_v20, %v987_v58  ;;  %v418_v50 = vmax.f32 %v384_v19, 0.0 }
 0x12c   :  { %v516_v23 = vpop.f32.mrb[27].mxu0 }
 0x12d   :  { %v517_v25 = vadd.f32 %v516_v23, %v515_v21  ;;  %v389_v26 = vadd.f32 %v388_v42, %v244_v22 }
 0x12f   :  { %v249_v27 = vadd.f32 %v517_v25, %v987_v58  ;;  %v419_v28 = vmax.f32 %v389_v26, 0.0  ;;  %v518_v29 = vpop.f32.mrb[28].mxu0 }
 0x130   :  { %v519_v30 = vpop.f32.mrb[29].mxu0 }
 0x131   :  { %v394_v33 = vadd.f32 %v608_v41, %v249_v27  ;;  %v427_v32 = vmax.f32 %v415_v24, %v419_v28  ;;  %v520_v34 = vadd.f32 %v519_v30, %v518_v29 }
 0x133   :  { %v420_v36 = vmax.f32 %v394_v33, 0.0  ;;  %v431_v31 = vmax.f32 %v995_v39, %v427_v32  ;;  %v521_v37 = vpop.f32.mrb[30].mxu0  ;;  %v254_v38 = vadd.f32 %v520_v34, %v987_v58 }
 0x134   :  { %v522_v40 = vpop.f32.mrb[31].mxu0 }
 0x135   :  { %v428_v43 = vmax.f32 %v416_v35, %v420_v36  ;;  %435 = vst [vmem:[%s1026_s3] sm:$0xff] %v431_v31  ;;  %v523_v42 = vadd.f32 %v522_v40, %v521_v37  ;;  %v399_v44 = vadd.f32 %v398_v52, %v254_v38 }
 0x137   :  { %v432_v41 = vmax.f32 %v998_v48, %v428_v43  ;;  %v259_v46 = vadd.f32 %v523_v42, %v987_v58  ;;  %v421_v47 = vmax.f32 %v399_v44, 0.0 }
 0x139   :  { %436 = vst [vmem:[%s1026_s3 + $0x8] sm:$0xff] %v432_v41  ;;  %v404_v39 = vadd.f32 %v611_v51, %v259_v46  ;;  %v429_v49 = vmax.f32 %v417_v45, %v421_v47 }
 0x13b   :  { %v422_v53 = vmax.f32 %v404_v39, 0.0  ;;  %v433_v54 = vmax.f32 %v425_v60, %v429_v49 }
 0x13d   :  { %v430_v55 = vmax.f32 %v418_v50, %v422_v53  ;;  %437 = vst [vmem:[%s1026_s3 + $0x10] sm:$0xff] %v433_v54 }
 0x13f   :  { %v434_v52 = vmax.f32 %v426_v3, %v430_v55 }
 0x141   :  { %438 = vst [vmem:[%s1026_s3 + $0x18] sm:$0xff] %v434_v52 }

</bundles_post_ra>
